<compile_context>
chip_gen: v7x
topology: tpu7x:2x2x1
jax: 0.10.0
libtpu: 0.0.40
codegen_flags: <defaults>
</compile_context>

<pallas_src>
import math

import jax
import jax.numpy as jnp
from jax.experimental import pallas as pl
from jax.experimental.pallas import tpu as pltpu

# ----------------------------- small config ---------------------------------
B = 2            # batch
S = 8            # sequence length
D = 32           # hidden size (config.dim)
NH = 4           # attention heads
HD = D // NH     # head dim
FF = 64          # FFN hidden dim
NL = 2           # transformer layers
VOCAB = 100      # vocab size
MAXPOS = 16      # max position embeddings
ENC = 32         # encoding_dim of the pair head
EPS = 1e-12      # LayerNorm eps (DistilBERT default)
R = 2 * B * S    # all token rows: [left batch ; right batch] x seq, flattened


# ------------------------------- kernel --------------------------------------
def _layernorm(x, g, b):
    mu = jnp.mean(x, axis=-1, keepdims=True)
    var = jnp.mean(jnp.square(x - mu), axis=-1, keepdims=True)
    return (x - mu) * jax.lax.rsqrt(var + EPS) * g + b


def fused_forward_kernel(h0_ref, maskadd_ref, embg_ref, embb_ref,
                         wqkv_ref, bqkv_ref, wo_ref, bo_ref,
                         ln1g_ref, ln1b_ref, w1_ref, b1_ref,
                         w2_ref, b2_ref, ln2g_ref, ln2b_ref,
                         prew_ref, preb_ref, clsw_ref, clsb_ref, o_ref):
    # -------------------------------------------------------------- embeddings
    h = _layernorm(h0_ref[...], embg_ref[...], embb_ref[...])     # (R, D)
    mask_add = maskadd_ref[...]                                   # (R, R)
    scale = 1.0 / math.sqrt(HD)

    # ----------------------------------------------------------------- encoder
    for l in range(NL):                                           # static unroll
        # fused Q/K/V projection: one (R, D) @ (D, 3D) MXU op
        qkv = (jnp.dot(h, wqkv_ref[l], preferred_element_type=jnp.float32)
               + bqkv_ref[l])                                     # (R, 3D)
        q = qkv[:, 0:D]
        k = qkv[:, D:2 * D]
        v = qkv[:, 2 * D:3 * D]

        ctx_heads = []
        for hh in range(NH):                                      # static heads
            lo, hi = hh * HD, (hh + 1) * HD
            scores = jax.lax.dot_general(
                q[:, lo:hi], k[:, lo:hi], (((1,), (1,)), ((), ())),
                preferred_element_type=jnp.float32)               # (R, R)
            probs = jax.nn.softmax(scores * scale + mask_add, axis=-1)
            ctx_heads.append(jnp.dot(probs, v[:, lo:hi],
                                     preferred_element_type=jnp.float32))
        ctx = jnp.concatenate(ctx_heads, axis=-1)                 # (R, D)
        # single output projection on the concatenated context
        attn = (jnp.dot(ctx, wo_ref[l], preferred_element_type=jnp.float32)
                + bo_ref[l])
        h = _layernorm(h + attn, ln1g_ref[l], ln1b_ref[l])

        # TODO(synk): HF DistilBERT uses exact erf-GELU; tanh approximation here.
        ff = (jnp.dot(h, w1_ref[l], preferred_element_type=jnp.float32)
              + b1_ref[l])
        ff = jax.nn.gelu(ff, approximate=True)
        ff = (jnp.dot(ff, w2_ref[l], preferred_element_type=jnp.float32)
              + b2_ref[l])
        h = _layernorm(h + ff, ln2g_ref[l], ln2b_ref[l])

    # --------------------------------------------------------------- pair head
    # pooled_output = hidden_state[:, 0]: pick row b*S of every stacked sequence
    # via a tiny selection matmul (avoids a strided sublane gather).
    row_id = jax.lax.broadcasted_iota(jnp.int32, (2 * B, R), 0)
    col_id = jax.lax.broadcasted_iota(jnp.int32, (2 * B, R), 1)
    sel = (col_id == row_id * S).astype(jnp.float32)              # (2B, R)
    pooled = jnp.dot(sel, h, preferred_element_type=jnp.float32)  # (2B, D)

    pre = (jnp.dot(pooled, prew_ref[...], preferred_element_type=jnp.float32)
           + preb_ref[...])                                       # (2B, ENC)
    left = pre[0:B, :]
    right = pre[B:2 * B, :]
    prod = left * right
    # ReLU(concat([l, r, p])) == concat of per-part ReLUs; dropout = eval identity.
    l_r = jnp.maximum(left, 0.0)
    r_r = jnp.maximum(right, 0.0)
    p_r = jnp.maximum(prod, 0.0)
    # classifier (3*ENC -> 1): VPU multiply + lane reduction (no 1-column matmul)
    contrib = (l_r * clsw_ref[0:1, :]
               + r_r * clsw_ref[1:2, :]
               + p_r * clsw_ref[2:3, :])                          # (B, ENC)
    o_ref[...] = jnp.sum(contrib, axis=-1, keepdims=True) + clsb_ref[...]


# ------------------------------ wrappers --------------------------------------
_VMEM = pl.BlockSpec(memory_space=pltpu.MemorySpace.VMEM)


def fused_forward(h0, mask_add, p):
    args = (h0, mask_add, p["emb_ln_g"], p["emb_ln_b"],
            p["wqkv"], p["bqkv"], p["wo"], p["bo"],
            p["ln1_g"], p["ln1_b"], p["w1"], p["b1"],
            p["w2"], p["b2"], p["ln2_g"], p["ln2_b"],
            p["pre_w"], p["pre_b"], p["cls_w3"], p["cls_b"])
    return pl.pallas_call(
        fused_forward_kernel,
        out_shape=jax.ShapeDtypeStruct((B, 1), jnp.float32),
        in_specs=[_VMEM] * len(args),
        out_specs=_VMEM,
    )(*args)


def forward(features_left, mask_left, features_right, mask_right, params):
    # stack left/right on the leading axis: sequences 0..B-1 = left, B..2B-1 = right
    ids = jnp.concatenate([features_left, features_right], axis=0)       # (2B, S)
    mask = jnp.concatenate([mask_left, mask_right], axis=0)              # (2B, S)

    # embeddings: word + position (table gather is plain-JAX glue)
    h0 = params["word_emb"][ids] + params["pos_emb"][:S][None, :, :]     # (2B, S, D)
    h0 = h0.reshape(R, D).astype(jnp.float32)

    # additive attention mask (glue, pure mask prep): block-diagonal so tokens
    # only attend inside their own sequence, plus key-padding mask.
    seq_id = jnp.repeat(jnp.arange(2 * B), S)                            # (R,)
    keep = (seq_id[:, None] == seq_id[None, :]) & (mask.reshape(R)[None, :] > 0)
    mask_add = jnp.where(keep, 0.0, -1e9).astype(jnp.float32)            # (R, R)

    return fused_forward(h0, mask_add, params)                           # (B, 1)


# ----------------------------- parameter init ---------------------------------
def init_params(key):
    def dense(k, shape, scale=0.02):
        return (scale * jax.random.normal(k, shape)).astype(jnp.float32)

    keys = iter(jax.random.split(key, 8 * NL + 8))
    params = {
        "word_emb": dense(next(keys), (VOCAB, D)),
        "pos_emb": dense(next(keys), (MAXPOS, D)),
        "emb_ln_g": jnp.ones((1, D), jnp.float32),
        "emb_ln_b": jnp.zeros((1, D), jnp.float32),
        "pre_w": dense(next(keys), (D, ENC)),          # nn.Linear(dim, ENC)
        "pre_b": jnp.zeros((1, ENC), jnp.float32),
        "cls_w": dense(next(keys), (3 * ENC, 1)),      # nn.Linear(3*ENC, 1)
        "cls_b": jnp.zeros((1, 1), jnp.float32),
        "layers": [],
    }
    for _ in range(NL):
        layer = {
            "wq": dense(next(keys), (D, D)), "bq": jnp.zeros((1, D), jnp.float32),
            "wk": dense(next(keys), (D, D)), "bk": jnp.zeros((1, D), jnp.float32),
            "wv": dense(next(keys), (D, D)), "bv": jnp.zeros((1, D), jnp.float32),
            "wo": dense(next(keys), (D, D)), "bo": jnp.zeros((1, D), jnp.float32),
            "ln1_g": jnp.ones((1, D), jnp.float32),
            "ln1_b": jnp.zeros((1, D), jnp.float32),
            "w1": dense(next(keys), (D, FF)), "b1": jnp.zeros((1, FF), jnp.float32),
            "w2": dense(next(keys), (FF, D)), "b2": jnp.zeros((1, D), jnp.float32),
            "ln2_g": jnp.ones((1, D), jnp.float32),
            "ln2_b": jnp.zeros((1, D), jnp.float32),
        }
        params["layers"].append(layer)
    return params


def pack_params(params):
    """Stack per-layer weights on a leading NL axis and fuse Q|K|V so the whole
    encoder + pair head runs inside one pallas_call with VMEM-resident weights."""
    layers = params["layers"]

    def stack(fn):
        return jnp.stack([fn(lp) for lp in layers], axis=0)

    return {
        "word_emb": params["word_emb"], "pos_emb": params["pos_emb"],
        "emb_ln_g": params["emb_ln_g"], "emb_ln_b": params["emb_ln_b"],
        "wqkv": stack(lambda lp: jnp.concatenate([lp["wq"], lp["wk"], lp["wv"]], axis=1)),
        "bqkv": stack(lambda lp: jnp.concatenate([lp["bq"], lp["bk"], lp["bv"]], axis=1)),
        "wo": stack(lambda lp: lp["wo"]), "bo": stack(lambda lp: lp["bo"]),
        "ln1_g": stack(lambda lp: lp["ln1_g"]), "ln1_b": stack(lambda lp: lp["ln1_b"]),
        "w1": stack(lambda lp: lp["w1"]), "b1": stack(lambda lp: lp["b1"]),
        "w2": stack(lambda lp: lp["w2"]), "b2": stack(lambda lp: lp["b2"]),
        "ln2_g": stack(lambda lp: lp["ln2_g"]), "ln2_b": stack(lambda lp: lp["ln2_b"]),
        "pre_w": params["pre_w"], "pre_b": params["pre_b"],
        # classifier weight split into the left / right / product parts
        "cls_w3": params["cls_w"].reshape(3, ENC),
        "cls_b": params["cls_b"],
    }


# --------------------------------- main ---------------------------------------
if __name__ == "__main__":
    root = jax.random.PRNGKey(0)
    pkey, k_left, k_right = jax.random.split(root, 3)
    params = pack_params(init_params(pkey))

    features_left = jax.random.randint(k_left, (B, S), 0, VOCAB, dtype=jnp.int32)
    features_right = jax.random.randint(k_right, (B, S), 0, VOCAB, dtype=jnp.int32)
    mask_left = jnp.array([[1, 1, 1, 1, 1, 1, 1, 1],
                           [1, 1, 1, 1, 1, 0, 0, 0]], dtype=jnp.int32)
    mask_right = jnp.array([[1, 1, 1, 1, 1, 1, 1, 0],
                            [1, 1, 1, 1, 1, 1, 0, 0]], dtype=jnp.int32)

    fwd = jax.jit(forward)
    logits = fwd(features_left, mask_left, features_right, mask_right, params)
    logits = jax.block_until_ready(logits)
    assert logits.shape == (B, 1) and logits.dtype == jnp.float32
    print("KERNEL_OK")
</pallas_src>

<mosaic_0001>
module attributes {stable_mosaic.version = 11 : i64} {
  func.func @fused_forward_kernel(%arg0: memref<32x32xf32, #tpu.memory_space<vmem>>, %arg1: memref<32x32xf32, #tpu.memory_space<vmem>>, %arg2: memref<1x32xf32, #tpu.memory_space<vmem>>, %arg3: memref<1x32xf32, #tpu.memory_space<vmem>>, %arg4: memref<2x32x96xf32, #tpu.memory_space<vmem>>, %arg5: memref<2x1x96xf32, #tpu.memory_space<vmem>>, %arg6: memref<2x32x32xf32, #tpu.memory_space<vmem>>, %arg7: memref<2x1x32xf32, #tpu.memory_space<vmem>>, %arg8: memref<2x1x32xf32, #tpu.memory_space<vmem>>, %arg9: memref<2x1x32xf32, #tpu.memory_space<vmem>>, %arg10: memref<2x32x64xf32, #tpu.memory_space<vmem>>, %arg11: memref<2x1x64xf32, #tpu.memory_space<vmem>>, %arg12: memref<2x64x32xf32, #tpu.memory_space<vmem>>, %arg13: memref<2x1x32xf32, #tpu.memory_space<vmem>>, %arg14: memref<2x1x32xf32, #tpu.memory_space<vmem>>, %arg15: memref<2x1x32xf32, #tpu.memory_space<vmem>>, %arg16: memref<32x32xf32, #tpu.memory_space<vmem>>, %arg17: memref<1x32xf32, #tpu.memory_space<vmem>>, %arg18: memref<3x32xf32, #tpu.memory_space<vmem>>, %arg19: memref<1x1xf32, #tpu.memory_space<vmem>>, %arg20: memref<2x1xf32, #tpu.memory_space<vmem>>) attributes {dimension_semantics = [], scalar_prefetch = 0 : i64, scratch_operands = 0 : i64, tpu.core_type = #tpu.core_type<tc>} {
    %c0 = arith.constant 0 : index
    %c0_0 = arith.constant 0 : index
    %0 = vector.load %arg0[%c0, %c0_0] : memref<32x32xf32, #tpu.memory_space<vmem>>, vector<32x32xf32>
    %c0_1 = arith.constant 0 : index
    %c0_2 = arith.constant 0 : index
    %1 = vector.load %arg2[%c0_1, %c0_2] : memref<1x32xf32, #tpu.memory_space<vmem>>, vector<1x32xf32>
    %c0_3 = arith.constant 0 : index
    %c0_4 = arith.constant 0 : index
    %2 = vector.load %arg3[%c0_3, %c0_4] : memref<1x32xf32, #tpu.memory_space<vmem>>, vector<1x32xf32>
    %cst = arith.constant dense<0.000000e+00> : vector<32xf32>
    %3 = vector.multi_reduction <add>, %0, %cst [1] : vector<32x32xf32> to vector<32xf32>
    %4 = vector.shape_cast %3 : vector<32xf32> to vector<32x1xf32>
    %cst_5 = arith.constant 3.200000e+01 : f32
    %5 = vector.broadcast %cst_5 : f32 to vector<32x1xf32>
    %6 = arith.divf %4, %5 : vector<32x1xf32>
    %7 = vector.broadcast %6 : vector<32x1xf32> to vector<32x32xf32>
    %8 = arith.subf %0, %7 : vector<32x32xf32>
    %9 = arith.mulf %8, %8 : vector<32x32xf32>
    %cst_6 = arith.constant dense<0.000000e+00> : vector<32xf32>
    %10 = vector.multi_reduction <add>, %9, %cst_6 [1] : vector<32x32xf32> to vector<32xf32>
    %11 = vector.shape_cast %10 : vector<32xf32> to vector<32x1xf32>
    %cst_7 = arith.constant 3.200000e+01 : f32
    %12 = vector.broadcast %cst_7 : f32 to vector<32x1xf32>
    %13 = arith.divf %11, %12 : vector<32x1xf32>
    %14 = vector.broadcast %6 : vector<32x1xf32> to vector<32x32xf32>
    %15 = arith.subf %0, %14 : vector<32x32xf32>
    %cst_8 = arith.constant 9.99999996E-13 : f32
    %16 = vector.broadcast %cst_8 : f32 to vector<32x1xf32>
    %17 = arith.addf %13, %16 : vector<32x1xf32>
    %18 = math.rsqrt %17 : vector<32x1xf32>
    %19 = vector.broadcast %18 : vector<32x1xf32> to vector<32x32xf32>
    %20 = arith.mulf %15, %19 : vector<32x32xf32>
    %21 = vector.broadcast %1 : vector<1x32xf32> to vector<32x32xf32>
    %22 = arith.mulf %20, %21 : vector<32x32xf32>
    %23 = vector.broadcast %2 : vector<1x32xf32> to vector<32x32xf32>
    %24 = arith.addf %22, %23 : vector<32x32xf32>
    %c0_9 = arith.constant 0 : index
    %c0_10 = arith.constant 0 : index
    %25 = vector.load %arg1[%c0_9, %c0_10] : memref<32x32xf32, #tpu.memory_space<vmem>>, vector<32x32xf32>
    %c0_11 = arith.constant 0 : index
    %c0_12 = arith.constant 0 : index
    %c0_13 = arith.constant 0 : index
    %26 = vector.load %arg4[%c0_11, %c0_12, %c0_13] : memref<2x32x96xf32, #tpu.memory_space<vmem>>, vector<1x32x96xf32>
    %27 = vector.shape_cast %26 : vector<1x32x96xf32> to vector<32x96xf32>
    %cst_14 = arith.constant dense<0.000000e+00> : vector<32x96xf32>
    %28 = tpu.matmul %24, %27, %cst_14 {dimension_numbers = #tpu.dot_dimension_numbers<[1], [0], [0], [1], [0, 0, 1, 1], [], []>} : vector<32x32xf32>, vector<32x96xf32>, vector<32x96xf32> -> vector<32x96xf32>
    %c0_15 = arith.constant 0 : index
    %c0_16 = arith.constant 0 : index
    %c0_17 = arith.constant 0 : index
    %29 = vector.load %arg5[%c0_15, %c0_16, %c0_17] : memref<2x1x96xf32, #tpu.memory_space<vmem>>, vector<1x1x96xf32>
    %30 = vector.shape_cast %29 : vector<1x1x96xf32> to vector<1x96xf32>
    %31 = vector.broadcast %30 : vector<1x96xf32> to vector<32x96xf32>
    %32 = arith.addf %28, %31 : vector<32x96xf32>
    %33 = vector.extract_strided_slice %32 {offsets = [0, 0], sizes = [32, 32], strides = [1, 1]} : vector<32x96xf32> to vector<32x32xf32>
    %34 = vector.extract_strided_slice %32 {offsets = [0, 32], sizes = [32, 32], strides = [1, 1]} : vector<32x96xf32> to vector<32x32xf32>
    %35 = vector.extract_strided_slice %32 {offsets = [0, 64], sizes = [32, 32], strides = [1, 1]} : vector<32x96xf32> to vector<32x32xf32>
    %36 = vector.extract_strided_slice %33 {offsets = [0, 0], sizes = [32, 8], strides = [1, 1]} : vector<32x32xf32> to vector<32x8xf32>
    %37 = vector.extract_strided_slice %34 {offsets = [0, 0], sizes = [32, 8], strides = [1, 1]} : vector<32x32xf32> to vector<32x8xf32>
    %cst_18 = arith.constant dense<0.000000e+00> : vector<32x32xf32>
    %38 = tpu.matmul %36, %37, %cst_18 {dimension_numbers = #tpu.dot_dimension_numbers<[1], [1], [0], [0], [0, 0, 1, 0], [], []>} : vector<32x8xf32>, vector<32x8xf32>, vector<32x32xf32> -> vector<32x32xf32>
    %cst_19 = arith.constant 0.353553385 : f32
    %39 = vector.broadcast %cst_19 : f32 to vector<32x32xf32>
    %40 = arith.mulf %38, %39 : vector<32x32xf32>
    %41 = arith.addf %40, %25 : vector<32x32xf32>
    %cst_20 = arith.constant dense<0xFF800000> : vector<32xf32>
    %42 = vector.multi_reduction <maximumf>, %41, %cst_20 [1] : vector<32x32xf32> to vector<32xf32>
    %cst_21 = arith.constant 0xFF800000 : f32
    %43 = vector.broadcast %cst_21 : f32 to vector<32xf32>
    %44 = arith.maximumf %43, %42 : vector<32xf32>
    %45 = vector.shape_cast %44 : vector<32xf32> to vector<32x1xf32>
    %46 = vector.broadcast %45 : vector<32x1xf32> to vector<32x32xf32>
    %47 = arith.subf %41, %46 : vector<32x32xf32>
    %48 = math.exp %47 : vector<32x32xf32>
    %cst_22 = arith.constant dense<0.000000e+00> : vector<32xf32>
    %49 = vector.multi_reduction <add>, %48, %cst_22 [1] : vector<32x32xf32> to vector<32xf32>
    %50 = vector.shape_cast %49 : vector<32xf32> to vector<32x1xf32>
    %51 = vector.broadcast %50 : vector<32x1xf32> to vector<32x32xf32>
    %52 = arith.divf %48, %51 : vector<32x32xf32>
    %53 = vector.extract_strided_slice %35 {offsets = [0, 0], sizes = [32, 8], strides = [1, 1]} : vector<32x32xf32> to vector<32x8xf32>
    %cst_23 = arith.constant dense<0.000000e+00> : vector<32x8xf32>
    %54 = tpu.matmul %52, %53, %cst_23 {dimension_numbers = #tpu.dot_dimension_numbers<[1], [0], [0], [1], [0, 0, 1, 1], [], []>} : vector<32x32xf32>, vector<32x8xf32>, vector<32x8xf32> -> vector<32x8xf32>
    %55 = vector.extract_strided_slice %33 {offsets = [0, 8], sizes = [32, 8], strides = [1, 1]} : vector<32x32xf32> to vector<32x8xf32>
    %56 = vector.extract_strided_slice %34 {offsets = [0, 8], sizes = [32, 8], strides = [1, 1]} : vector<32x32xf32> to vector<32x8xf32>
    %cst_24 = arith.constant dense<0.000000e+00> : vector<32x32xf32>
    %57 = tpu.matmul %55, %56, %cst_24 {dimension_numbers = #tpu.dot_dimension_numbers<[1], [1], [0], [0], [0, 0, 1, 0], [], []>} : vector<32x8xf32>, vector<32x8xf32>, vector<32x32xf32> -> vector<32x32xf32>
    %cst_25 = arith.constant 0.353553385 : f32
    %58 = vector.broadcast %cst_25 : f32 to vector<32x32xf32>
    %59 = arith.mulf %57, %58 : vector<32x32xf32>
    %60 = arith.addf %59, %25 : vector<32x32xf32>
    %cst_26 = arith.constant dense<0xFF800000> : vector<32xf32>
    %61 = vector.multi_reduction <maximumf>, %60, %cst_26 [1] : vector<32x32xf32> to vector<32xf32>
    %cst_27 = arith.constant 0xFF800000 : f32
    %62 = vector.broadcast %cst_27 : f32 to vector<32xf32>
    %63 = arith.maximumf %62, %61 : vector<32xf32>
    %64 = vector.shape_cast %63 : vector<32xf32> to vector<32x1xf32>
    %65 = vector.broadcast %64 : vector<32x1xf32> to vector<32x32xf32>
    %66 = arith.subf %60, %65 : vector<32x32xf32>
    %67 = math.exp %66 : vector<32x32xf32>
    %cst_28 = arith.constant dense<0.000000e+00> : vector<32xf32>
    %68 = vector.multi_reduction <add>, %67, %cst_28 [1] : vector<32x32xf32> to vector<32xf32>
    %69 = vector.shape_cast %68 : vector<32xf32> to vector<32x1xf32>
    %70 = vector.broadcast %69 : vector<32x1xf32> to vector<32x32xf32>
    %71 = arith.divf %67, %70 : vector<32x32xf32>
    %72 = vector.extract_strided_slice %35 {offsets = [0, 8], sizes = [32, 8], strides = [1, 1]} : vector<32x32xf32> to vector<32x8xf32>
    %cst_29 = arith.constant dense<0.000000e+00> : vector<32x8xf32>
    %73 = tpu.matmul %71, %72, %cst_29 {dimension_numbers = #tpu.dot_dimension_numbers<[1], [0], [0], [1], [0, 0, 1, 1], [], []>} : vector<32x32xf32>, vector<32x8xf32>, vector<32x8xf32> -> vector<32x8xf32>
    %74 = vector.extract_strided_slice %33 {offsets = [0, 16], sizes = [32, 8], strides = [1, 1]} : vector<32x32xf32> to vector<32x8xf32>
    %75 = vector.extract_strided_slice %34 {offsets = [0, 16], sizes = [32, 8], strides = [1, 1]} : vector<32x32xf32> to vector<32x8xf32>
    %cst_30 = arith.constant dense<0.000000e+00> : vector<32x32xf32>
    %76 = tpu.matmul %74, %75, %cst_30 {dimension_numbers = #tpu.dot_dimension_numbers<[1], [1], [0], [0], [0, 0, 1, 0], [], []>} : vector<32x8xf32>, vector<32x8xf32>, vector<32x32xf32> -> vector<32x32xf32>
    %cst_31 = arith.constant 0.353553385 : f32
    %77 = vector.broadcast %cst_31 : f32 to vector<32x32xf32>
    %78 = arith.mulf %76, %77 : vector<32x32xf32>
    %79 = arith.addf %78, %25 : vector<32x32xf32>
    %cst_32 = arith.constant dense<0xFF800000> : vector<32xf32>
    %80 = vector.multi_reduction <maximumf>, %79, %cst_32 [1] : vector<32x32xf32> to vector<32xf32>
    %cst_33 = arith.constant 0xFF800000 : f32
    %81 = vector.broadcast %cst_33 : f32 to vector<32xf32>
    %82 = arith.maximumf %81, %80 : vector<32xf32>
    %83 = vector.shape_cast %82 : vector<32xf32> to vector<32x1xf32>
    %84 = vector.broadcast %83 : vector<32x1xf32> to vector<32x32xf32>
    %85 = arith.subf %79, %84 : vector<32x32xf32>
    %86 = math.exp %85 : vector<32x32xf32>
    %cst_34 = arith.constant dense<0.000000e+00> : vector<32xf32>
    %87 = vector.multi_reduction <add>, %86, %cst_34 [1] : vector<32x32xf32> to vector<32xf32>
    %88 = vector.shape_cast %87 : vector<32xf32> to vector<32x1xf32>
    %89 = vector.broadcast %88 : vector<32x1xf32> to vector<32x32xf32>
    %90 = arith.divf %86, %89 : vector<32x32xf32>
    %91 = vector.extract_strided_slice %35 {offsets = [0, 16], sizes = [32, 8], strides = [1, 1]} : vector<32x32xf32> to vector<32x8xf32>
    %cst_35 = arith.constant dense<0.000000e+00> : vector<32x8xf32>
    %92 = tpu.matmul %90, %91, %cst_35 {dimension_numbers = #tpu.dot_dimension_numbers<[1], [0], [0], [1], [0, 0, 1, 1], [], []>} : vector<32x32xf32>, vector<32x8xf32>, vector<32x8xf32> -> vector<32x8xf32>
    %93 = vector.extract_strided_slice %33 {offsets = [0, 24], sizes = [32, 8], strides = [1, 1]} : vector<32x32xf32> to vector<32x8xf32>
    %94 = vector.extract_strided_slice %34 {offsets = [0, 24], sizes = [32, 8], strides = [1, 1]} : vector<32x32xf32> to vector<32x8xf32>
    %cst_36 = arith.constant dense<0.000000e+00> : vector<32x32xf32>
    %95 = tpu.matmul %93, %94, %cst_36 {dimension_numbers = #tpu.dot_dimension_numbers<[1], [1], [0], [0], [0, 0, 1, 0], [], []>} : vector<32x8xf32>, vector<32x8xf32>, vector<32x32xf32> -> vector<32x32xf32>
    %cst_37 = arith.constant 0.353553385 : f32
    %96 = vector.broadcast %cst_37 : f32 to vector<32x32xf32>
    %97 = arith.mulf %95, %96 : vector<32x32xf32>
    %98 = arith.addf %97, %25 : vector<32x32xf32>
    %cst_38 = arith.constant dense<0xFF800000> : vector<32xf32>
    %99 = vector.multi_reduction <maximumf>, %98, %cst_38 [1] : vector<32x32xf32> to vector<32xf32>
    %cst_39 = arith.constant 0xFF800000 : f32
    %100 = vector.broadcast %cst_39 : f32 to vector<32xf32>
    %101 = arith.maximumf %100, %99 : vector<32xf32>
    %102 = vector.shape_cast %101 : vector<32xf32> to vector<32x1xf32>
    %103 = vector.broadcast %102 : vector<32x1xf32> to vector<32x32xf32>
    %104 = arith.subf %98, %103 : vector<32x32xf32>
    %105 = math.exp %104 : vector<32x32xf32>
    %cst_40 = arith.constant dense<0.000000e+00> : vector<32xf32>
    %106 = vector.multi_reduction <add>, %105, %cst_40 [1] : vector<32x32xf32> to vector<32xf32>
    %107 = vector.shape_cast %106 : vector<32xf32> to vector<32x1xf32>
    %108 = vector.broadcast %107 : vector<32x1xf32> to vector<32x32xf32>
    %109 = arith.divf %105, %108 : vector<32x32xf32>
    %110 = vector.extract_strided_slice %35 {offsets = [0, 24], sizes = [32, 8], strides = [1, 1]} : vector<32x32xf32> to vector<32x8xf32>
    %cst_41 = arith.constant dense<0.000000e+00> : vector<32x8xf32>
    %111 = tpu.matmul %109, %110, %cst_41 {dimension_numbers = #tpu.dot_dimension_numbers<[1], [0], [0], [1], [0, 0, 1, 1], [], []>} : vector<32x32xf32>, vector<32x8xf32>, vector<32x8xf32> -> vector<32x8xf32>
    %112 = tpu.concatenate %54, %73, %92, %111 in 1 : vector<32x8xf32>, vector<32x8xf32>, vector<32x8xf32>, vector<32x8xf32> -> vector<32x32xf32>
    %c0_42 = arith.constant 0 : index
    %c0_43 = arith.constant 0 : index
    %c0_44 = arith.constant 0 : index
    %113 = vector.load %arg6[%c0_42, %c0_43, %c0_44] : memref<2x32x32xf32, #tpu.memory_space<vmem>>, vector<1x32x32xf32>
    %114 = vector.shape_cast %113 : vector<1x32x32xf32> to vector<32x32xf32>
    %cst_45 = arith.constant dense<0.000000e+00> : vector<32x32xf32>
    %115 = tpu.matmul %112, %114, %cst_45 {dimension_numbers = #tpu.dot_dimension_numbers<[1], [0], [0], [1], [0, 0, 1, 1], [], []>} : vector<32x32xf32>, vector<32x32xf32>, vector<32x32xf32> -> vector<32x32xf32>
    %c0_46 = arith.constant 0 : index
    %c0_47 = arith.constant 0 : index
    %c0_48 = arith.constant 0 : index
    %116 = vector.load %arg7[%c0_46, %c0_47, %c0_48] : memref<2x1x32xf32, #tpu.memory_space<vmem>>, vector<1x1x32xf32>
    %117 = vector.shape_cast %116 : vector<1x1x32xf32> to vector<1x32xf32>
    %118 = vector.broadcast %117 : vector<1x32xf32> to vector<32x32xf32>
    %119 = arith.addf %115, %118 : vector<32x32xf32>
    %120 = arith.addf %24, %119 : vector<32x32xf32>
    %c0_49 = arith.constant 0 : index
    %c0_50 = arith.constant 0 : index
    %c0_51 = arith.constant 0 : index
    %121 = vector.load %arg8[%c0_49, %c0_50, %c0_51] : memref<2x1x32xf32, #tpu.memory_space<vmem>>, vector<1x1x32xf32>
    %122 = vector.shape_cast %121 : vector<1x1x32xf32> to vector<1x32xf32>
    %c0_52 = arith.constant 0 : index
    %c0_53 = arith.constant 0 : index
    %c0_54 = arith.constant 0 : index
    %123 = vector.load %arg9[%c0_52, %c0_53, %c0_54] : memref<2x1x32xf32, #tpu.memory_space<vmem>>, vector<1x1x32xf32>
    %124 = vector.shape_cast %123 : vector<1x1x32xf32> to vector<1x32xf32>
    %cst_55 = arith.constant dense<0.000000e+00> : vector<32xf32>
    %125 = vector.multi_reduction <add>, %120, %cst_55 [1] : vector<32x32xf32> to vector<32xf32>
    %126 = vector.shape_cast %125 : vector<32xf32> to vector<32x1xf32>
    %cst_56 = arith.constant 3.200000e+01 : f32
    %127 = vector.broadcast %cst_56 : f32 to vector<32x1xf32>
    %128 = arith.divf %126, %127 : vector<32x1xf32>
    %129 = vector.broadcast %128 : vector<32x1xf32> to vector<32x32xf32>
    %130 = arith.subf %120, %129 : vector<32x32xf32>
    %131 = arith.mulf %130, %130 : vector<32x32xf32>
    %cst_57 = arith.constant dense<0.000000e+00> : vector<32xf32>
    %132 = vector.multi_reduction <add>, %131, %cst_57 [1] : vector<32x32xf32> to vector<32xf32>
    %133 = vector.shape_cast %132 : vector<32xf32> to vector<32x1xf32>
    %cst_58 = arith.constant 3.200000e+01 : f32
    %134 = vector.broadcast %cst_58 : f32 to vector<32x1xf32>
    %135 = arith.divf %133, %134 : vector<32x1xf32>
    %136 = vector.broadcast %128 : vector<32x1xf32> to vector<32x32xf32>
    %137 = arith.subf %120, %136 : vector<32x32xf32>
    %cst_59 = arith.constant 9.99999996E-13 : f32
    %138 = vector.broadcast %cst_59 : f32 to vector<32x1xf32>
    %139 = arith.addf %135, %138 : vector<32x1xf32>
    %140 = math.rsqrt %139 : vector<32x1xf32>
    %141 = vector.broadcast %140 : vector<32x1xf32> to vector<32x32xf32>
    %142 = arith.mulf %137, %141 : vector<32x32xf32>
    %143 = vector.broadcast %122 : vector<1x32xf32> to vector<32x32xf32>
    %144 = arith.mulf %142, %143 : vector<32x32xf32>
    %145 = vector.broadcast %124 : vector<1x32xf32> to vector<32x32xf32>
    %146 = arith.addf %144, %145 : vector<32x32xf32>
    %c0_60 = arith.constant 0 : index
    %c0_61 = arith.constant 0 : index
    %c0_62 = arith.constant 0 : index
    %147 = vector.load %arg10[%c0_60, %c0_61, %c0_62] : memref<2x32x64xf32, #tpu.memory_space<vmem>>, vector<1x32x64xf32>
    %148 = vector.shape_cast %147 : vector<1x32x64xf32> to vector<32x64xf32>
    %cst_63 = arith.constant dense<0.000000e+00> : vector<32x64xf32>
    %149 = tpu.matmul %146, %148, %cst_63 {dimension_numbers = #tpu.dot_dimension_numbers<[1], [0], [0], [1], [0, 0, 1, 1], [], []>} : vector<32x32xf32>, vector<32x64xf32>, vector<32x64xf32> -> vector<32x64xf32>
    %c0_64 = arith.constant 0 : index
    %c0_65 = arith.constant 0 : index
    %c0_66 = arith.constant 0 : index
    %150 = vector.load %arg11[%c0_64, %c0_65, %c0_66] : memref<2x1x64xf32, #tpu.memory_space<vmem>>, vector<1x1x64xf32>
    %151 = vector.shape_cast %150 : vector<1x1x64xf32> to vector<1x64xf32>
    %152 = vector.broadcast %151 : vector<1x64xf32> to vector<32x64xf32>
    %153 = arith.addf %149, %152 : vector<32x64xf32>
    %154 = arith.mulf %153, %153 : vector<32x64xf32>
    %155 = arith.mulf %153, %154 : vector<32x64xf32>
    %cst_67 = arith.constant 4.471500e-02 : f32
    %156 = vector.broadcast %cst_67 : f32 to vector<32x64xf32>
    %157 = arith.mulf %156, %155 : vector<32x64xf32>
    %158 = arith.addf %153, %157 : vector<32x64xf32>
    %cst_68 = arith.constant 0.797884583 : f32
    %159 = vector.broadcast %cst_68 : f32 to vector<32x64xf32>
    %160 = arith.mulf %159, %158 : vector<32x64xf32>
    %161 = math.tanh %160 : vector<32x64xf32>
    %cst_69 = arith.constant 1.000000e+00 : f32
    %162 = vector.broadcast %cst_69 : f32 to vector<32x64xf32>
    %163 = arith.addf %162, %161 : vector<32x64xf32>
    %cst_70 = arith.constant 5.000000e-01 : f32
    %164 = vector.broadcast %cst_70 : f32 to vector<32x64xf32>
    %165 = arith.mulf %164, %163 : vector<32x64xf32>
    %166 = arith.mulf %153, %165 : vector<32x64xf32>
    %c0_71 = arith.constant 0 : index
    %c0_72 = arith.constant 0 : index
    %c0_73 = arith.constant 0 : index
    %167 = vector.load %arg12[%c0_71, %c0_72, %c0_73] : memref<2x64x32xf32, #tpu.memory_space<vmem>>, vector<1x64x32xf32>
    %168 = vector.shape_cast %167 : vector<1x64x32xf32> to vector<64x32xf32>
    %cst_74 = arith.constant dense<0.000000e+00> : vector<32x32xf32>
    %169 = tpu.matmul %166, %168, %cst_74 {dimension_numbers = #tpu.dot_dimension_numbers<[1], [0], [0], [1], [0, 0, 1, 1], [], []>} : vector<32x64xf32>, vector<64x32xf32>, vector<32x32xf32> -> vector<32x32xf32>
    %c0_75 = arith.constant 0 : index
    %c0_76 = arith.constant 0 : index
    %c0_77 = arith.constant 0 : index
    %170 = vector.load %arg13[%c0_75, %c0_76, %c0_77] : memref<2x1x32xf32, #tpu.memory_space<vmem>>, vector<1x1x32xf32>
    %171 = vector.shape_cast %170 : vector<1x1x32xf32> to vector<1x32xf32>
    %172 = vector.broadcast %171 : vector<1x32xf32> to vector<32x32xf32>
    %173 = arith.addf %169, %172 : vector<32x32xf32>
    %174 = arith.addf %146, %173 : vector<32x32xf32>
    %c0_78 = arith.constant 0 : index
    %c0_79 = arith.constant 0 : index
    %c0_80 = arith.constant 0 : index
    %175 = vector.load %arg14[%c0_78, %c0_79, %c0_80] : memref<2x1x32xf32, #tpu.memory_space<vmem>>, vector<1x1x32xf32>
    %176 = vector.shape_cast %175 : vector<1x1x32xf32> to vector<1x32xf32>
    %c0_81 = arith.constant 0 : index
    %c0_82 = arith.constant 0 : index
    %c0_83 = arith.constant 0 : index
    %177 = vector.load %arg15[%c0_81, %c0_82, %c0_83] : memref<2x1x32xf32, #tpu.memory_space<vmem>>, vector<1x1x32xf32>
    %178 = vector.shape_cast %177 : vector<1x1x32xf32> to vector<1x32xf32>
    %cst_84 = arith.constant dense<0.000000e+00> : vector<32xf32>
    %179 = vector.multi_reduction <add>, %174, %cst_84 [1] : vector<32x32xf32> to vector<32xf32>
    %180 = vector.shape_cast %179 : vector<32xf32> to vector<32x1xf32>
    %cst_85 = arith.constant 3.200000e+01 : f32
    %181 = vector.broadcast %cst_85 : f32 to vector<32x1xf32>
    %182 = arith.divf %180, %181 : vector<32x1xf32>
    %183 = vector.broadcast %182 : vector<32x1xf32> to vector<32x32xf32>
    %184 = arith.subf %174, %183 : vector<32x32xf32>
    %185 = arith.mulf %184, %184 : vector<32x32xf32>
    %cst_86 = arith.constant dense<0.000000e+00> : vector<32xf32>
    %186 = vector.multi_reduction <add>, %185, %cst_86 [1] : vector<32x32xf32> to vector<32xf32>
    %187 = vector.shape_cast %186 : vector<32xf32> to vector<32x1xf32>
    %cst_87 = arith.constant 3.200000e+01 : f32
    %188 = vector.broadcast %cst_87 : f32 to vector<32x1xf32>
    %189 = arith.divf %187, %188 : vector<32x1xf32>
    %190 = vector.broadcast %182 : vector<32x1xf32> to vector<32x32xf32>
    %191 = arith.subf %174, %190 : vector<32x32xf32>
    %cst_88 = arith.constant 9.99999996E-13 : f32
    %192 = vector.broadcast %cst_88 : f32 to vector<32x1xf32>
    %193 = arith.addf %189, %192 : vector<32x1xf32>
    %194 = math.rsqrt %193 : vector<32x1xf32>
    %195 = vector.broadcast %194 : vector<32x1xf32> to vector<32x32xf32>
    %196 = arith.mulf %191, %195 : vector<32x32xf32>
    %197 = vector.broadcast %176 : vector<1x32xf32> to vector<32x32xf32>
    %198 = arith.mulf %196, %197 : vector<32x32xf32>
    %199 = vector.broadcast %178 : vector<1x32xf32> to vector<32x32xf32>
    %200 = arith.addf %198, %199 : vector<32x32xf32>
    %c1 = arith.constant 1 : index
    %c0_89 = arith.constant 0 : index
    %c0_90 = arith.constant 0 : index
    %201 = vector.load %arg4[%c1, %c0_89, %c0_90] : memref<2x32x96xf32, #tpu.memory_space<vmem>>, vector<1x32x96xf32>
    %202 = vector.shape_cast %201 : vector<1x32x96xf32> to vector<32x96xf32>
    %cst_91 = arith.constant dense<0.000000e+00> : vector<32x96xf32>
    %203 = tpu.matmul %200, %202, %cst_91 {dimension_numbers = #tpu.dot_dimension_numbers<[1], [0], [0], [1], [0, 0, 1, 1], [], []>} : vector<32x32xf32>, vector<32x96xf32>, vector<32x96xf32> -> vector<32x96xf32>
    %c1_92 = arith.constant 1 : index
    %c0_93 = arith.constant 0 : index
    %c0_94 = arith.constant 0 : index
    %204 = vector.load %arg5[%c1_92, %c0_93, %c0_94] : memref<2x1x96xf32, #tpu.memory_space<vmem>>, vector<1x1x96xf32>
    %205 = vector.shape_cast %204 : vector<1x1x96xf32> to vector<1x96xf32>
    %206 = vector.broadcast %205 : vector<1x96xf32> to vector<32x96xf32>
    %207 = arith.addf %203, %206 : vector<32x96xf32>
    %208 = vector.extract_strided_slice %207 {offsets = [0, 0], sizes = [32, 32], strides = [1, 1]} : vector<32x96xf32> to vector<32x32xf32>
    %209 = vector.extract_strided_slice %207 {offsets = [0, 32], sizes = [32, 32], strides = [1, 1]} : vector<32x96xf32> to vector<32x32xf32>
    %210 = vector.extract_strided_slice %207 {offsets = [0, 64], sizes = [32, 32], strides = [1, 1]} : vector<32x96xf32> to vector<32x32xf32>
    %211 = vector.extract_strided_slice %208 {offsets = [0, 0], sizes = [32, 8], strides = [1, 1]} : vector<32x32xf32> to vector<32x8xf32>
    %212 = vector.extract_strided_slice %209 {offsets = [0, 0], sizes = [32, 8], strides = [1, 1]} : vector<32x32xf32> to vector<32x8xf32>
    %cst_95 = arith.constant dense<0.000000e+00> : vector<32x32xf32>
    %213 = tpu.matmul %211, %212, %cst_95 {dimension_numbers = #tpu.dot_dimension_numbers<[1], [1], [0], [0], [0, 0, 1, 0], [], []>} : vector<32x8xf32>, vector<32x8xf32>, vector<32x32xf32> -> vector<32x32xf32>
    %cst_96 = arith.constant 0.353553385 : f32
    %214 = vector.broadcast %cst_96 : f32 to vector<32x32xf32>
    %215 = arith.mulf %213, %214 : vector<32x32xf32>
    %216 = arith.addf %215, %25 : vector<32x32xf32>
    %cst_97 = arith.constant dense<0xFF800000> : vector<32xf32>
    %217 = vector.multi_reduction <maximumf>, %216, %cst_97 [1] : vector<32x32xf32> to vector<32xf32>
    %cst_98 = arith.constant 0xFF800000 : f32
    %218 = vector.broadcast %cst_98 : f32 to vector<32xf32>
    %219 = arith.maximumf %218, %217 : vector<32xf32>
    %220 = vector.shape_cast %219 : vector<32xf32> to vector<32x1xf32>
    %221 = vector.broadcast %220 : vector<32x1xf32> to vector<32x32xf32>
    %222 = arith.subf %216, %221 : vector<32x32xf32>
    %223 = math.exp %222 : vector<32x32xf32>
    %cst_99 = arith.constant dense<0.000000e+00> : vector<32xf32>
    %224 = vector.multi_reduction <add>, %223, %cst_99 [1] : vector<32x32xf32> to vector<32xf32>
    %225 = vector.shape_cast %224 : vector<32xf32> to vector<32x1xf32>
    %226 = vector.broadcast %225 : vector<32x1xf32> to vector<32x32xf32>
    %227 = arith.divf %223, %226 : vector<32x32xf32>
    %228 = vector.extract_strided_slice %210 {offsets = [0, 0], sizes = [32, 8], strides = [1, 1]} : vector<32x32xf32> to vector<32x8xf32>
    %cst_100 = arith.constant dense<0.000000e+00> : vector<32x8xf32>
    %229 = tpu.matmul %227, %228, %cst_100 {dimension_numbers = #tpu.dot_dimension_numbers<[1], [0], [0], [1], [0, 0, 1, 1], [], []>} : vector<32x32xf32>, vector<32x8xf32>, vector<32x8xf32> -> vector<32x8xf32>
    %230 = vector.extract_strided_slice %208 {offsets = [0, 8], sizes = [32, 8], strides = [1, 1]} : vector<32x32xf32> to vector<32x8xf32>
    %231 = vector.extract_strided_slice %209 {offsets = [0, 8], sizes = [32, 8], strides = [1, 1]} : vector<32x32xf32> to vector<32x8xf32>
    %cst_101 = arith.constant dense<0.000000e+00> : vector<32x32xf32>
    %232 = tpu.matmul %230, %231, %cst_101 {dimension_numbers = #tpu.dot_dimension_numbers<[1], [1], [0], [0], [0, 0, 1, 0], [], []>} : vector<32x8xf32>, vector<32x8xf32>, vector<32x32xf32> -> vector<32x32xf32>
    %cst_102 = arith.constant 0.353553385 : f32
    %233 = vector.broadcast %cst_102 : f32 to vector<32x32xf32>
    %234 = arith.mulf %232, %233 : vector<32x32xf32>
    %235 = arith.addf %234, %25 : vector<32x32xf32>
    %cst_103 = arith.constant dense<0xFF800000> : vector<32xf32>
    %236 = vector.multi_reduction <maximumf>, %235, %cst_103 [1] : vector<32x32xf32> to vector<32xf32>
    %cst_104 = arith.constant 0xFF800000 : f32
    %237 = vector.broadcast %cst_104 : f32 to vector<32xf32>
    %238 = arith.maximumf %237, %236 : vector<32xf32>
    %239 = vector.shape_cast %238 : vector<32xf32> to vector<32x1xf32>
    %240 = vector.broadcast %239 : vector<32x1xf32> to vector<32x32xf32>
    %241 = arith.subf %235, %240 : vector<32x32xf32>
    %242 = math.exp %241 : vector<32x32xf32>
    %cst_105 = arith.constant dense<0.000000e+00> : vector<32xf32>
    %243 = vector.multi_reduction <add>, %242, %cst_105 [1] : vector<32x32xf32> to vector<32xf32>
    %244 = vector.shape_cast %243 : vector<32xf32> to vector<32x1xf32>
    %245 = vector.broadcast %244 : vector<32x1xf32> to vector<32x32xf32>
    %246 = arith.divf %242, %245 : vector<32x32xf32>
    %247 = vector.extract_strided_slice %210 {offsets = [0, 8], sizes = [32, 8], strides = [1, 1]} : vector<32x32xf32> to vector<32x8xf32>
    %cst_106 = arith.constant dense<0.000000e+00> : vector<32x8xf32>
    %248 = tpu.matmul %246, %247, %cst_106 {dimension_numbers = #tpu.dot_dimension_numbers<[1], [0], [0], [1], [0, 0, 1, 1], [], []>} : vector<32x32xf32>, vector<32x8xf32>, vector<32x8xf32> -> vector<32x8xf32>
    %249 = vector.extract_strided_slice %208 {offsets = [0, 16], sizes = [32, 8], strides = [1, 1]} : vector<32x32xf32> to vector<32x8xf32>
    %250 = vector.extract_strided_slice %209 {offsets = [0, 16], sizes = [32, 8], strides = [1, 1]} : vector<32x32xf32> to vector<32x8xf32>
    %cst_107 = arith.constant dense<0.000000e+00> : vector<32x32xf32>
    %251 = tpu.matmul %249, %250, %cst_107 {dimension_numbers = #tpu.dot_dimension_numbers<[1], [1], [0], [0], [0, 0, 1, 0], [], []>} : vector<32x8xf32>, vector<32x8xf32>, vector<32x32xf32> -> vector<32x32xf32>
    %cst_108 = arith.constant 0.353553385 : f32
    %252 = vector.broadcast %cst_108 : f32 to vector<32x32xf32>
    %253 = arith.mulf %251, %252 : vector<32x32xf32>
    %254 = arith.addf %253, %25 : vector<32x32xf32>
    %cst_109 = arith.constant dense<0xFF800000> : vector<32xf32>
    %255 = vector.multi_reduction <maximumf>, %254, %cst_109 [1] : vector<32x32xf32> to vector<32xf32>
    %cst_110 = arith.constant 0xFF800000 : f32
    %256 = vector.broadcast %cst_110 : f32 to vector<32xf32>
    %257 = arith.maximumf %256, %255 : vector<32xf32>
    %258 = vector.shape_cast %257 : vector<32xf32> to vector<32x1xf32>
    %259 = vector.broadcast %258 : vector<32x1xf32> to vector<32x32xf32>
    %260 = arith.subf %254, %259 : vector<32x32xf32>
    %261 = math.exp %260 : vector<32x32xf32>
    %cst_111 = arith.constant dense<0.000000e+00> : vector<32xf32>
    %262 = vector.multi_reduction <add>, %261, %cst_111 [1] : vector<32x32xf32> to vector<32xf32>
    %263 = vector.shape_cast %262 : vector<32xf32> to vector<32x1xf32>
    %264 = vector.broadcast %263 : vector<32x1xf32> to vector<32x32xf32>
    %265 = arith.divf %261, %264 : vector<32x32xf32>
    %266 = vector.extract_strided_slice %210 {offsets = [0, 16], sizes = [32, 8], strides = [1, 1]} : vector<32x32xf32> to vector<32x8xf32>
    %cst_112 = arith.constant dense<0.000000e+00> : vector<32x8xf32>
    %267 = tpu.matmul %265, %266, %cst_112 {dimension_numbers = #tpu.dot_dimension_numbers<[1], [0], [0], [1], [0, 0, 1, 1], [], []>} : vector<32x32xf32>, vector<32x8xf32>, vector<32x8xf32> -> vector<32x8xf32>
    %268 = vector.extract_strided_slice %208 {offsets = [0, 24], sizes = [32, 8], strides = [1, 1]} : vector<32x32xf32> to vector<32x8xf32>
    %269 = vector.extract_strided_slice %209 {offsets = [0, 24], sizes = [32, 8], strides = [1, 1]} : vector<32x32xf32> to vector<32x8xf32>
    %cst_113 = arith.constant dense<0.000000e+00> : vector<32x32xf32>
    %270 = tpu.matmul %268, %269, %cst_113 {dimension_numbers = #tpu.dot_dimension_numbers<[1], [1], [0], [0], [0, 0, 1, 0], [], []>} : vector<32x8xf32>, vector<32x8xf32>, vector<32x32xf32> -> vector<32x32xf32>
    %cst_114 = arith.constant 0.353553385 : f32
    %271 = vector.broadcast %cst_114 : f32 to vector<32x32xf32>
    %272 = arith.mulf %270, %271 : vector<32x32xf32>
    %273 = arith.addf %272, %25 : vector<32x32xf32>
    %cst_115 = arith.constant dense<0xFF800000> : vector<32xf32>
    %274 = vector.multi_reduction <maximumf>, %273, %cst_115 [1] : vector<32x32xf32> to vector<32xf32>
    %cst_116 = arith.constant 0xFF800000 : f32
    %275 = vector.broadcast %cst_116 : f32 to vector<32xf32>
    %276 = arith.maximumf %275, %274 : vector<32xf32>
    %277 = vector.shape_cast %276 : vector<32xf32> to vector<32x1xf32>
    %278 = vector.broadcast %277 : vector<32x1xf32> to vector<32x32xf32>
    %279 = arith.subf %273, %278 : vector<32x32xf32>
    %280 = math.exp %279 : vector<32x32xf32>
    %cst_117 = arith.constant dense<0.000000e+00> : vector<32xf32>
    %281 = vector.multi_reduction <add>, %280, %cst_117 [1] : vector<32x32xf32> to vector<32xf32>
    %282 = vector.shape_cast %281 : vector<32xf32> to vector<32x1xf32>
    %283 = vector.broadcast %282 : vector<32x1xf32> to vector<32x32xf32>
    %284 = arith.divf %280, %283 : vector<32x32xf32>
    %285 = vector.extract_strided_slice %210 {offsets = [0, 24], sizes = [32, 8], strides = [1, 1]} : vector<32x32xf32> to vector<32x8xf32>
    %cst_118 = arith.constant dense<0.000000e+00> : vector<32x8xf32>
    %286 = tpu.matmul %284, %285, %cst_118 {dimension_numbers = #tpu.dot_dimension_numbers<[1], [0], [0], [1], [0, 0, 1, 1], [], []>} : vector<32x32xf32>, vector<32x8xf32>, vector<32x8xf32> -> vector<32x8xf32>
    %287 = tpu.concatenate %229, %248, %267, %286 in 1 : vector<32x8xf32>, vector<32x8xf32>, vector<32x8xf32>, vector<32x8xf32> -> vector<32x32xf32>
    %c1_119 = arith.constant 1 : index
    %c0_120 = arith.constant 0 : index
    %c0_121 = arith.constant 0 : index
    %288 = vector.load %arg6[%c1_119, %c0_120, %c0_121] : memref<2x32x32xf32, #tpu.memory_space<vmem>>, vector<1x32x32xf32>
    %289 = vector.shape_cast %288 : vector<1x32x32xf32> to vector<32x32xf32>
    %cst_122 = arith.constant dense<0.000000e+00> : vector<32x32xf32>
    %290 = tpu.matmul %287, %289, %cst_122 {dimension_numbers = #tpu.dot_dimension_numbers<[1], [0], [0], [1], [0, 0, 1, 1], [], []>} : vector<32x32xf32>, vector<32x32xf32>, vector<32x32xf32> -> vector<32x32xf32>
    %c1_123 = arith.constant 1 : index
    %c0_124 = arith.constant 0 : index
    %c0_125 = arith.constant 0 : index
    %291 = vector.load %arg7[%c1_123, %c0_124, %c0_125] : memref<2x1x32xf32, #tpu.memory_space<vmem>>, vector<1x1x32xf32>
    %292 = vector.shape_cast %291 : vector<1x1x32xf32> to vector<1x32xf32>
    %293 = vector.broadcast %292 : vector<1x32xf32> to vector<32x32xf32>
    %294 = arith.addf %290, %293 : vector<32x32xf32>
    %295 = arith.addf %200, %294 : vector<32x32xf32>
    %c1_126 = arith.constant 1 : index
    %c0_127 = arith.constant 0 : index
    %c0_128 = arith.constant 0 : index
    %296 = vector.load %arg8[%c1_126, %c0_127, %c0_128] : memref<2x1x32xf32, #tpu.memory_space<vmem>>, vector<1x1x32xf32>
    %297 = vector.shape_cast %296 : vector<1x1x32xf32> to vector<1x32xf32>
    %c1_129 = arith.constant 1 : index
    %c0_130 = arith.constant 0 : index
    %c0_131 = arith.constant 0 : index
    %298 = vector.load %arg9[%c1_129, %c0_130, %c0_131] : memref<2x1x32xf32, #tpu.memory_space<vmem>>, vector<1x1x32xf32>
    %299 = vector.shape_cast %298 : vector<1x1x32xf32> to vector<1x32xf32>
    %cst_132 = arith.constant dense<0.000000e+00> : vector<32xf32>
    %300 = vector.multi_reduction <add>, %295, %cst_132 [1] : vector<32x32xf32> to vector<32xf32>
    %301 = vector.shape_cast %300 : vector<32xf32> to vector<32x1xf32>
    %cst_133 = arith.constant 3.200000e+01 : f32
    %302 = vector.broadcast %cst_133 : f32 to vector<32x1xf32>
    %303 = arith.divf %301, %302 : vector<32x1xf32>
    %304 = vector.broadcast %303 : vector<32x1xf32> to vector<32x32xf32>
    %305 = arith.subf %295, %304 : vector<32x32xf32>
    %306 = arith.mulf %305, %305 : vector<32x32xf32>
    %cst_134 = arith.constant dense<0.000000e+00> : vector<32xf32>
    %307 = vector.multi_reduction <add>, %306, %cst_134 [1] : vector<32x32xf32> to vector<32xf32>
    %308 = vector.shape_cast %307 : vector<32xf32> to vector<32x1xf32>
    %cst_135 = arith.constant 3.200000e+01 : f32
    %309 = vector.broadcast %cst_135 : f32 to vector<32x1xf32>
    %310 = arith.divf %308, %309 : vector<32x1xf32>
    %311 = vector.broadcast %303 : vector<32x1xf32> to vector<32x32xf32>
    %312 = arith.subf %295, %311 : vector<32x32xf32>
    %cst_136 = arith.constant 9.99999996E-13 : f32
    %313 = vector.broadcast %cst_136 : f32 to vector<32x1xf32>
    %314 = arith.addf %310, %313 : vector<32x1xf32>
    %315 = math.rsqrt %314 : vector<32x1xf32>
    %316 = vector.broadcast %315 : vector<32x1xf32> to vector<32x32xf32>
    %317 = arith.mulf %312, %316 : vector<32x32xf32>
    %318 = vector.broadcast %297 : vector<1x32xf32> to vector<32x32xf32>
    %319 = arith.mulf %317, %318 : vector<32x32xf32>
    %320 = vector.broadcast %299 : vector<1x32xf32> to vector<32x32xf32>
    %321 = arith.addf %319, %320 : vector<32x32xf32>
    %c1_137 = arith.constant 1 : index
    %c0_138 = arith.constant 0 : index
    %c0_139 = arith.constant 0 : index
    %322 = vector.load %arg10[%c1_137, %c0_138, %c0_139] : memref<2x32x64xf32, #tpu.memory_space<vmem>>, vector<1x32x64xf32>
    %323 = vector.shape_cast %322 : vector<1x32x64xf32> to vector<32x64xf32>
    %cst_140 = arith.constant dense<0.000000e+00> : vector<32x64xf32>
    %324 = tpu.matmul %321, %323, %cst_140 {dimension_numbers = #tpu.dot_dimension_numbers<[1], [0], [0], [1], [0, 0, 1, 1], [], []>} : vector<32x32xf32>, vector<32x64xf32>, vector<32x64xf32> -> vector<32x64xf32>
    %c1_141 = arith.constant 1 : index
    %c0_142 = arith.constant 0 : index
    %c0_143 = arith.constant 0 : index
    %325 = vector.load %arg11[%c1_141, %c0_142, %c0_143] : memref<2x1x64xf32, #tpu.memory_space<vmem>>, vector<1x1x64xf32>
    %326 = vector.shape_cast %325 : vector<1x1x64xf32> to vector<1x64xf32>
    %327 = vector.broadcast %326 : vector<1x64xf32> to vector<32x64xf32>
    %328 = arith.addf %324, %327 : vector<32x64xf32>
    %329 = arith.mulf %328, %328 : vector<32x64xf32>
    %330 = arith.mulf %328, %329 : vector<32x64xf32>
    %cst_144 = arith.constant 4.471500e-02 : f32
    %331 = vector.broadcast %cst_144 : f32 to vector<32x64xf32>
    %332 = arith.mulf %331, %330 : vector<32x64xf32>
    %333 = arith.addf %328, %332 : vector<32x64xf32>
    %cst_145 = arith.constant 0.797884583 : f32
    %334 = vector.broadcast %cst_145 : f32 to vector<32x64xf32>
    %335 = arith.mulf %334, %333 : vector<32x64xf32>
    %336 = math.tanh %335 : vector<32x64xf32>
    %cst_146 = arith.constant 1.000000e+00 : f32
    %337 = vector.broadcast %cst_146 : f32 to vector<32x64xf32>
    %338 = arith.addf %337, %336 : vector<32x64xf32>
    %cst_147 = arith.constant 5.000000e-01 : f32
    %339 = vector.broadcast %cst_147 : f32 to vector<32x64xf32>
    %340 = arith.mulf %339, %338 : vector<32x64xf32>
    %341 = arith.mulf %328, %340 : vector<32x64xf32>
    %c1_148 = arith.constant 1 : index
    %c0_149 = arith.constant 0 : index
    %c0_150 = arith.constant 0 : index
    %342 = vector.load %arg12[%c1_148, %c0_149, %c0_150] : memref<2x64x32xf32, #tpu.memory_space<vmem>>, vector<1x64x32xf32>
    %343 = vector.shape_cast %342 : vector<1x64x32xf32> to vector<64x32xf32>
    %cst_151 = arith.constant dense<0.000000e+00> : vector<32x32xf32>
    %344 = tpu.matmul %341, %343, %cst_151 {dimension_numbers = #tpu.dot_dimension_numbers<[1], [0], [0], [1], [0, 0, 1, 1], [], []>} : vector<32x64xf32>, vector<64x32xf32>, vector<32x32xf32> -> vector<32x32xf32>
    %c1_152 = arith.constant 1 : index
    %c0_153 = arith.constant 0 : index
    %c0_154 = arith.constant 0 : index
    %345 = vector.load %arg13[%c1_152, %c0_153, %c0_154] : memref<2x1x32xf32, #tpu.memory_space<vmem>>, vector<1x1x32xf32>
    %346 = vector.shape_cast %345 : vector<1x1x32xf32> to vector<1x32xf32>
    %347 = vector.broadcast %346 : vector<1x32xf32> to vector<32x32xf32>
    %348 = arith.addf %344, %347 : vector<32x32xf32>
    %349 = arith.addf %321, %348 : vector<32x32xf32>
    %c1_155 = arith.constant 1 : index
    %c0_156 = arith.constant 0 : index
    %c0_157 = arith.constant 0 : index
    %350 = vector.load %arg14[%c1_155, %c0_156, %c0_157] : memref<2x1x32xf32, #tpu.memory_space<vmem>>, vector<1x1x32xf32>
    %351 = vector.shape_cast %350 : vector<1x1x32xf32> to vector<1x32xf32>
    %c1_158 = arith.constant 1 : index
    %c0_159 = arith.constant 0 : index
    %c0_160 = arith.constant 0 : index
    %352 = vector.load %arg15[%c1_158, %c0_159, %c0_160] : memref<2x1x32xf32, #tpu.memory_space<vmem>>, vector<1x1x32xf32>
    %353 = vector.shape_cast %352 : vector<1x1x32xf32> to vector<1x32xf32>
    %cst_161 = arith.constant dense<0.000000e+00> : vector<32xf32>
    %354 = vector.multi_reduction <add>, %349, %cst_161 [1] : vector<32x32xf32> to vector<32xf32>
    %355 = vector.shape_cast %354 : vector<32xf32> to vector<32x1xf32>
    %cst_162 = arith.constant 3.200000e+01 : f32
    %356 = vector.broadcast %cst_162 : f32 to vector<32x1xf32>
    %357 = arith.divf %355, %356 : vector<32x1xf32>
    %358 = vector.broadcast %357 : vector<32x1xf32> to vector<32x32xf32>
    %359 = arith.subf %349, %358 : vector<32x32xf32>
    %360 = arith.mulf %359, %359 : vector<32x32xf32>
    %cst_163 = arith.constant dense<0.000000e+00> : vector<32xf32>
    %361 = vector.multi_reduction <add>, %360, %cst_163 [1] : vector<32x32xf32> to vector<32xf32>
    %362 = vector.shape_cast %361 : vector<32xf32> to vector<32x1xf32>
    %cst_164 = arith.constant 3.200000e+01 : f32
    %363 = vector.broadcast %cst_164 : f32 to vector<32x1xf32>
    %364 = arith.divf %362, %363 : vector<32x1xf32>
    %365 = vector.broadcast %357 : vector<32x1xf32> to vector<32x32xf32>
    %366 = arith.subf %349, %365 : vector<32x32xf32>
    %cst_165 = arith.constant 9.99999996E-13 : f32
    %367 = vector.broadcast %cst_165 : f32 to vector<32x1xf32>
    %368 = arith.addf %364, %367 : vector<32x1xf32>
    %369 = math.rsqrt %368 : vector<32x1xf32>
    %370 = vector.broadcast %369 : vector<32x1xf32> to vector<32x32xf32>
    %371 = arith.mulf %366, %370 : vector<32x32xf32>
    %372 = vector.broadcast %351 : vector<1x32xf32> to vector<32x32xf32>
    %373 = arith.mulf %371, %372 : vector<32x32xf32>
    %374 = vector.broadcast %353 : vector<1x32xf32> to vector<32x32xf32>
    %375 = arith.addf %373, %374 : vector<32x32xf32>
    %376 = tpu.iota {dimensions = array<i32: 0>} : vector<4x32xi32>
    %377 = tpu.iota {dimensions = array<i32: 1>} : vector<4x32xi32>
    %c8_i32 = arith.constant 8 : i32
    %378 = vector.broadcast %c8_i32 : i32 to vector<4x32xi32>
    %379 = arith.muli %376, %378 : vector<4x32xi32>
    %380 = arith.cmpi eq, %377, %379 : vector<4x32xi32>
    %381 = arith.extui %380 : vector<4x32xi1> to vector<4x32xi32>
    %382 = arith.sitofp %381 : vector<4x32xi32> to vector<4x32xf32>
    %cst_166 = arith.constant dense<0.000000e+00> : vector<4x32xf32>
    %383 = tpu.matmul %382, %375, %cst_166 {dimension_numbers = #tpu.dot_dimension_numbers<[1], [0], [0], [1], [0, 0, 1, 1], [], []>} : vector<4x32xf32>, vector<32x32xf32>, vector<4x32xf32> -> vector<4x32xf32>
    %c0_167 = arith.constant 0 : index
    %c0_168 = arith.constant 0 : index
    %384 = vector.load %arg16[%c0_167, %c0_168] : memref<32x32xf32, #tpu.memory_space<vmem>>, vector<32x32xf32>
    %cst_169 = arith.constant dense<0.000000e+00> : vector<4x32xf32>
    %385 = tpu.matmul %383, %384, %cst_169 {dimension_numbers = #tpu.dot_dimension_numbers<[1], [0], [0], [1], [0, 0, 1, 1], [], []>} : vector<4x32xf32>, vector<32x32xf32>, vector<4x32xf32> -> vector<4x32xf32>
    %c0_170 = arith.constant 0 : index
    %c0_171 = arith.constant 0 : index
    %386 = vector.load %arg17[%c0_170, %c0_171] : memref<1x32xf32, #tpu.memory_space<vmem>>, vector<1x32xf32>
    %387 = vector.broadcast %386 : vector<1x32xf32> to vector<4x32xf32>
    %388 = arith.addf %385, %387 : vector<4x32xf32>
    %389 = vector.extract_strided_slice %388 {offsets = [0, 0], sizes = [2, 32], strides = [1, 1]} : vector<4x32xf32> to vector<2x32xf32>
    %390 = vector.extract_strided_slice %388 {offsets = [2, 0], sizes = [2, 32], strides = [1, 1]} : vector<4x32xf32> to vector<2x32xf32>
    %391 = arith.mulf %389, %390 : vector<2x32xf32>
    %cst_172 = arith.constant 0.000000e+00 : f32
    %392 = vector.broadcast %cst_172 : f32 to vector<2x32xf32>
    %393 = arith.maximumf %389, %392 : vector<2x32xf32>
    %cst_173 = arith.constant 0.000000e+00 : f32
    %394 = vector.broadcast %cst_173 : f32 to vector<2x32xf32>
    %395 = arith.maximumf %390, %394 : vector<2x32xf32>
    %cst_174 = arith.constant 0.000000e+00 : f32
    %396 = vector.broadcast %cst_174 : f32 to vector<2x32xf32>
    %397 = arith.maximumf %391, %396 : vector<2x32xf32>
    %c0_175 = arith.constant 0 : index
    %c0_176 = arith.constant 0 : index
    %398 = vector.load %arg18[%c0_175, %c0_176] : memref<3x32xf32, #tpu.memory_space<vmem>>, vector<1x32xf32>
    %399 = vector.broadcast %398 : vector<1x32xf32> to vector<2x32xf32>
    %400 = arith.mulf %393, %399 : vector<2x32xf32>
    %c1_177 = arith.constant 1 : index
    %c0_178 = arith.constant 0 : index
    %401 = vector.load %arg18[%c1_177, %c0_178] : memref<3x32xf32, #tpu.memory_space<vmem>>, vector<1x32xf32>
    %402 = vector.broadcast %401 : vector<1x32xf32> to vector<2x32xf32>
    %403 = arith.mulf %395, %402 : vector<2x32xf32>
    %404 = arith.addf %400, %403 : vector<2x32xf32>
    %c2 = arith.constant 2 : index
    %c0_179 = arith.constant 0 : index
    %405 = vector.load %arg18[%c2, %c0_179] : memref<3x32xf32, #tpu.memory_space<vmem>>, vector<1x32xf32>
    %406 = vector.broadcast %405 : vector<1x32xf32> to vector<2x32xf32>
    %407 = arith.mulf %397, %406 : vector<2x32xf32>
    %408 = arith.addf %404, %407 : vector<2x32xf32>
    %cst_180 = arith.constant dense<0.000000e+00> : vector<2xf32>
    %409 = vector.multi_reduction <add>, %408, %cst_180 [1] : vector<2x32xf32> to vector<2xf32>
    %410 = vector.shape_cast %409 : vector<2xf32> to vector<2x1xf32>
    %c0_181 = arith.constant 0 : index
    %c0_182 = arith.constant 0 : index
    %411 = vector.load %arg19[%c0_181, %c0_182] : memref<1x1xf32, #tpu.memory_space<vmem>>, vector<1x1xf32>
    %412 = vector.broadcast %411 : vector<1x1xf32> to vector<2x1xf32>
    %413 = arith.addf %410, %412 : vector<2x1xf32>
    %c0_183 = arith.constant 0 : index
    %c0_184 = arith.constant 0 : index
    %414 = vector.load %arg20[%c0_183, %c0_184] : memref<2x1xf32, #tpu.memory_space<vmem>>, vector<2x1xf32>
    tpu.vector_store %arg20[%c0_183, %c0_184], %413 {strides = array<i32>} : memref<2x1xf32, #tpu.memory_space<vmem>>, vector<2x1xf32>,
    return
  }
}

</mosaic_0001>

<bundles_post_ra>
// kernel: eq.8
= control target key start
LH: loop header
LB: loop body
LE: loop exit
PB: predicated region body
PF: predicated region fallthrough
CT: control target
= control target key end

     0   :  { %vm7_vm0 = vcmask 64512   ;;  %s37_s8 = smov 8   ;;  %s38_s9 = smov 16   ;;  %vm13_vm1 = vcmask 261312   ;;  %vm19_vm2 = vcmask 195712   ;;  %vm25_vm3 = vcmask 130112   ;;  %s55_s0 = inlined_call_operand.vmem [shape: s32[4,8], index: 0, kind: input, shape index: {}]   ;;  %s56_s1 = inlined_call_operand.vmem [shape: s32[32], index: 1, kind: output, shape index: {}]  }
   0x1   :  { %v4_v0 = vld [vmem:[%s55_s0] sm:$0xf]  ;;  %s36_s0 = smov 24  }
   0x2   :  { %5 = vst [vmem:[#allocation1] sm:$0xf] %v4_v0 }
   0x9   :  { %v10_v1 = vld [vmem:[#allocation1 + $0x3] sm:$0x1]   ;;  %v22_v2 = vld [vmem:[#allocation1 + $0x1] sm:$0x1]   ;;  %v6_v3 = vld [vmem:[#allocation1] sm:$0x1]  }
   0xa   :  { %11 = vrot.lane.b32.xlu0 %v10_v1, %s36_s0  ;;  %23 = vrot.lane.b32.xlu1 %v22_v2, %s37_s8  ;;  %v16_v4 = vld [vmem:[#allocation1 + $0x2] sm:$0x1]   ;;  %8 = vst.msk [vmem:[#allocation0] sm:$0x1] %vm7_vm0, %v6_v3  }
   0xe   :  { %17 = vrot.lane.b32.xlu0 %v16_v4, %s38_s9 }
  0x7c   :  { %v12_v5 = vpop.permute.xlu0 %11   ;;  %v24_v6 = vpop.permute.xlu1 %23  }
  0x7d   :  { %14 = vst.msk [vmem:[#allocation0] sm:$0x1] %vm13_vm1, %v12_v5  }
  0x80   :  { %v18_v7 = vpop.permute.xlu0 %17  }
  0x81   :  { %20 = vst.msk [vmem:[#allocation0] sm:$0x1] %vm19_vm2, %v18_v7  }
  0x82   :  { %26 = vst.msk [vmem:[#allocation0] sm:$0x1] %vm25_vm3, %v24_v6  }
  0x89   :  { %v30_v8 = vld [vmem:[#allocation0] sm:$0x1] }
  0x8a   :  { %32 = vst [vmem:[%s56_s1] sm:$0x1] %v30_v8 }

// kernel: forward.1
= control target key start
LH: loop header
LB: loop body
LE: loop exit
PB: predicated region body
PF: predicated region fallthrough
CT: control target
= control target key end

     0   :  { %vm73_vm0 = vcmask 261120   ;;  %vm271_vm1 = vcmask 64512   ;;  %s5355_s26 = smov 64   ;;  %s5357_s28 = smov 120   ;;  %vm1420_vm3 = vcmask 130048   ;;  %vm1425_vm4 = vcmask 195584   ;;  %s6356_s0 = inlined_call_operand.vmem [shape: f32[32,32], index: 0, kind: input, shape index: {}]   ;;  %s6357_s4 = inlined_call_operand.vmem [shape: f32[2,32,96], index: 4, kind: input, shape index: {}]   ;;  %s6358_s2 = inlined_call_operand.vmem [shape: f32[1,32], index: 2, kind: input, shape index: {}]   ;;  %s6359_s3 = inlined_call_operand.vmem [shape: f32[1,32], index: 3, kind: input, shape index: {}]   ;;  %s6360_s5 = inlined_call_operand.vmem [shape: f32[2,1,96], index: 5, kind: input, shape index: {}]   ;;  %s6361_s1 = inlined_call_operand.vmem [shape: f32[32,32], index: 1, kind: input, shape index: {}]   ;;  %s6362_s6 = inlined_call_operand.vmem [shape: f32[2,32,32], index: 6, kind: input, shape index: {}]   ;;  %s6363_s7 = inlined_call_operand.vmem [shape: f32[2,1,32], index: 7, kind: input, shape index: {}]   ;;  %s6364_s10 = inlined_call_operand.vmem [shape: f32[2,32,64], index: 10, kind: input, shape index: {}]   ;;  %s6365_s8 = inlined_call_operand.vmem [shape: f32[2,1,32], index: 8, kind: input, shape index: {}]   ;;  %s6366_s9 = inlined_call_operand.vmem [shape: f32[2,1,32], index: 9, kind: input, shape index: {}]   ;;  %s6367_s12 = inlined_call_operand.vmem [shape: f32[2,64,32], index: 12, kind: input, shape index: {}]   ;;  %s6368_s11 = inlined_call_operand.vmem [shape: f32[2,1,64], index: 11, kind: input, shape index: {}]   ;;  %s6369_s13 = inlined_call_operand.vmem [shape: f32[2,1,32], index: 13, kind: input, shape index: {}]   ;;  %s6370_s14 = inlined_call_operand.vmem [shape: f32[2,1,32], index: 14, kind: input, shape index: {}]   ;;  %s6371_s15 = inlined_call_operand.vmem [shape: f32[2,1,32], index: 15, kind: input, shape index: {}]   ;;  %s6372_s16 = inlined_call_operand.vmem [shape: f32[32,32], index: 16, kind: input, shape index: {}]   ;;  %s6373_s19 = inlined_call_operand.<no memory space> [shape: f32[1,1], index: 19, kind: input, shape index: {}]   ;;  %s6374_s17 = inlined_call_operand.vmem [shape: f32[1,32], index: 17, kind: input, shape index: {}]   ;;  %s6375_s18 = inlined_call_operand.vmem [shape: f32[3,32], index: 18, kind: input, shape index: {}]   ;;  %s6376_s20 = inlined_call_operand.vmem [shape: f32[2,1], index: 20, kind: output, shape index: {}]  }
   0x1   :  { %6398 = sst [smem:[#allocation3_spill]] %s6356_s0  ;;  %s5354_s0 = smov 96   ;;  %vm5557_vm2 = vmpackc.low %vm271_vm1, %vm271_vm1  ;;  %vm1775_vm5 = vcmask 523264   ;;  %vm5369_vm6 = vmmov 0   ;;  %vm3953_vm8 = vcmask 254976   ;;  %vm3965_vm9 = vcmask 1024  }
   0x2   :  { %6399 = sst [smem:[#allocation4_spill]] %s6357_s4  ;;  %s6403_s23 = sld [smem:[#allocation3_spill]] }
   0x3   :  { %6400 = sst [smem:[#allocation5_spill]] %s6358_s2  ;;  %s6404_s29 = sld [smem:[#allocation4_spill]] }
   0x4   :  { %6401 = sst [smem:[#allocation6_spill]] %s6359_s3  ;;  %s6405_s25 = sld [smem:[#allocation5_spill]] }
   0x5   :  { %6402 = sst [smem:[#allocation7_spill]] %s6360_s5  ;;  %s6406_s27 = sld [smem:[#allocation6_spill]] }
   0x6   :  { %s6407_s30 = sld [smem:[#allocation7_spill]]  ;;  %s6394_s5 = smov 56  }
   0x7   :  { %s6392_s21 = smov 80   ;;  %s6390_s4 = smov 112  }
   0x8   :  { %v67_v0 = vld [vmem:[%s6403_s23] sm:$0xff]  ;;  %v69_v1 = vld [vmem:[%s6403_s23 + $0x10] sm:$0xff]  ;;  %v68_v2 = vld [vmem:[%s6403_s23 + $0x8] sm:$0xff]  ;;  %s6388_s22 = smov 48   ;;  %s6384_s24 = smov 104  }
   0x9   :  { %v74_v3 = vsel %vm73_vm0, %v67_v0, 0.0  ;;  %v80_v4 = vsel %vm73_vm0, %v69_v1, 0.0  ;;  %v70_v5 = vld [vmem:[%s6403_s23 + $0x18] sm:$0xff]  ;;  %v77_v6 = vsel %vm73_vm0, %v68_v2, 0.0  ;;  %v151_v28 = vld [vmem:[%s6404_s29] sm:$0xff]  ;;  %v152_v29 = vld [vmem:[%s6404_s29 + $0x8] sm:$0xff] }
   0xa   :  { %75 = vadd.xlane.f32.xlu0 %v74_v3  ;;  %81 = vadd.xlane.f32.xlu1 %v80_v4  ;;  %v83_v7 = vsel %vm73_vm0, %v70_v5, 0.0  ;;  %v153_v30 = vld [vmem:[%s6404_s29 + $0x10] sm:$0xff]  ;;  %v4737_v31 = vpack.c.bf16 %v152_v29, %v151_v28  ;;  %v154_v32 = vld [vmem:[%s6404_s29 + $0x18] sm:$0xff]  ;;  %v3971_v47 = vld [vmem:[%s6405_s25] ss:$0 sm:$0xff]  ;;  %s6386_s23 = smov 72  }
   0xb   :  { %v4741_v33 = vpack.c.bf16 %v154_v32, %v153_v30  ;;  %v3972_v49 = vld [vmem:[%s6406_s27] ss:$0 sm:$0xff]  ;;  %v5590_v29 = vld [vmem:[%s6361_s1 + $0x18] sm:$0xff]  ;;  %s5356_s27 = smov 88   ;;  %s6382_s2 = smov 40  }
   0xc   :  { %4738 = vmatprep.subr.bf16.mxu0 %v4737_v31  ;;  %s6380_s25 = smov 8   ;;  %s5366_s3 = smov 16  }
   0xd   :  { %4740 = vmatpush3.bf16.msra.mxu0 %v4737_v31 }
   0xe   :  { %78 = vadd.xlane.f32.xlu0 %v77_v6  ;;  %84 = vadd.xlane.f32.xlu1 %v83_v7 }
   0xf   :  { %4742 = vmatprep.subr.bf16.mxu0 %v4741_v33 }
  0x11   :  { %4744 = vmatpush3.bf16.msra.mxu0 %v4741_v33  ;;  %v5596_v33 = vld [vmem:[%s6361_s1 + $0x10] sm:$0xff] }
  0x97   :  { %v76_v8 = vpop.xlane.xlu0 %75  ;;  %v82_v9 = vpop.xlane.xlu1 %81 }
  0x98   :  { %v87_v10 = vmul.f32 0.03125, %v76_v8  ;;  %v89_v11 = vmul.f32 0.03125, %v82_v9 }
  0x9a   :  { %v91_v12 = vsub.f32 %v67_v0, %v87_v10  ;;  %v93_v13 = vsub.f32 %v69_v1, %v89_v11  ;;  %v3973_v0 = vld [vmem:[%s6407_s30] ss:$0 sm:$0xff] }
  0x9b   :  { %v79_v14 = vpop.xlane.xlu0 %78  ;;  %v85_v15 = vpop.xlane.xlu1 %84 }
  0x9c   :  { %v88_v16 = vmul.f32 0.03125, %v79_v14  ;;  %v90_v17 = vmul.f32 0.03125, %v85_v15  ;;  %v95_v18 = vmul.f32 %v91_v12, %v91_v12  ;;  %v97_v19 = vmul.f32 %v93_v13, %v93_v13 }
  0x9e   :  { %v92_v20 = vsub.f32 %v68_v2, %v88_v16  ;;  %v94_v21 = vsub.f32 %v70_v5, %v90_v17  ;;  %v99_v22 = vsel %vm73_vm0, %v95_v18, 0.0  ;;  %v105_v23 = vsel %vm73_vm0, %v97_v19, 0.0 }
  0x9f   :  { %100 = vadd.xlane.f32.xlu0 %v99_v22 }
  0xa0   :  { %v96_v24 = vmul.f32 %v92_v20, %v92_v20  ;;  %v98_v25 = vmul.f32 %v94_v21, %v94_v21 }
  0xa2   :  { %v102_v26 = vsel %vm73_vm0, %v96_v24, 0.0  ;;  %v108_v27 = vsel %vm73_vm0, %v98_v25, 0.0  ;;  %v5583_v24 = vld [vmem:[%s6361_s1] sm:$0xff] }
  0xa3   :  { %106 = vadd.xlane.f32.xlu0 %v105_v23  ;;  %103 = vadd.xlane.f32.xlu1 %v102_v26 }
  0xa7   :  { %109 = vadd.xlane.f32.xlu1 %v108_v27 }
 0x12c   :  { %v101_v34 = vpop.xlane.xlu0 %100 }
 0x12d   :  { %v111_v35 = vmul.f32 0.03125, %v101_v34 }
 0x12f   :  { %v115_v36 = vadd.f32 1e-12, %v111_v35 }
 0x130   :  { %v104_v37 = vpop.xlane.xlu1 %103  ;;  %v107_v38 = vpop.xlane.xlu0 %106 }
 0x131   :  { %5166 = vrsqrt.f32 %v115_v36  ;;  %v112_v39 = vmul.f32 0.03125, %v104_v37  ;;  %v113_v40 = vmul.f32 0.03125, %v107_v38 }
 0x133   :  { %v116_v41 = vadd.f32 1e-12, %v112_v39  ;;  %v117_v42 = vadd.f32 1e-12, %v113_v40 }
 0x134   :  { %v110_v43 = vpop.xlane.xlu1 %109 }
 0x135   :  { %5168 = vrsqrt.f32 %v116_v41  ;;  %v114_v44 = vmul.f32 0.03125, %v110_v43 }
 0x136   :  { %5170 = vrsqrt.f32 %v117_v42 }
 0x137   :  { %v118_v45 = vadd.f32 1e-12, %v114_v44 }
 0x139   :  { %5172 = vrsqrt.f32 %v118_v45 }
 0x13b   :  { %v5167_v46 = vpop.eup %5166 }
 0x13c   :  { %v123_v48 = vmul.f32 %v5167_v46, %v91_v12 }
 0x13e   :  { %v133_v50 = vmul.f32 %v3971_v47, %v123_v48 }
 0x13f   :  { %v5169_v51 = vpop.eup %5168 }
 0x140   :  { %v5171_v52 = vpop.eup %5170  ;;  %v5514_v53 = vadd.f32 %v3972_v49, %v133_v50  ;;  %v124_v54 = vmul.f32 %v5169_v51, %v92_v20 }
 0x141   :  { %v125_v55 = vmul.f32 %v5171_v52, %v93_v13 }
 0x142   :  { %4371 = vmatprep.mubr.msk.f32.mxu0 %vm73_vm0, %v5514_v53  ;;  %v134_v56 = vmul.f32 %v3971_v47, %v124_v54 }
 0x143   :  { %v5173_v57 = vpop.eup %5172  ;;  %v135_v58 = vmul.f32 %v3971_v47, %v125_v55 }
 0x144   :  { %v5518_v59 = vadd.f32 %v3972_v49, %v134_v56  ;;  %v126_v60 = vmul.f32 %v5173_v57, %v94_v21  ;;  %v5578_v21 = vld [vmem:[%s6361_s1 + $0x8] sm:$0xff] }
 0x145   :  { %v5520_v61 = vadd.f32 %v3972_v49, %v135_v58 }
 0x146   :  { %4372 = vmatmul.mubr.msk.f32.vlgmr.msra.gmra.mrb[0].mxu0 %vm73_vm0, %v5518_v59  ;;  %v136_v62 = vmul.f32 %v3971_v47, %v126_v60 }
 0x147   :  { %4374 = vmatprep.mubr.msk.f32.mxu0 %vm73_vm0, %v5520_v61 }
 0x148   :  { %v5526_v63 = vadd.f32 %v3972_v49, %v136_v62 }
 0x14a   :  { %4375 = vmatmul.mubr.msk.f32.gmra.mrb[2].mxu0 %vm73_vm0, %v5526_v63 }
 0x219   :  { %v4373_v1 = vpop.f32.mrb[0].mxu0 }
 0x21a   :  { %v5533_v2 = vadd.f32 %v4373_v1, %v3973_v0  ;;  %v240_v3 = vpop.f32.mrb[1].mxu0 }
 0x21b   :  { %v5535_v4 = vadd.f32 %v3973_v0, %v240_v3 }
 0x21d   :  { %v4376_v5 = vpop.f32.mrb[2].mxu0  ;;  %4385 = vmatprep.mubr.msk.f32.mxu1 %vm271_vm1, %v5535_v4  ;;  %v5541_v6 = vpack.i.bf16 %v5533_v2, %v5535_v4 }
 0x21e   :  { %v5543_v7 = vadd.f32 %v4376_v5, %v3973_v0  ;;  %v250_v8 = vpop.f32.mrb[3].mxu0 }
 0x21f   :  { %v5545_v9 = vadd.f32 %v3973_v0, %v250_v8  ;;  %5007 = vrot.lane.b32.xlu0 %v5541_v6, %s5354_s0 }
 0x221   :  { %v5551_v10 = vpack.i.bf16 %v5543_v7, %v5545_v9 }
 0x223   :  { %5012 = vrot.lane.b32.xlu1 %v5551_v10, %s5354_s0 }
 0x291   :  { %v5008_v11 = vpop.permute.xlu0 %5007 }
 0x292   :  { %v5010_v12 = vunpack.i.h.bf16 %v5008_v11  ;;  %v5009_v13 = vunpack.i.l.bf16 %v5008_v11 }
 0x294   :  { %v4745_v15 = vpack.c.bf16 %v5010_v12, %v5009_v13 }
 0x295   :  { %v5013_v16 = vpop.permute.xlu1 %5012 }
 0x296   :  { %v5015_v17 = vunpack.i.h.bf16 %v5013_v16  ;;  %v5014_v18 = vunpack.i.l.bf16 %v5013_v16  ;;  %4747 = vmatprep.subr.msk.bf16.mxu1 %vm5557_vm2, %v4745_v15 }
 0x297   :  { %4750 = vmatpush3.bf16.xpose.msk.msra.mxu1 %vm5557_vm2, %v4745_v15 }
 0x298   :  { %v4751_v19 = vpack.c.bf16 %v5015_v17, %v5014_v18 }
 0x29a   :  { %4753 = vmatprep.subr.msk.bf16.mxu1 %vm5557_vm2, %v4751_v19 }
 0x29f   :  { %4756 = vmatpush3.bf16.xpose.msk.msra.mxu1 %vm5557_vm2, %v4751_v19 }
 0x2a6   :  { %4386 = vmatmul.mubr.msk.f32.vlgmr.msra.gmra.mrb[0].mxu1 %vm271_vm1, %v5533_v2 }
 0x2a7   :  { %4388 = vmatprep.mubr.msk.f32.mxu1 %vm271_vm1, %v5545_v9 }
 0x2aa   :  { %4389 = vmatmul.mubr.msk.f32.gmra.mrb[2].mxu1 %vm271_vm1, %v5543_v7 }
 0x379   :  { %v4387_v20 = vpop.f32.mrb[0].mxu1 }
 0x37a   :  { %v374_v22 = vmul.f32 0.35355338, %v4387_v20  ;;  %v354_v23 = vpop.f32.mrb[1].mxu1 }
 0x37b   :  { %v373_v25 = vmul.f32 0.35355338, %v354_v23 }
 0x37c   :  { %v378_v26 = vadd.f32 %v374_v22, %v5578_v21 }
 0x37d   :  { %v4390_v27 = vpop.f32.mrb[2].mxu1  ;;  %v377_v28 = vadd.f32 %v373_v25, %v5583_v24 }
 0x37e   :  { %v376_v30 = vmul.f32 0.35355338, %v4390_v27  ;;  %v364_v31 = vpop.f32.mrb[3].mxu1  ;;  %v384_v32 = vsel %vm73_vm0, %v378_v26, -inf }
 0x37f   :  { %v375_v34 = vmul.f32 0.35355338, %v364_v31  ;;  %385 = vmax.xlane.f32.xlu0 %v384_v32  ;;  %v381_v35 = vsel %vm73_vm0, %v377_v28, -inf }
 0x380   :  { %382 = vmax.xlane.f32.xlu1 %v381_v35  ;;  %v380_v36 = vadd.f32 %v376_v30, %v5590_v29 }
 0x381   :  { %v379_v37 = vadd.f32 %v375_v34, %v5596_v33 }
 0x382   :  { %v390_v38 = vsel %vm73_vm0, %v380_v36, -inf }
 0x383   :  { %v387_v39 = vsel %vm73_vm0, %v379_v37, -inf }
 0x384   :  { %391 = vmax.xlane.f32.xlu1 %v390_v38  ;;  %388 = vmax.xlane.f32.xlu0 %v387_v39 }
 0x40c   :  { %v386_v40 = vpop.xlane.xlu0 %385 }
 0x40d   :  { %v394_v41 = vsub.f32 %v378_v26, %v386_v40  ;;  %v383_v42 = vpop.xlane.xlu1 %382 }
 0x40e   :  { %v393_v43 = vsub.f32 %v377_v28, %v383_v42 }
 0x40f   :  { %v399_v44 = vmul.f32 1.442695, %v394_v41 }
 0x410   :  { %v397_v45 = vmul.f32 1.442695, %v393_v43 }
 0x411   :  { %5174 = vpow2.f32 %v399_v44  ;;  %v389_v50 = vpop.xlane.xlu0 %388  ;;  %v392_v52 = vpop.xlane.xlu1 %391 }
 0x412   :  { %5176 = vpow2.f32 %v397_v45  ;;  %v395_v51 = vsub.f32 %v379_v37, %v389_v50  ;;  %v396_v55 = vsub.f32 %v380_v36, %v392_v52 }
 0x414   :  { %v401_v54 = vmul.f32 1.442695, %v395_v51  ;;  %v403_v56 = vmul.f32 1.442695, %v396_v55 }
 0x416   :  { %5178 = vpow2.f32 %v401_v54 }
 0x417   :  { %5180 = vpow2.f32 %v403_v56 }
 0x41b   :  { %v5175_v46 = vpop.eup %5174 }
 0x41c   :  { %v5177_v47 = vpop.eup %5176  ;;  %v408_v48 = vsel %vm73_vm0, %v5175_v46, 0.0 }
 0x41d   :  { %409 = vadd.xlane.f32.xlu1 %v408_v48  ;;  %v405_v49 = vsel %vm73_vm0, %v5177_v47, 0.0 }
 0x41e   :  { %406 = vadd.xlane.f32.xlu0 %v405_v49 }
 0x420   :  { %v5179_v57 = vpop.eup %5178 }
 0x421   :  { %v411_v58 = vsel %vm73_vm0, %v5179_v57, 0.0  ;;  %v5181_v60 = vpop.eup %5180 }
 0x422   :  { %v414_v62 = vsel %vm73_vm0, %v5181_v60, 0.0 }
 0x42e   :  { %5022 = vrot.lane.b32.xlu1 %v5551_v10, %s5355_s26 }
 0x432   :  { %5027 = vrot.lane.b32.xlu1 %v5541_v6, %s5356_s27 }
 0x434   :  { %5017 = vrot.lane.b32.xlu0 %v5541_v6, %s5355_s26 }
 0x436   :  { %5032 = vrot.lane.b32.xlu1 %v5551_v10, %s5356_s27 }
 0x453   :  { %412 = vadd.xlane.f32.xlu0 %v411_v58 }
 0x45a   :  { %415 = vadd.xlane.f32.xlu1 %v414_v62 }
 0x469   :  { %534 = vrot.lane.b32.xlu0 %v5535_v4, %s5357_s28 }
 0x46b   :  { %536 = vrot.lane.b32.xlu1 %v5533_v2, %s5357_s28 }
 0x46d   :  { %538 = vrot.lane.b32.xlu0 %v5545_v9, %s5357_s28 }
 0x46f   :  { %540 = vrot.lane.b32.xlu1 %v5543_v7, %s5357_s28 }
 0x4aa   :  { %v410_v0 = vpop.xlane.xlu1 %409 }
 0x4ab   :  { %v407_v1 = vpop.xlane.xlu0 %406 }
 0x4ac   :  { %5182 = vrcp.f32 %v407_v1 }
 0x4ad   :  { %5184 = vrcp.f32 %v410_v0 }
 0x4ae   :  { %v5023_v3 = vpop.permute.xlu1 %5022 }
 0x4af   :  { %v5018_v5 = vpop.permute.xlu0 %5017  ;;  %v5025_v8 = vunpack.i.h.bf16 %v5023_v3  ;;  %v5024_v11 = vunpack.i.l.bf16 %v5023_v3 }
 0x4b0   :  { %v5020_v12 = vunpack.i.h.bf16 %v5018_v5  ;;  %v5019_v13 = vunpack.i.l.bf16 %v5018_v5 }
 0x4b1   :  { %v4761_v19 = vpack.c.bf16 %v5025_v8, %v5024_v11 }
 0x4b2   :  { %v5028_v15 = vpop.permute.xlu1 %5027  ;;  %v4757_v16 = vpack.c.bf16 %v5020_v12, %v5019_v13 }
 0x4b3   :  { %v5030_v17 = vunpack.i.h.bf16 %v5028_v15  ;;  %v5029_v18 = vunpack.i.l.bf16 %v5028_v15 }
 0x4b4   :  { %4758 = vmatprep.subr.bf16.mxu0 %v4757_v16 }
 0x4b5   :  { %4760 = vmatpush3.bf16.msra.mxu0 %v4757_v16  ;;  %v4765_v25 = vpack.c.bf16 %v5030_v17, %v5029_v18 }
 0x4b6   :  { %v5183_v20 = vpop.eup %5182  ;;  %4762 = vmatprep.subr.bf16.mxu0 %v4761_v19  ;;  %v5033_v27 = vpop.permute.xlu1 %5032 }
 0x4b7   :  { %v5185_v22 = vpop.eup %5184  ;;  %v418_v23 = vmul.f32 %v5183_v20, %v5177_v47  ;;  %v5035_v28 = vunpack.i.h.bf16 %v5033_v27  ;;  %v5034_v30 = vunpack.i.l.bf16 %v5033_v27 }
 0x4b8   :  { %v420_v26 = vmul.f32 %v5185_v22, %v5175_v46 }
 0x4b9   :  { %4764 = vmatpush3.bf16.msra.mxu0 %v4761_v19  ;;  %4399 = vmatprep.mubr.msk.f32.mxu0 %vm73_vm0, %v418_v23  ;;  %v4771_v31 = vpack.c.bf16 %v5035_v28, %v5034_v30 }
 0x4ba   :  { %4767 = vmatprep.subr.msk.bf16.mxu0 %vm5557_vm2, %v4765_v25 }
 0x4bc   :  { %4400 = vmatmul.mubr.msk.f32.vlgmr.msra.gmra.mrb[4].mxu0 %vm73_vm0, %v420_v26 }
 0x4c2   :  { %4770 = vmatpush3.bf16.xpose.msk.msra.mxu0 %vm5557_vm2, %v4765_v25 }
 0x4c3   :  { %4773 = vmatprep.subr.msk.bf16.mxu0 %vm5557_vm2, %v4771_v31 }
 0x4ca   :  { %4776 = vmatpush3.bf16.xpose.msk.msra.mxu0 %vm5557_vm2, %v4771_v31 }
 0x4e0   :  { %v413_v32 = vpop.xlane.xlu0 %412 }
 0x4e1   :  { %5186 = vrcp.f32 %v413_v32 }
 0x4e4   :  { %v535_v38 = vpop.permute.xlu0 %534 }
 0x4e7   :  { %v416_v34 = vpop.xlane.xlu1 %415 }
 0x4e8   :  { %5188 = vrcp.f32 %v416_v34  ;;  %v539_v41 = vpop.permute.xlu0 %538 }
 0x4eb   :  { %v5187_v35 = vpop.eup %5186  ;;  %v537_v40 = vpop.permute.xlu1 %536 }
 0x4ec   :  { %v422_v36 = vmul.f32 %v5187_v35, %v5179_v57 }
 0x4ee   :  { %4402 = vmatprep.mubr.msk.f32.mxu0 %vm73_vm0, %v422_v36 }
 0x4ef   :  { %v541_v42 = vpop.permute.xlu1 %540 }
 0x4f2   :  { %v5189_v37 = vpop.eup %5188 }
 0x4f3   :  { %v424_v39 = vmul.f32 %v5189_v37, %v5181_v60 }
 0x4f5   :  { %4403 = vmatmul.mubr.msk.f32.gmra.mrb[6].mxu0 %vm73_vm0, %v424_v39 }
 0x4f6   :  { %4413 = vmatprep.mubr.msk.f32.mxu0 %vm271_vm1, %v535_v38 }
 0x4f9   :  { %4414 = vmatmul.mubr.msk.f32.vlgmr.msra.gmra.mrb[8].mxu0 %vm271_vm1, %v537_v40 }
 0x4fa   :  { %4416 = vmatprep.mubr.msk.f32.mxu0 %vm271_vm1, %v539_v41 }
 0x4fd   :  { %4417 = vmatmul.mubr.msk.f32.gmra.mrb[10].mxu0 %vm271_vm1, %v541_v42 }
 0x58f   :  { %v5639_v43 = vpop.f32.mrb[4].mxu0 }
 0x590   :  { %v5641_v44 = vpop.f32.mrb[5].mxu0 }
 0x5c8   :  { %v5643_v45 = vpop.f32.mrb[6].mxu0 }
 0x5c9   :  { %v5645_v46 = vpop.f32.mrb[7].mxu0 }
 0x5cc   :  { %v4415_v47 = vpop.f32.mrb[8].mxu0 }
 0x5cd   :  { %v652_v48 = vmul.f32 0.35355338, %v4415_v47  ;;  %v632_v49 = vpop.f32.mrb[9].mxu0 }
 0x5ce   :  { %v651_v50 = vmul.f32 0.35355338, %v632_v49 }
 0x5cf   :  { %v656_v51 = vadd.f32 %v652_v48, %v5578_v21 }
 0x5d0   :  { %v4418_v52 = vpop.f32.mrb[10].mxu0  ;;  %v655_v54 = vadd.f32 %v651_v50, %v5583_v24 }
 0x5d1   :  { %v642_v55 = vpop.f32.mrb[11].mxu0  ;;  %v662_v56 = vsel %vm73_vm0, %v656_v51, -inf  ;;  %v654_v57 = vmul.f32 0.35355338, %v4418_v52 }
 0x5d2   :  { %v653_v58 = vmul.f32 0.35355338, %v642_v55  ;;  %663 = vmax.xlane.f32.xlu1 %v662_v56  ;;  %v659_v60 = vsel %vm73_vm0, %v655_v54, -inf }
 0x5d3   :  { %660 = vmax.xlane.f32.xlu0 %v659_v60  ;;  %v658_v1 = vadd.f32 %v654_v57, %v5590_v29 }
 0x5d4   :  { %v657_v62 = vadd.f32 %v653_v58, %v5596_v33 }
 0x5d5   :  { %v668_v3 = vsel %vm73_vm0, %v658_v1, -inf }
 0x5d6   :  { %v665_v0 = vsel %vm73_vm0, %v657_v62, -inf }
 0x5d7   :  { %666 = vmax.xlane.f32.xlu0 %v665_v0 }
 0x5db   :  { %669 = vmax.xlane.f32.xlu0 %v668_v3 }
 0x65f   :  { %v664_v5 = vpop.xlane.xlu1 %663 }
 0x660   :  { %v672_v8 = vsub.f32 %v656_v51, %v664_v5  ;;  %v661_v11 = vpop.xlane.xlu0 %660 }
 0x661   :  { %v671_v12 = vsub.f32 %v655_v54, %v661_v11 }
 0x662   :  { %v677_v13 = vmul.f32 1.442695, %v672_v8 }
 0x663   :  { %v675_v15 = vmul.f32 1.442695, %v671_v12 }
 0x664   :  { %5190 = vpow2.f32 %v677_v13  ;;  %v667_v20 = vpop.xlane.xlu0 %666 }
 0x665   :  { %5192 = vpow2.f32 %v675_v15  ;;  %v673_v22 = vsub.f32 %v657_v62, %v667_v20 }
 0x667   :  { %v679_v23 = vmul.f32 1.442695, %v673_v22 }
 0x668   :  { %v670_v25 = vpop.xlane.xlu0 %669 }
 0x669   :  { %v674_v26 = vsub.f32 %v658_v1, %v670_v25  ;;  %5194 = vpow2.f32 %v679_v23 }
 0x66b   :  { %v681_v27 = vmul.f32 1.442695, %v674_v26 }
 0x66d   :  { %5196 = vpow2.f32 %v681_v27 }
 0x66e   :  { %v5191_v16 = vpop.eup %5190 }
 0x66f   :  { %v5193_v17 = vpop.eup %5192  ;;  %v686_v18 = vsel %vm73_vm0, %v5191_v16, 0.0 }
 0x670   :  { %687 = vadd.xlane.f32.xlu1 %v686_v18  ;;  %v683_v19 = vsel %vm73_vm0, %v5193_v17, 0.0 }
 0x671   :  { %684 = vadd.xlane.f32.xlu0 %v683_v19 }
 0x673   :  { %v5195_v28 = vpop.eup %5194 }
 0x674   :  { %v689_v30 = vsel %vm73_vm0, %v5195_v28, 0.0 }
 0x677   :  { %v5197_v31 = vpop.eup %5196 }
 0x678   :  { %v692_v32 = vsel %vm73_vm0, %v5197_v31, 0.0 }
 0x681   :  { %5042 = vrot.lane.b32.xlu1 %v5551_v10, %s6394_s5 }
 0x685   :  { %5047 = vrot.lane.b32.xlu1 %v5541_v6, %s6392_s21 }
 0x687   :  { %5037 = vrot.lane.b32.xlu0 %v5541_v6, %s6394_s5 }
 0x689   :  { %5052 = vrot.lane.b32.xlu1 %v5551_v10, %s6392_s21 }
 0x6a6   :  { %690 = vadd.xlane.f32.xlu0 %v689_v30 }
 0x6ad   :  { %693 = vadd.xlane.f32.xlu1 %v692_v32 }
 0x6bc   :  { %812 = vrot.lane.b32.xlu0 %v5535_v4, %s6390_s4 }
 0x6be   :  { %814 = vrot.lane.b32.xlu1 %v5533_v2, %s6390_s4 }
 0x6c0   :  { %816 = vrot.lane.b32.xlu0 %v5545_v9, %s6390_s4 }
 0x6c2   :  { %818 = vrot.lane.b32.xlu1 %v5543_v7, %s6390_s4 }
 0x6fd   :  { %v688_v34 = vpop.xlane.xlu1 %687 }
 0x6fe   :  { %v685_v35 = vpop.xlane.xlu0 %684 }
 0x6ff   :  { %5198 = vrcp.f32 %v685_v35 }
 0x700   :  { %5200 = vrcp.f32 %v688_v34 }
 0x701   :  { %v5043_v36 = vpop.permute.xlu1 %5042 }
 0x702   :  { %v5038_v37 = vpop.permute.xlu0 %5037  ;;  %v5045_v38 = vunpack.i.h.bf16 %v5043_v36  ;;  %v5044_v39 = vunpack.i.l.bf16 %v5043_v36 }
 0x703   :  { %v5040_v40 = vunpack.i.h.bf16 %v5038_v37  ;;  %v5039_v41 = vunpack.i.l.bf16 %v5038_v37 }
 0x704   :  { %v4781_v50 = vpack.c.bf16 %v5045_v38, %v5044_v39 }
 0x705   :  { %v5048_v42 = vpop.permute.xlu1 %5047  ;;  %v4777_v47 = vpack.c.bf16 %v5040_v40, %v5039_v41 }
 0x706   :  { %v5050_v48 = vunpack.i.h.bf16 %v5048_v42  ;;  %v5049_v49 = vunpack.i.l.bf16 %v5048_v42 }
 0x707   :  { %4778 = vmatprep.subr.bf16.mxu1 %v4777_v47 }
 0x708   :  { %4780 = vmatpush3.bf16.msra.mxu1 %v4777_v47  ;;  %v4785_v55 = vpack.c.bf16 %v5050_v48, %v5049_v49 }
 0x709   :  { %v5199_v51 = vpop.eup %5198  ;;  %4782 = vmatprep.subr.bf16.mxu1 %v4781_v50  ;;  %v5053_v57 = vpop.permute.xlu1 %5052 }
 0x70a   :  { %v5201_v52 = vpop.eup %5200  ;;  %v696_v54 = vmul.f32 %v5199_v51, %v5193_v17  ;;  %v5055_v58 = vunpack.i.h.bf16 %v5053_v57  ;;  %v5054_v60 = vunpack.i.l.bf16 %v5053_v57 }
 0x70b   :  { %v698_v56 = vmul.f32 %v5201_v52, %v5191_v16 }
 0x70c   :  { %4784 = vmatpush3.bf16.msra.mxu1 %v4781_v50  ;;  %4427 = vmatprep.mubr.msk.f32.mxu1 %vm73_vm0, %v696_v54  ;;  %v4791_v62 = vpack.c.bf16 %v5055_v58, %v5054_v60 }
 0x70d   :  { %4787 = vmatprep.subr.msk.bf16.mxu1 %vm5557_vm2, %v4785_v55 }
 0x70f   :  { %4428 = vmatmul.mubr.msk.f32.vlgmr.msra.gmra.mrb[4].mxu1 %vm73_vm0, %v698_v56 }
 0x715   :  { %4790 = vmatpush3.bf16.xpose.msk.msra.mxu1 %vm5557_vm2, %v4785_v55 }
 0x716   :  { %4793 = vmatprep.subr.msk.bf16.mxu1 %vm5557_vm2, %v4791_v62 }
 0x71d   :  { %4796 = vmatpush3.bf16.xpose.msk.msra.mxu1 %vm5557_vm2, %v4791_v62 }
 0x733   :  { %v691_v0 = vpop.xlane.xlu0 %690 }
 0x734   :  { %5202 = vrcp.f32 %v691_v0 }
 0x737   :  { %v813_v11 = vpop.permute.xlu0 %812 }
 0x73a   :  { %v694_v1 = vpop.xlane.xlu1 %693 }
 0x73b   :  { %5204 = vrcp.f32 %v694_v1  ;;  %v817_v15 = vpop.permute.xlu0 %816 }
 0x73e   :  { %v5203_v3 = vpop.eup %5202  ;;  %v815_v13 = vpop.permute.xlu1 %814 }
 0x73f   :  { %v700_v5 = vmul.f32 %v5203_v3, %v5195_v28 }
 0x741   :  { %4430 = vmatprep.mubr.msk.f32.mxu1 %vm73_vm0, %v700_v5 }
 0x742   :  { %v819_v16 = vpop.permute.xlu1 %818 }
 0x745   :  { %v5205_v8 = vpop.eup %5204 }
 0x746   :  { %v702_v12 = vmul.f32 %v5205_v8, %v5197_v31 }
 0x748   :  { %4431 = vmatmul.mubr.msk.f32.gmra.mrb[6].mxu1 %vm73_vm0, %v702_v12 }
 0x749   :  { %4441 = vmatprep.mubr.msk.f32.mxu1 %vm271_vm1, %v813_v11 }
 0x74c   :  { %4442 = vmatmul.mubr.msk.f32.vlgmr.msra.gmra.mrb[8].mxu1 %vm271_vm1, %v815_v13 }
 0x74d   :  { %4444 = vmatprep.mubr.msk.f32.mxu1 %vm271_vm1, %v817_v15 }
 0x750   :  { %4445 = vmatmul.mubr.msk.f32.gmra.mrb[10].mxu1 %vm271_vm1, %v819_v16 }
 0x7e2   :  { %v5691_v17 = vpop.f32.mrb[4].mxu1 }
 0x7e3   :  { %v5693_v18 = vpop.f32.mrb[5].mxu1 }
 0x81b   :  { %v5695_v19 = vpop.f32.mrb[6].mxu1 }
 0x81c   :  { %v5697_v20 = vpop.f32.mrb[7].mxu1 }
 0x81f   :  { %v4443_v22 = vpop.f32.mrb[8].mxu1 }
 0x820   :  { %v930_v23 = vmul.f32 0.35355338, %v4443_v22  ;;  %v910_v25 = vpop.f32.mrb[9].mxu1 }
 0x821   :  { %v929_v26 = vmul.f32 0.35355338, %v910_v25 }
 0x822   :  { %v934_v27 = vadd.f32 %v930_v23, %v5578_v21 }
 0x823   :  { %v4446_v28 = vpop.f32.mrb[10].mxu1  ;;  %v933_v30 = vadd.f32 %v929_v26, %v5583_v24 }
 0x824   :  { %v920_v31 = vpop.f32.mrb[11].mxu1  ;;  %v940_v32 = vsel %vm73_vm0, %v934_v27, -inf  ;;  %v932_v34 = vmul.f32 0.35355338, %v4446_v28 }
 0x825   :  { %v931_v35 = vmul.f32 0.35355338, %v920_v31  ;;  %941 = vmax.xlane.f32.xlu1 %v940_v32  ;;  %v937_v36 = vsel %vm73_vm0, %v933_v30, -inf }
 0x826   :  { %938 = vmax.xlane.f32.xlu0 %v937_v36  ;;  %v936_v39 = vadd.f32 %v932_v34, %v5590_v29 }
 0x827   :  { %v935_v37 = vadd.f32 %v931_v35, %v5596_v33 }
 0x828   :  { %v946_v40 = vsel %vm73_vm0, %v936_v39, -inf }
 0x829   :  { %v943_v38 = vsel %vm73_vm0, %v935_v37, -inf }
 0x82a   :  { %944 = vmax.xlane.f32.xlu0 %v943_v38 }
 0x82e   :  { %947 = vmax.xlane.f32.xlu0 %v946_v40 }
 0x8b2   :  { %v942_v41 = vpop.xlane.xlu1 %941 }
 0x8b3   :  { %v950_v42 = vsub.f32 %v934_v27, %v942_v41  ;;  %v939_v47 = vpop.xlane.xlu0 %938 }
 0x8b4   :  { %v949_v48 = vsub.f32 %v933_v30, %v939_v47 }
 0x8b5   :  { %v955_v49 = vmul.f32 1.442695, %v950_v42 }
 0x8b6   :  { %v953_v50 = vmul.f32 1.442695, %v949_v48 }
 0x8b7   :  { %5206 = vpow2.f32 %v955_v49  ;;  %v945_v56 = vpop.xlane.xlu0 %944 }
 0x8b8   :  { %5208 = vpow2.f32 %v953_v50  ;;  %v951_v57 = vsub.f32 %v935_v37, %v945_v56 }
 0x8ba   :  { %v957_v58 = vmul.f32 1.442695, %v951_v57 }
 0x8bb   :  { %v948_v60 = vpop.xlane.xlu0 %947 }
 0x8bc   :  { %v952_v62 = vsub.f32 %v936_v39, %v948_v60  ;;  %5210 = vpow2.f32 %v957_v58 }
 0x8be   :  { %v959_v0 = vmul.f32 1.442695, %v952_v62 }
 0x8c0   :  { %5212 = vpow2.f32 %v959_v0 }
 0x8c1   :  { %v5207_v51 = vpop.eup %5206 }
 0x8c2   :  { %v5209_v52 = vpop.eup %5208  ;;  %v964_v54 = vsel %vm73_vm0, %v5207_v51, 0.0 }
 0x8c3   :  { %965 = vadd.xlane.f32.xlu1 %v964_v54  ;;  %v961_v55 = vsel %vm73_vm0, %v5209_v52, 0.0 }
 0x8c4   :  { %962 = vadd.xlane.f32.xlu0 %v961_v55 }
 0x8c6   :  { %v5211_v1 = vpop.eup %5210 }
 0x8c7   :  { %v967_v3 = vsel %vm73_vm0, %v5211_v1, 0.0 }
 0x8ca   :  { %v5213_v5 = vpop.eup %5212 }
 0x8cb   :  { %v970_v8 = vsel %vm73_vm0, %v5213_v5, 0.0 }
 0x8d4   :  { %5062 = vrot.lane.b32.xlu1 %v5551_v10, %s6388_s22 }
 0x8d8   :  { %5067 = vrot.lane.b32.xlu1 %v5541_v6, %s6386_s23 }
 0x8da   :  { %5057 = vrot.lane.b32.xlu0 %v5541_v6, %s6388_s22  ;;  %s6414_s22 = smov 72  }
 0x8dc   :  { %5072 = vrot.lane.b32.xlu1 %v5551_v10, %s6386_s23  ;;  %s6415_s23 = smov 104  }
 0x8f9   :  { %968 = vadd.xlane.f32.xlu0 %v967_v3 }
 0x900   :  { %971 = vadd.xlane.f32.xlu1 %v970_v8 }
 0x90f   :  { %1090 = vrot.lane.b32.xlu0 %v5535_v4, %s6384_s24 }
 0x911   :  { %1092 = vrot.lane.b32.xlu1 %v5533_v2, %s6384_s24 }
 0x913   :  { %1094 = vrot.lane.b32.xlu0 %v5545_v9, %s6384_s24 }
 0x915   :  { %1096 = vrot.lane.b32.xlu1 %v5543_v7, %s6384_s24  ;;  %s6416_s24 = smov 40  }
 0x950   :  { %v966_v11 = vpop.xlane.xlu1 %965 }
 0x951   :  { %v963_v12 = vpop.xlane.xlu0 %962 }
 0x952   :  { %5214 = vrcp.f32 %v963_v12 }
 0x953   :  { %5216 = vrcp.f32 %v966_v11 }
 0x954   :  { %v5063_v13 = vpop.permute.xlu1 %5062 }
 0x955   :  { %v5058_v15 = vpop.permute.xlu0 %5057  ;;  %v5065_v16 = vunpack.i.h.bf16 %v5063_v13  ;;  %v5064_v22 = vunpack.i.l.bf16 %v5063_v13 }
 0x956   :  { %v5060_v23 = vunpack.i.h.bf16 %v5058_v15  ;;  %v5059_v25 = vunpack.i.l.bf16 %v5058_v15 }
 0x957   :  { %v4801_v28 = vpack.c.bf16 %v5065_v16, %v5064_v22 }
 0x958   :  { %v5068_v4 = vpop.permute.xlu1 %5067  ;;  %v4797_v26 = vpack.c.bf16 %v5060_v23, %v5059_v25 }
 0x959   :  { %v5070_v27 = vunpack.i.h.bf16 %v5068_v4  ;;  %v5069_v2 = vunpack.i.l.bf16 %v5068_v4 }
 0x95a   :  { %4798 = vmatprep.subr.bf16.mxu0 %v4797_v26 }
 0x95b   :  { %4800 = vmatpush3.bf16.msra.mxu0 %v4797_v26  ;;  %v4805_v31 = vpack.c.bf16 %v5070_v27, %v5069_v2 }
 0x95c   :  { %v5215_v9 = vpop.eup %5214  ;;  %4802 = vmatprep.subr.bf16.mxu0 %v4801_v28  ;;  %v5073_v34 = vpop.permute.xlu1 %5072 }
 0x95d   :  { %v5217_v7 = vpop.eup %5216  ;;  %v974_v30 = vmul.f32 %v5215_v9, %v5209_v52  ;;  %v5075_v35 = vunpack.i.h.bf16 %v5073_v34  ;;  %v5074_v36 = vunpack.i.l.bf16 %v5073_v34 }
 0x95e   :  { %v976_v32 = vmul.f32 %v5217_v7, %v5207_v51 }
 0x95f   :  { %4804 = vmatpush3.bf16.msra.mxu0 %v4801_v28  ;;  %4455 = vmatprep.mubr.msk.f32.mxu0 %vm73_vm0, %v974_v30  ;;  %v4811_v37 = vpack.c.bf16 %v5075_v35, %v5074_v36 }
 0x960   :  { %4807 = vmatprep.subr.msk.bf16.mxu0 %vm5557_vm2, %v4805_v31 }
 0x962   :  { %4456 = vmatmul.mubr.msk.f32.vlgmr.msra.gmra.mrb[12].mxu0 %vm73_vm0, %v976_v32 }
 0x968   :  { %4810 = vmatpush3.bf16.xpose.msk.msra.mxu0 %vm5557_vm2, %v4805_v31 }
 0x969   :  { %4813 = vmatprep.subr.msk.bf16.mxu0 %vm5557_vm2, %v4811_v37 }
 0x970   :  { %4816 = vmatpush3.bf16.xpose.msk.msra.mxu0 %vm5557_vm2, %v4811_v37 }
 0x986   :  { %v969_v38 = vpop.xlane.xlu0 %968 }
 0x987   :  { %5218 = vrcp.f32 %v969_v38 }
 0x98a   :  { %v1091_v47 = vpop.permute.xlu0 %1090 }
 0x98d   :  { %v972_v39 = vpop.xlane.xlu1 %971 }
 0x98e   :  { %5220 = vrcp.f32 %v972_v39  ;;  %v1095_v50 = vpop.permute.xlu0 %1094 }
 0x991   :  { %v5219_v40 = vpop.eup %5218  ;;  %v1093_v49 = vpop.permute.xlu1 %1092 }
 0x992   :  { %v978_v41 = vmul.f32 %v5219_v40, %v5211_v1 }
 0x994   :  { %4458 = vmatprep.mubr.msk.f32.mxu0 %vm73_vm0, %v978_v41 }
 0x995   :  { %v1097_v51 = vpop.permute.xlu1 %1096 }
 0x998   :  { %v5221_v42 = vpop.eup %5220 }
 0x999   :  { %v980_v48 = vmul.f32 %v5221_v42, %v5213_v5 }
 0x99b   :  { %4459 = vmatmul.mubr.msk.f32.gmra.mrb[14].mxu0 %vm73_vm0, %v980_v48 }
 0x99c   :  { %4469 = vmatprep.mubr.msk.f32.mxu0 %vm271_vm1, %v1091_v47 }
 0x99f   :  { %4470 = vmatmul.mubr.msk.f32.vlgmr.msra.gmra.mrb[16].mxu0 %vm271_vm1, %v1093_v49 }
 0x9a0   :  { %4472 = vmatprep.mubr.msk.f32.mxu0 %vm271_vm1, %v1095_v50 }
 0x9a3   :  { %4473 = vmatmul.mubr.msk.f32.gmra.mrb[18].mxu0 %vm271_vm1, %v1097_v51 }
 0xa35   :  { %v4457_v52 = vpop.f32.mrb[12].mxu0 }
 0xa36   :  { %v1071_v54 = vpop.f32.mrb[13].mxu0 }
 0xa6e   :  { %v5743_v55 = vpop.f32.mrb[14].mxu0 }
 0xa6f   :  { %v5745_v56 = vpop.f32.mrb[15].mxu0 }
 0xa72   :  { %v4471_v57 = vpop.f32.mrb[16].mxu0 }
 0xa73   :  { %v1208_v58 = vmul.f32 0.35355338, %v4471_v57  ;;  %v1188_v60 = vpop.f32.mrb[17].mxu0 }
 0xa74   :  { %v1207_v62 = vmul.f32 0.35355338, %v1188_v60 }
 0xa75   :  { %v1212_v0 = vadd.f32 %v1208_v58, %v5578_v21 }
 0xa76   :  { %v4474_v1 = vpop.f32.mrb[18].mxu0  ;;  %v1211_v3 = vadd.f32 %v1207_v62, %v5583_v24  ;;  %v1430_v62 = vld [vmem:[%s6362_s6] sm:$0xff] }
 0xa77   :  { %v1198_v5 = vpop.f32.mrb[19].mxu0  ;;  %v1218_v8 = vsel %vm73_vm0, %v1212_v0, -inf  ;;  %v1210_v11 = vmul.f32 0.35355338, %v4474_v1  ;;  %v1432_v1 = vld [vmem:[%s6362_s6 + $0x10] sm:$0xff] }
 0xa78   :  { %v1209_v12 = vmul.f32 0.35355338, %v1198_v5  ;;  %1219 = vmax.xlane.f32.xlu1 %v1218_v8  ;;  %v1215_v13 = vsel %vm73_vm0, %v1211_v3, -inf  ;;  %v1433_v5 = vld [vmem:[%s6362_s6 + $0x18] sm:$0xff] }
 0xa79   :  { %1216 = vmax.xlane.f32.xlu0 %v1215_v13  ;;  %v1214_v22 = vadd.f32 %v1210_v11, %v5590_v29  ;;  %v4829_v8 = vpack.c.bf16 %v1433_v5, %v1432_v1 }
 0xa7a   :  { %v1213_v15 = vadd.f32 %v1209_v12, %v5596_v33 }
 0xa7b   :  { %v1224_v21 = vsel %vm73_vm0, %v1214_v22, -inf }
 0xa7c   :  { %v1221_v16 = vsel %vm73_vm0, %v1213_v15, -inf }
 0xa7d   :  { %1222 = vmax.xlane.f32.xlu0 %v1221_v16 }
 0xa81   :  { %1225 = vmax.xlane.f32.xlu0 %v1224_v21 }
 0xb05   :  { %v1220_v24 = vpop.xlane.xlu1 %1219 }
 0xb06   :  { %v1228_v23 = vsub.f32 %v1212_v0, %v1220_v24  ;;  %v1217_v25 = vpop.xlane.xlu0 %1216  ;;  %v1431_v0 = vld [vmem:[%s6362_s6 + $0x8] sm:$0xff] }
 0xb07   :  { %v1227_v4 = vsub.f32 %v1211_v3, %v1217_v25  ;;  %v4825_v3 = vpack.c.bf16 %v1431_v0, %v1430_v62 }
 0xb08   :  { %v1233_v26 = vmul.f32 1.442695, %v1228_v23 }
 0xb09   :  { %v1231_v27 = vmul.f32 1.442695, %v1227_v4 }
 0xb0a   :  { %5222 = vpow2.f32 %v1233_v26  ;;  %v1223_v2 = vpop.xlane.xlu0 %1222 }
 0xb0b   :  { %5224 = vpow2.f32 %v1231_v27  ;;  %v1229_v28 = vsub.f32 %v1213_v15, %v1223_v2 }
 0xb0d   :  { %v1235_v9 = vmul.f32 1.442695, %v1229_v28 }
 0xb0e   :  { %v1226_v33 = vpop.xlane.xlu0 %1225 }
 0xb0f   :  { %5226 = vpow2.f32 %v1235_v9  ;;  %v1230_v7 = vsub.f32 %v1214_v22, %v1226_v33 }
 0xb11   :  { %v1237_v30 = vmul.f32 1.442695, %v1230_v7 }
 0xb13   :  { %5228 = vpow2.f32 %v1237_v30 }
 0xb14   :  { %v5223_v29 = vpop.eup %5222 }
 0xb15   :  { %v5225_v31 = vpop.eup %5224  ;;  %v1242_v32 = vsel %vm73_vm0, %v5223_v29, 0.0 }
 0xb16   :  { %1243 = vadd.xlane.f32.xlu1 %v1242_v32  ;;  %v1239_v34 = vsel %vm73_vm0, %v5225_v31, 0.0 }
 0xb17   :  { %1240 = vadd.xlane.f32.xlu0 %v1239_v34 }
 0xb19   :  { %v5227_v35 = vpop.eup %5226 }
 0xb1a   :  { %v1245_v36 = vsel %vm73_vm0, %v5227_v35, 0.0 }
 0xb1b   :  { %1246 = vadd.xlane.f32.xlu0 %v1245_v36 }
 0xb1d   :  { %v5229_v37 = vpop.eup %5228 }
 0xb1e   :  { %v1248_v38 = vsel %vm73_vm0, %v5229_v37, 0.0 }
 0xb1f   :  { %1249 = vadd.xlane.f32.xlu1 %v1248_v38 }
 0xb30   :  { %5082 = vrot.lane.b32.xlu1 %v5551_v10, %s6382_s2 }
 0xb31   :  { %5077 = vrot.lane.b32.xlu0 %v5541_v6, %s6382_s2  ;;  %s6396_s2 = smov 24  }
 0xb34   :  { %1372 = vrot.lane.b32.xlu1 %v5693_v18, %s6380_s25 }
 0xb35   :  { %1388 = vrot.lane.b32.xlu0 %v1071_v54, %s5366_s3 }
 0xb38   :  { %1374 = vrot.lane.b32.xlu1 %v5691_v17, %s6380_s25 }
 0xb39   :  { %1376 = vrot.lane.b32.xlu0 %v5697_v20, %s6380_s25 }
 0xb3c   :  { %1390 = vrot.lane.b32.xlu1 %v4457_v52, %s5366_s3 }
 0xb40   :  { %1378 = vrot.lane.b32.xlu1 %v5695_v19, %s6380_s25 }
 0xba3   :  { %v1244_v6 = vpop.xlane.xlu1 %1243 }
 0xba4   :  { %v1241_v10 = vpop.xlane.xlu0 %1240 }
 0xba5   :  { %5230 = vrcp.f32 %v1241_v10 }
 0xba6   :  { %5232 = vrcp.f32 %v1244_v6 }
 0xba8   :  { %v1247_v39 = vpop.xlane.xlu0 %1246 }
 0xba9   :  { %5234 = vrcp.f32 %v1247_v39 }
 0xbac   :  { %v1250_v18 = vpop.xlane.xlu1 %1249  ;;  %v5078_v40 = vpop.permute.xlu0 %5077 }
 0xbad   :  { %v5080_v41 = vunpack.i.h.bf16 %v5078_v40  ;;  %v5079_v42 = vunpack.i.l.bf16 %v5078_v40  ;;  %5236 = vrcp.f32 %v1250_v18 }
 0xbaf   :  { %v5231_v17 = vpop.eup %5230  ;;  %v4817_v47 = vpack.c.bf16 %v5080_v41, %v5079_v42 }
 0xbb0   :  { %v5083_v48 = vpop.permute.xlu1 %5082  ;;  %v1252_v20 = vmul.f32 %v5231_v17, %v5225_v31  ;;  %v5233_v51 = vpop.eup %5232 }
 0xbb1   :  { %v5085_v49 = vunpack.i.h.bf16 %v5083_v48  ;;  %v5084_v50 = vunpack.i.l.bf16 %v5083_v48  ;;  %4818 = vmatprep.subr.bf16.mxu1 %v4817_v47  ;;  %v1254_v54 = vmul.f32 %v5233_v51, %v5223_v29  ;;  %v1389_v24 = vpop.permute.xlu0 %1388 }
 0xbb2   :  { %4820 = vmatpush3.bf16.msra.mxu1 %v4817_v47  ;;  %4483 = vmatprep.mubr.msk.f32.mxu1 %vm73_vm0, %v1252_v20 }
 0xbb3   :  { %v4821_v19 = vpack.c.bf16 %v5085_v49, %v5084_v50  ;;  %v5235_v52 = vpop.eup %5234 }
 0xbb4   :  { %v1256_v58 = vmul.f32 %v5235_v52, %v5227_v35  ;;  %v1373_v16 = vpop.permute.xlu1 %1372 }
 0xbb5   :  { %4822 = vmatprep.subr.bf16.mxu1 %v4821_v19  ;;  %v1377_v25 = vpop.permute.xlu0 %1376  ;;  %v1416_v4 = vsel %vm271_vm1, %v5641_v44, %v1373_v16 }
 0xbb6   :  { %4824 = vmatpush3.bf16.msra.mxu1 %v4821_v19  ;;  %v1418_v7 = vsel %vm271_vm1, %v5645_v46, %v1377_v25  ;;  %v4026_v46 = vld [vmem:[%s6363_s7] ss:$0 sm:$0xff] }
 0xbb7   :  { %v5237_v57 = vpop.eup %5236  ;;  %4826 = vmatprep.subr.bf16.mxu1 %v4825_v3 }
 0xbb8   :  { %v1258_v60 = vmul.f32 %v5237_v57, %v5229_v37  ;;  %v1375_v22 = vpop.permute.xlu1 %1374 }
 0xbb9   :  { %4484 = vmatmul.mubr.msk.f32.vlgmr.msra.gmra.mrb[12].mxu1 %vm73_vm0, %v1254_v54  ;;  %v1417_v26 = vsel %vm271_vm1, %v5639_v43, %v1375_v22  ;;  %v1618_v22 = vld [vmem:[%s6364_s10 + $0x10] sm:$0xff] }
 0xbba   :  { %4486 = vmatprep.mubr.msk.f32.mxu1 %vm73_vm0, %v1256_v58  ;;  %4828 = vmatpush3.bf16.msra.mxu1 %v4825_v3 }
 0xbbb   :  { %4830 = vmatprep.subr.bf16.mxu1 %v4829_v8 }
 0xbbc   :  { %v1391_v21 = vpop.permute.xlu1 %1390 }
 0xbbd   :  { %4487 = vmatmul.mubr.msk.f32.gmra.mrb[14].mxu1 %vm73_vm0, %v1258_v60  ;;  %v1422_v2 = vsel %vm1420_vm3, %v1417_v26, %v1391_v21  ;;  %v1619_v21 = vld [vmem:[%s6364_s10 + $0x18] sm:$0xff] }
 0xbbe   :  { %4832 = vmatpush3.bf16.msra.mxu1 %v4829_v8 }
 0xbc0   :  { %v1379_v23 = vpop.permute.xlu1 %1378 }
 0xbc1   :  { %v1419_v43 = vsel %vm271_vm1, %v5643_v45, %v1379_v23 }
 0xc8c   :  { %v4485_v11 = vpop.f32.mrb[12].mxu1 }
 0xc8d   :  { %1406 = vrot.lane.b32.xlu1 %v4485_v11, %s6396_s2  ;;  %v1349_v12 = vpop.f32.mrb[13].mxu1 }
 0xc8e   :  { %1404 = vrot.lane.b32.xlu0 %v1349_v12, %s6396_s2 }
 0xc90   :  { %v4488_v13 = vpop.f32.mrb[14].mxu1 }
 0xc91   :  { %1394 = vrot.lane.b32.xlu1 %v5743_v55, %s5366_s3  ;;  %v1359_v15 = vpop.f32.mrb[15].mxu1 }
 0xc92   :  { %1392 = vrot.lane.b32.xlu0 %v5745_v56, %s5366_s3  ;;  %v1421_v56 = vsel %vm1420_vm3, %v1416_v4, %v1389_v24  ;;  %v4837_v24 = vpack.c.bf16 %v1619_v21, %v1618_v22 }
 0xc95   :  { %1410 = vrot.lane.b32.xlu1 %v4488_v13, %s6396_s2  ;;  %v1616_v13 = vld [vmem:[%s6364_s10] sm:$0xff] }
 0xc96   :  { %1408 = vrot.lane.b32.xlu0 %v1359_v15, %s6396_s2  ;;  %v1617_v15 = vld [vmem:[%s6364_s10 + $0x8] sm:$0xff] }
 0xc97   :  { %v4833_v16 = vpack.c.bf16 %v1617_v15, %v1616_v13 }
 0xc99   :  { %4834 = vmatprep.subr.bf16.mxu0 %v4833_v16 }
 0xc9a   :  { %4836 = vmatpush3.bf16.msra.mxu0 %v4833_v16 }
 0xc9b   :  { %4838 = vmatprep.subr.bf16.mxu0 %v4837_v24 }
 0xc9e   :  { %4840 = vmatpush3.bf16.msra.mxu0 %v4837_v24 }
 0xcff   :  { %v1407_v55 = vpop.permute.xlu1 %1406 }
 0xd00   :  { %v1405_v27 = vpop.permute.xlu0 %1404  ;;  %v1427_v9 = vsel %vm1425_vm4, %v1422_v2, %v1407_v55 }
 0xd01   :  { %v1426_v28 = vsel %vm1425_vm4, %v1421_v56, %v1405_v27 }
 0xd02   :  { %4497 = vmatprep.mubr.msk.f32.mxu1 %vm73_vm0, %v1426_v28 }
 0xd03   :  { %v1395_v33 = vpop.permute.xlu1 %1394  ;;  %4498 = vmatmul.mubr.msk.f32.vlgmr.msra.gmra.mrb[16].mxu1 %vm73_vm0, %v1427_v9 }
 0xd04   :  { %v1393_v44 = vpop.permute.xlu0 %1392  ;;  %v1424_v32 = vsel %vm1420_vm3, %v1419_v43, %v1395_v33 }
 0xd05   :  { %v1423_v29 = vsel %vm1420_vm3, %v1418_v7, %v1393_v44  ;;  %v4031_v7 = vld [vmem:[%s6365_s8] ss:$0 sm:$0xff] }
 0xd07   :  { %v1411_v30 = vpop.permute.xlu1 %1410 }
 0xd08   :  { %v1409_v31 = vpop.permute.xlu0 %1408  ;;  %v1429_v35 = vsel %vm1425_vm4, %v1424_v32, %v1411_v30  ;;  %v4032_v32 = vld [vmem:[%s6366_s9] ss:$0 sm:$0xff] }
 0xd09   :  { %v1428_v34 = vsel %vm1425_vm4, %v1423_v29, %v1409_v31 }
 0xd0a   :  { %4500 = vmatprep.mubr.msk.f32.mxu1 %vm73_vm0, %v1428_v34 }
 0xd0b   :  { %4501 = vmatmul.mubr.msk.f32.gmra.mrb[18].mxu1 %vm73_vm0, %v1429_v35 }
 0xdd6   :  { %v4499_v36 = vpop.f32.mrb[16].mxu1 }
 0xdd7   :  { %v1525_v37 = vadd.f32 %v4499_v36, %v4026_v46  ;;  %v1519_v45 = vpop.f32.mrb[17].mxu1 }
 0xdd8   :  { %v1520_v38 = vadd.f32 %v4026_v46, %v1519_v45 }
 0xdd9   :  { %v1539_v10 = vadd.f32 %v1525_v37, %v5518_v59 }
 0xdda   :  { %v1538_v6 = vadd.f32 %v1520_v38, %v5514_v53 }
 0xddb   :  { %v1547_v39 = vsel %vm73_vm0, %v1539_v10, 0.0 }
 0xddc   :  { %1548 = vadd.xlane.f32.xlu1 %v1547_v39  ;;  %v1544_v18 = vsel %vm73_vm0, %v1538_v6, 0.0 }
 0xddd   :  { %1545 = vadd.xlane.f32.xlu0 %v1544_v18 }
 0xdde   :  { %v4502_v40 = vpop.f32.mrb[18].mxu1 }
 0xddf   :  { %v1529_v41 = vpop.f32.mrb[19].mxu1  ;;  %v1535_v42 = vadd.f32 %v4502_v40, %v4026_v46 }
 0xde0   :  { %v1530_v17 = vadd.f32 %v4026_v46, %v1529_v41  ;;  %v1760_v41 = vld [vmem:[%s6367_s12] sm:$0xff] }
 0xde1   :  { %v1541_v20 = vadd.f32 %v1535_v42, %v5526_v63  ;;  %v1761_v42 = vld [vmem:[%s6367_s12 + $0x8] sm:$0xff] }
 0xde2   :  { %v1540_v47 = vadd.f32 %v1530_v17, %v5520_v61  ;;  %v4841_v17 = vpack.c.bf16 %v1761_v42, %v1760_v41 }
 0xde3   :  { %v1553_v59 = vsel %vm73_vm0, %v1541_v20, 0.0 }
 0xde4   :  { %v1550_v48 = vsel %vm73_vm0, %v1540_v47, 0.0  ;;  %4842 = vmatprep.subr.bf16.mxu1 %v4841_v17 }
 0xde5   :  { %1551 = vadd.xlane.f32.xlu0 %v1550_v48  ;;  %4844 = vmatpush3.bf16.msra.mxu1 %v4841_v17  ;;  %v1763_v48 = vld [vmem:[%s6367_s12 + $0x18] sm:$0xff] }
 0xde9   :  { %1554 = vadd.xlane.f32.xlu0 %v1553_v59  ;;  %v1764_v59 = vld [vmem:[%s6367_s12 + $0x20] sm:$0xff] }
 0xe69   :  { %v1549_v53 = vpop.xlane.xlu1 %1548 }
 0xe6a   :  { %v1557_v49 = vmul.f32 0.03125, %v1549_v53  ;;  %v1546_v50 = vpop.xlane.xlu0 %1545  ;;  %v1765_v53 = vld [vmem:[%s6367_s12 + $0x28] sm:$0xff] }
 0xe6b   :  { %v1556_v19 = vmul.f32 0.03125, %v1546_v50  ;;  %v1766_v50 = vld [vmem:[%s6367_s12 + $0x30] sm:$0xff] }
 0xe6c   :  { %v1561_v51 = vsub.f32 %v1539_v10, %v1557_v49  ;;  %v4849_v49 = vpack.c.bf16 %v1765_v53, %v1764_v59 }
 0xe6d   :  { %v1560_v52 = vsub.f32 %v1538_v6, %v1556_v19  ;;  %v1767_v19 = vld [vmem:[%s6367_s12 + $0x38] sm:$0xff] }
 0xe6e   :  { %v1565_v54 = vmul.f32 %v1561_v51, %v1561_v51 }
 0xe6f   :  { %v1564_v57 = vmul.f32 %v1560_v52, %v1560_v52 }
 0xe70   :  { %v1571_v58 = vsel %vm73_vm0, %v1565_v54, 0.0 }
 0xe71   :  { %1572 = vadd.xlane.f32.xlu1 %v1571_v58  ;;  %v1568_v61 = vsel %vm73_vm0, %v1564_v57, 0.0 }
 0xe72   :  { %1569 = vadd.xlane.f32.xlu0 %v1568_v61  ;;  %v1552_v60 = vpop.xlane.xlu0 %1551 }
 0xe73   :  { %v1558_v63 = vmul.f32 0.03125, %v1552_v60 }
 0xe75   :  { %v1562_v62 = vsub.f32 %v1540_v47, %v1558_v63  ;;  %v1762_v47 = vld [vmem:[%s6367_s12 + $0x10] sm:$0xff] }
 0xe76   :  { %v1555_v0 = vpop.xlane.xlu0 %1554 }
 0xe77   :  { %v1559_v1 = vmul.f32 0.03125, %v1555_v0  ;;  %v1566_v3 = vmul.f32 %v1562_v62, %v1562_v62 }
 0xe79   :  { %v1563_v5 = vsub.f32 %v1541_v20, %v1559_v1  ;;  %v1574_v8 = vsel %vm73_vm0, %v1566_v3, 0.0  ;;  %v4845_v20 = vpack.c.bf16 %v1763_v48, %v1762_v47 }
 0xe7a   :  { %1575 = vadd.xlane.f32.xlu0 %v1574_v8 }
 0xe7b   :  { %v1567_v11 = vmul.f32 %v1563_v5, %v1563_v5  ;;  %4846 = vmatprep.subr.bf16.mxu1 %v4845_v20 }
 0xe7c   :  { %4848 = vmatpush3.bf16.msra.mxu1 %v4845_v20 }
 0xe7d   :  { %v1577_v12 = vsel %vm73_vm0, %v1567_v11, 0.0  ;;  %4850 = vmatprep.subr.bf16.mxu1 %v4849_v49 }
 0xe7e   :  { %1578 = vadd.xlane.f32.xlu1 %v1577_v12 }
 0xe80   :  { %4852 = vmatpush3.bf16.msra.mxu1 %v4849_v49 }
 0xefe   :  { %v1573_v23 = vpop.xlane.xlu1 %1572 }
 0xeff   :  { %v1581_v25 = vmul.f32 0.03125, %v1573_v23  ;;  %v1570_v4 = vpop.xlane.xlu0 %1569 }
 0xf00   :  { %v1580_v55 = vmul.f32 0.03125, %v1570_v4 }
 0xf01   :  { %v1585_v26 = vadd.f32 1e-12, %v1581_v25 }
 0xf02   :  { %v1584_v56 = vadd.f32 1e-12, %v1580_v55 }
 0xf03   :  { %5238 = vrsqrt.f32 %v1585_v26 }
 0xf04   :  { %5240 = vrsqrt.f32 %v1584_v56 }
 0xf07   :  { %v1576_v27 = vpop.xlane.xlu0 %1575 }
 0xf08   :  { %v1582_v2 = vmul.f32 0.03125, %v1576_v27 }
 0xf0a   :  { %v1586_v28 = vadd.f32 1e-12, %v1582_v2 }
 0xf0b   :  { %v1579_v9 = vpop.xlane.xlu1 %1578 }
 0xf0c   :  { %5242 = vrsqrt.f32 %v1586_v28  ;;  %v1583_v33 = vmul.f32 0.03125, %v1579_v9 }
 0xf0d   :  { %v5239_v44 = vpop.eup %5238 }
 0xf0e   :  { %v5241_v30 = vpop.eup %5240  ;;  %v1593_v43 = vmul.f32 %v5239_v44, %v1561_v51  ;;  %v1587_v29 = vadd.f32 1e-12, %v1583_v33  ;;  %v4853_v51 = vpack.c.bf16 %v1767_v19, %v1766_v50 }
 0xf0f   :  { %v1592_v31 = vmul.f32 %v5241_v30, %v1560_v52  ;;  %v4033_v52 = vld [vmem:[%s6368_s11] ss:$0 sm:$0xff] }
 0xf10   :  { %5244 = vrsqrt.f32 %v1587_v29  ;;  %v1603_v34 = vmul.f32 %v4031_v7, %v1593_v43  ;;  %4854 = vmatprep.subr.bf16.mxu1 %v4853_v51 }
 0xf11   :  { %v1602_v35 = vmul.f32 %v4031_v7, %v1592_v31  ;;  %4856 = vmatpush3.bf16.msra.mxu1 %v4853_v51 }
 0xf12   :  { %v5852_v36 = vadd.f32 %v4032_v32, %v1603_v34 }
 0xf13   :  { %v5850_v46 = vadd.f32 %v4032_v32, %v1602_v35 }
 0xf15   :  { %4511 = vmatprep.mubr.msk.f32.mxu0 %vm73_vm0, %v5850_v46 }
 0xf16   :  { %v5243_v37 = vpop.eup %5242  ;;  %4512 = vmatmul.mubr.msk.f32.vlgmr.msra.gmra.mrb[20].mxu0 %vm73_vm0, %v5852_v36 }
 0xf17   :  { %v1594_v45 = vmul.f32 %v5243_v37, %v1562_v62 }
 0xf19   :  { %v1604_v38 = vmul.f32 %v4031_v7, %v1594_v45 }
 0xf1a   :  { %v5245_v10 = vpop.eup %5244 }
 0xf1b   :  { %v5858_v6 = vadd.f32 %v4032_v32, %v1604_v38  ;;  %v1595_v39 = vmul.f32 %v5245_v10, %v1563_v5 }
 0xf1d   :  { %4514 = vmatprep.mubr.msk.f32.mxu0 %vm73_vm0, %v5858_v6  ;;  %v1605_v18 = vmul.f32 %v4031_v7, %v1595_v39  ;;  %v4038_v39 = vld [vmem:[%s6369_s13] ss:$0 sm:$0xff] }
 0xf1f   :  { %v5862_v40 = vadd.f32 %v4032_v32, %v1605_v18 }
 0xf21   :  { %4515 = vmatmul.mubr.msk.f32.gmra.mrb[22].mxu0 %vm73_vm0, %v5862_v40 }
 0xfe9   :  { %v4513_v54 = vpop.f32.mrb[20].mxu0 }
 0xfea   :  { %v1711_v57 = vadd.f32 %v4513_v54, %v4033_v52  ;;  %v1705_v58 = vpop.f32.mrb[21].mxu0 }
 0xfeb   :  { %v1706_v61 = vadd.f32 %v4033_v52, %v1705_v58 }
 0xfec   :  { %v1725_v60 = vmul.f32 %v1711_v57, %v1711_v57 }
 0xfed   :  { %v1724_v63 = vmul.f32 %v1706_v61, %v1706_v61 }
 0xfee   :  { %v1729_v62 = vmul.f32 %v1725_v60, %v1711_v57 }
 0xfef   :  { %v1728_v0 = vmul.f32 %v1724_v63, %v1706_v61 }
 0xff0   :  { %v1733_v1 = vmul.f32 0.044715, %v1729_v62 }
 0xff1   :  { %v1732_v3 = vmul.f32 0.044715, %v1728_v0 }
 0xff2   :  { %v1737_v5 = vadd.f32 %v1733_v1, %v1711_v57 }
 0xff3   :  { %v1736_v8 = vadd.f32 %v1732_v3, %v1706_v61 }
 0xff4   :  { %v1741_v11 = vmul.f32 0.7978846, %v1737_v5  ;;  %v4516_v12 = vpop.f32.mrb[22].mxu0 }
 0xff5   :  { %v1740_v13 = vmul.f32 0.7978846, %v1736_v8  ;;  %v1721_v15 = vadd.f32 %v4516_v12, %v4033_v52  ;;  %v1715_v16 = vpop.f32.mrb[23].mxu0 }
 0xff6   :  { %5246 = vtanh.f32 %v1741_v11  ;;  %v1716_v22 = vadd.f32 %v4033_v52, %v1715_v16 }
 0xff7   :  { %5248 = vtanh.f32 %v1740_v13  ;;  %v1727_v21 = vmul.f32 %v1721_v15, %v1721_v15 }
 0xff8   :  { %v1726_v24 = vmul.f32 %v1716_v22, %v1716_v22 }
 0xff9   :  { %v1731_v23 = vmul.f32 %v1727_v21, %v1721_v15  ;;  %v4045_v21 = vld [vmem:[%s6404_s29 + $0x20] sm:$0xff] }
 0xffa   :  { %v1730_v25 = vmul.f32 %v1726_v24, %v1716_v22  ;;  %v4046_v24 = vld [vmem:[%s6404_s29 + $0x28] sm:$0xff] }
 0xffb   :  { %v1735_v4 = vmul.f32 0.044715, %v1731_v23  ;;  %v4857_v23 = vpack.c.bf16 %v4046_v24, %v4045_v21 }
 0xffc   :  { %v1734_v55 = vmul.f32 0.044715, %v1730_v25  ;;  %v4047_v25 = vld [vmem:[%s6404_s29 + $0x30] sm:$0xff] }
 0xffd   :  { %v1739_v26 = vadd.f32 %v1735_v4, %v1721_v15  ;;  %v4048_v4 = vld [vmem:[%s6404_s29 + $0x38] sm:$0xff]  ;;  %4858 = vmatprep.subr.bf16.mxu0 %v4857_v23 }
 0xffe   :  { %v1738_v56 = vadd.f32 %v1734_v55, %v1716_v22  ;;  %v4861_v55 = vpack.c.bf16 %v4048_v4, %v4047_v25  ;;  %4860 = vmatpush3.bf16.msra.mxu0 %v4857_v23 }
 0xfff   :  { %v1743_v27 = vmul.f32 0.7978846, %v1739_v26 }
0x1000   :  { %v5247_v2 = vpop.eup %5246  ;;  %v1742_v28 = vmul.f32 0.7978846, %v1738_v56  ;;  %4862 = vmatprep.subr.bf16.mxu0 %v4861_v55 }
0x1001   :  { %v5249_v9 = vpop.eup %5248  ;;  %v1749_v33 = vadd.f32 1.0, %v5247_v2  ;;  %5250 = vtanh.f32 %v1743_v27 }
0x1002   :  { %5252 = vtanh.f32 %v1742_v28  ;;  %v1748_v44 = vadd.f32 1.0, %v5249_v9  ;;  %4864 = vmatpush3.bf16.msra.mxu0 %v4861_v55 }
0x1003   :  { %v1753_v7 = vmul.f32 0.5, %v1749_v33 }
0x1004   :  { %v1752_v30 = vmul.f32 0.5, %v1748_v44 }
0x1005   :  { %v1757_v29 = vmul.f32 %v1753_v7, %v1711_v57 }
0x1006   :  { %v1756_v43 = vmul.f32 %v1752_v30, %v1706_v61 }
0x1008   :  { %4533 = vmatprep.mubr.msk.f32.mxu1 %vm1775_vm5, %v1756_v43 }
0x1009   :  { %4534 = vmatmul.mubr.msk.f32.vlgmr.msra.gmra.mrb[20].mxu1 %vm1775_vm5, %v1757_v29 }
0x100b   :  { %v5251_v31 = vpop.eup %5250 }
0x100c   :  { %v5253_v32 = vpop.eup %5252  ;;  %v1751_v34 = vadd.f32 1.0, %v5251_v31 }
0x100d   :  { %v1750_v35 = vadd.f32 1.0, %v5253_v32  ;;  %v4043_v32 = vld [vmem:[%s6370_s14] ss:$0 sm:$0xff] }
0x100e   :  { %v1755_v37 = vmul.f32 0.5, %v1751_v34 }
0x100f   :  { %v1754_v45 = vmul.f32 0.5, %v1750_v35 }
0x1010   :  { %v1759_v10 = vmul.f32 %v1755_v37, %v1721_v15 }
0x1011   :  { %v1758_v38 = vmul.f32 %v1754_v45, %v1716_v22  ;;  %v4044_v45 = vld [vmem:[%s6371_s15] ss:$0 sm:$0xff] }
0x1013   :  { %4536 = vmatprep.mubr.msk.f32.mxu1 %vm1775_vm5, %v1758_v38 }
0x1014   :  { %4537 = vmatmul.mubr.msk.f32.gmra.mrb[22].mxu1 %vm1775_vm5, %v1759_v10 }
0x10dc   :  { %v4535_v18 = vpop.f32.mrb[20].mxu1 }
0x10dd   :  { %v1860_v41 = vadd.f32 %v4535_v18, %v4038_v39  ;;  %v1854_v42 = vpop.f32.mrb[21].mxu1 }
0x10de   :  { %v1855_v17 = vadd.f32 %v4038_v39, %v1854_v42 }
0x10df   :  { %v1874_v47 = vadd.f32 %v1860_v41, %v5852_v36 }
0x10e0   :  { %v1873_v48 = vadd.f32 %v1855_v17, %v5850_v46 }
0x10e1   :  { %v1882_v20 = vsel %vm73_vm0, %v1874_v47, 0.0 }
0x10e2   :  { %1883 = vadd.xlane.f32.xlu1 %v1882_v20  ;;  %v1879_v59 = vsel %vm73_vm0, %v1873_v48, 0.0 }
0x10e3   :  { %1880 = vadd.xlane.f32.xlu0 %v1879_v59 }
0x10e7   :  { %v4538_v53 = vpop.f32.mrb[22].mxu1 }
0x10e8   :  { %v1870_v49 = vadd.f32 %v4538_v53, %v4038_v39  ;;  %v1864_v50 = vpop.f32.mrb[23].mxu1 }
0x10e9   :  { %v1865_v19 = vadd.f32 %v4038_v39, %v1864_v50 }
0x10ea   :  { %v1876_v51 = vadd.f32 %v1870_v49, %v5862_v40  ;;  %v4050_v49 = vld [vmem:[%s6407_s30 + $0x1] ss:$0 sm:$0xff]  ;;  %s6417_s30 = smov 8  }
0x10eb   :  { %v1875_v52 = vadd.f32 %v1865_v19, %v5858_v6 }
0x10ec   :  { %v1888_v54 = vsel %vm73_vm0, %v1876_v51, 0.0 }
0x10ed   :  { %1889 = vadd.xlane.f32.xlu1 %v1888_v54  ;;  %v1885_v36 = vsel %vm73_vm0, %v1875_v52, 0.0 }
0x10ee   :  { %1886 = vadd.xlane.f32.xlu0 %v1885_v36 }
0x116f   :  { %v1884_v46 = vpop.xlane.xlu1 %1883 }
0x1170   :  { %v1892_v57 = vmul.f32 0.03125, %v1884_v46  ;;  %v1881_v58 = vpop.xlane.xlu0 %1880 }
0x1171   :  { %v1891_v61 = vmul.f32 0.03125, %v1881_v58 }
0x1172   :  { %v1896_v60 = vsub.f32 %v1874_v47, %v1892_v57 }
0x1173   :  { %v1895_v63 = vsub.f32 %v1873_v48, %v1891_v61 }
0x1174   :  { %v1900_v62 = vmul.f32 %v1896_v60, %v1896_v60 }
0x1175   :  { %v1899_v0 = vmul.f32 %v1895_v63, %v1895_v63 }
0x1176   :  { %v1906_v1 = vsel %vm73_vm0, %v1900_v62, 0.0 }
0x1177   :  { %1907 = vadd.xlane.f32.xlu1 %v1906_v1  ;;  %v1903_v40 = vsel %vm73_vm0, %v1899_v0, 0.0 }
0x1178   :  { %1904 = vadd.xlane.f32.xlu0 %v1903_v40 }
0x117a   :  { %v1890_v6 = vpop.xlane.xlu1 %1889 }
0x117b   :  { %v1894_v3 = vmul.f32 0.03125, %v1890_v6  ;;  %v1887_v5 = vpop.xlane.xlu0 %1886 }
0x117c   :  { %v1893_v8 = vmul.f32 0.03125, %v1887_v5 }
0x117d   :  { %v1898_v11 = vsub.f32 %v1876_v51, %v1894_v3 }
0x117e   :  { %v1897_v12 = vsub.f32 %v1875_v52, %v1893_v8 }
0x117f   :  { %v1902_v13 = vmul.f32 %v1898_v11, %v1898_v11 }
0x1180   :  { %v1901_v15 = vmul.f32 %v1897_v12, %v1897_v12 }
0x1181   :  { %v1912_v16 = vsel %vm73_vm0, %v1902_v13, 0.0  ;;  %v5988_v13 = vld [vmem:[%s6361_s1 + $0x8] sm:$0xff] }
0x1182   :  { %1913 = vadd.xlane.f32.xlu1 %v1912_v16  ;;  %v1909_v22 = vsel %vm73_vm0, %v1901_v15, 0.0  ;;  %v5994_v16 = vld [vmem:[%s6361_s1] sm:$0xff] }
0x1183   :  { %1910 = vadd.xlane.f32.xlu0 %v1909_v22 }
0x1204   :  { %v1908_v26 = vpop.xlane.xlu1 %1907 }
0x1205   :  { %v1916_v56 = vmul.f32 0.03125, %v1908_v26  ;;  %v1905_v27 = vpop.xlane.xlu0 %1904  ;;  %v6002_v26 = vld [vmem:[%s6361_s1 + $0x18] sm:$0xff] }
0x1206   :  { %v1915_v2 = vmul.f32 0.03125, %v1905_v27  ;;  %v6008_v27 = vld [vmem:[%s6361_s1 + $0x10] sm:$0xff]  ;;  %s6410_s1 = smov 56  }
0x1207   :  { %v1920_v28 = vadd.f32 1e-12, %v1916_v56 }
0x1208   :  { %v1919_v9 = vadd.f32 1e-12, %v1915_v2 }
0x1209   :  { %5254 = vrsqrt.f32 %v1920_v28 }
0x120a   :  { %5256 = vrsqrt.f32 %v1919_v9 }
0x120f   :  { %v1914_v33 = vpop.xlane.xlu1 %1913 }
0x1210   :  { %v1918_v44 = vmul.f32 0.03125, %v1914_v33  ;;  %v1911_v7 = vpop.xlane.xlu0 %1910 }
0x1211   :  { %v1917_v30 = vmul.f32 0.03125, %v1911_v7 }
0x1212   :  { %v1922_v43 = vadd.f32 1e-12, %v1918_v44 }
0x1213   :  { %v5255_v29 = vpop.eup %5254  ;;  %v1921_v31 = vadd.f32 1e-12, %v1917_v30 }
0x1214   :  { %v5257_v34 = vpop.eup %5256  ;;  %v1928_v35 = vmul.f32 %v5255_v29, %v1896_v60  ;;  %5258 = vrsqrt.f32 %v1922_v43 }
0x1215   :  { %5260 = vrsqrt.f32 %v1921_v31  ;;  %v1927_v37 = vmul.f32 %v5257_v34, %v1895_v63 }
0x1216   :  { %v1938_v38 = vmul.f32 %v4043_v32, %v1928_v35 }
0x1217   :  { %v1937_v10 = vmul.f32 %v4043_v32, %v1927_v37 }
0x1218   :  { %v5932_v18 = vadd.f32 %v4044_v45, %v1938_v38 }
0x1219   :  { %v5930_v39 = vadd.f32 %v4044_v45, %v1937_v10 }
0x121b   :  { %4547 = vmatprep.mubr.msk.f32.mxu0 %vm73_vm0, %v5930_v39 }
0x121c   :  { %4548 = vmatmul.mubr.msk.f32.vlgmr.msra.gmra.mrb[24].mxu0 %vm73_vm0, %v5932_v18 }
0x121e   :  { %v5259_v41 = vpop.eup %5258 }
0x121f   :  { %v5261_v42 = vpop.eup %5260  ;;  %v1930_v17 = vmul.f32 %v5259_v41, %v1898_v11 }
0x1220   :  { %v1929_v47 = vmul.f32 %v5261_v42, %v1897_v12 }
0x1221   :  { %v1940_v48 = vmul.f32 %v4043_v32, %v1930_v17 }
0x1222   :  { %v1939_v20 = vmul.f32 %v4043_v32, %v1929_v47 }
0x1223   :  { %v5940_v53 = vadd.f32 %v4044_v45, %v1940_v48 }
0x1224   :  { %v5938_v59 = vadd.f32 %v4044_v45, %v1939_v20 }
0x1226   :  { %4550 = vmatprep.mubr.msk.f32.mxu0 %vm73_vm0, %v5938_v59 }
0x1227   :  { %4551 = vmatmul.mubr.msk.f32.gmra.mrb[26].mxu0 %vm73_vm0, %v5940_v53 }
0x12ef   :  { %v4549_v50 = vpop.f32.mrb[24].mxu0 }
0x12f0   :  { %v5949_v19 = vadd.f32 %v4549_v50, %v4050_v49  ;;  %v2042_v51 = vpop.f32.mrb[25].mxu0 }
0x12f1   :  { %v5951_v52 = vadd.f32 %v4050_v49, %v2042_v51 }
0x12f3   :  { %4561 = vmatprep.mubr.msk.f32.mxu0 %vm271_vm1, %v5951_v52  ;;  %v5957_v54 = vpack.i.bf16 %v5949_v19, %v5951_v52 }
0x12f5   :  { %5087 = vrot.lane.b32.xlu0 %v5957_v54, %s5354_s0 }
0x12fa   :  { %v4552_v36 = vpop.f32.mrb[26].mxu0 }
0x12fb   :  { %v5961_v46 = vadd.f32 %v4552_v36, %v4050_v49  ;;  %v2052_v57 = vpop.f32.mrb[27].mxu0 }
0x12fc   :  { %v5963_v58 = vadd.f32 %v4050_v49, %v2052_v57 }
0x12fe   :  { %v5967_v61 = vpack.i.bf16 %v5961_v46, %v5963_v58 }
0x1300   :  { %5092 = vrot.lane.b32.xlu1 %v5967_v61, %s5354_s0 }
0x1367   :  { %v5088_v60 = vpop.permute.xlu0 %5087 }
0x1368   :  { %v5090_v63 = vunpack.i.h.bf16 %v5088_v60  ;;  %v5089_v62 = vunpack.i.l.bf16 %v5088_v60 }
0x136a   :  { %v4865_v0 = vpack.c.bf16 %v5090_v63, %v5089_v62 }
0x136c   :  { %4867 = vmatprep.subr.msk.bf16.mxu0 %vm5557_vm2, %v4865_v0 }
0x136d   :  { %4870 = vmatpush3.bf16.xpose.msk.msra.mxu0 %vm5557_vm2, %v4865_v0 }
0x1372   :  { %v5093_v1 = vpop.permute.xlu1 %5092 }
0x1373   :  { %v5095_v40 = vunpack.i.h.bf16 %v5093_v1  ;;  %v5094_v6 = vunpack.i.l.bf16 %v5093_v1 }
0x1375   :  { %v4871_v3 = vpack.c.bf16 %v5095_v40, %v5094_v6 }
0x1377   :  { %4873 = vmatprep.subr.msk.bf16.mxu0 %vm5557_vm2, %v4871_v3 }
0x1378   :  { %4876 = vmatpush3.bf16.xpose.msk.msra.mxu0 %vm5557_vm2, %v4871_v3 }
0x137f   :  { %4562 = vmatmul.mubr.msk.f32.vlgmr.msra.gmra.mrb[28].mxu0 %vm271_vm1, %v5949_v19 }
0x1380   :  { %4564 = vmatprep.mubr.msk.f32.mxu0 %vm271_vm1, %v5963_v58 }
0x1383   :  { %4565 = vmatmul.mubr.msk.f32.gmra.mrb[30].mxu0 %vm271_vm1, %v5961_v46 }
0x1452   :  { %v4563_v5 = vpop.f32.mrb[28].mxu0 }
0x1453   :  { %v2175_v8 = vmul.f32 0.35355338, %v4563_v5  ;;  %v2155_v11 = vpop.f32.mrb[29].mxu0 }
0x1454   :  { %v2174_v12 = vmul.f32 0.35355338, %v2155_v11 }
0x1455   :  { %v2179_v15 = vadd.f32 %v5988_v13, %v2175_v8 }
0x1456   :  { %v2178_v22 = vadd.f32 %v5994_v16, %v2174_v12  ;;  %v4566_v21 = vpop.f32.mrb[30].mxu0 }
0x1457   :  { %v2177_v24 = vmul.f32 0.35355338, %v4566_v21  ;;  %v2165_v23 = vpop.f32.mrb[31].mxu0  ;;  %v2185_v25 = vsel %vm73_vm0, %v2179_v15, -inf }
0x1458   :  { %v2176_v4 = vmul.f32 0.35355338, %v2165_v23  ;;  %2186 = vmax.xlane.f32.xlu0 %v2185_v25  ;;  %v2182_v55 = vsel %vm73_vm0, %v2178_v22, -inf }
0x1459   :  { %v2181_v56 = vadd.f32 %v6002_v26, %v2177_v24  ;;  %2183 = vmax.xlane.f32.xlu1 %v2182_v55 }
0x145a   :  { %v2180_v2 = vadd.f32 %v6008_v27, %v2176_v4 }
0x145b   :  { %v2191_v28 = vsel %vm73_vm0, %v2181_v56, -inf }
0x145c   :  { %v2188_v9 = vsel %vm73_vm0, %v2180_v2, -inf }
0x145d   :  { %2192 = vmax.xlane.f32.xlu1 %v2191_v28  ;;  %2189 = vmax.xlane.f32.xlu0 %v2188_v9 }
0x14e5   :  { %v2187_v33 = vpop.xlane.xlu0 %2186 }
0x14e6   :  { %v2195_v44 = vsub.f32 %v2179_v15, %v2187_v33  ;;  %v2184_v7 = vpop.xlane.xlu1 %2183 }
0x14e7   :  { %v2194_v30 = vsub.f32 %v2178_v22, %v2184_v7 }
0x14e8   :  { %v2200_v43 = vmul.f32 1.442695, %v2195_v44 }
0x14e9   :  { %v2198_v29 = vmul.f32 1.442695, %v2194_v30 }
0x14ea   :  { %5262 = vpow2.f32 %v2200_v43  ;;  %v2190_v37 = vpop.xlane.xlu0 %2189  ;;  %v2193_v38 = vpop.xlane.xlu1 %2192 }
0x14eb   :  { %5264 = vpow2.f32 %v2198_v29  ;;  %v2196_v45 = vsub.f32 %v2180_v2, %v2190_v37  ;;  %v2197_v41 = vsub.f32 %v2181_v56, %v2193_v38 }
0x14ed   :  { %v2202_v10 = vmul.f32 1.442695, %v2196_v45  ;;  %v2204_v42 = vmul.f32 1.442695, %v2197_v41 }
0x14ef   :  { %5266 = vpow2.f32 %v2202_v10 }
0x14f0   :  { %5268 = vpow2.f32 %v2204_v42 }
0x14f4   :  { %v5263_v31 = vpop.eup %5262 }
0x14f5   :  { %v5265_v32 = vpop.eup %5264  ;;  %v2209_v34 = vsel %vm73_vm0, %v5263_v31, 0.0 }
0x14f6   :  { %2210 = vadd.xlane.f32.xlu1 %v2209_v34  ;;  %v2206_v35 = vsel %vm73_vm0, %v5265_v32, 0.0 }
0x14f7   :  { %2207 = vadd.xlane.f32.xlu0 %v2206_v35 }
0x14f9   :  { %v5267_v17 = vpop.eup %5266 }
0x14fa   :  { %v2212_v47 = vsel %vm73_vm0, %v5267_v17, 0.0  ;;  %v5269_v48 = vpop.eup %5268 }
0x14fb   :  { %v2215_v20 = vsel %vm73_vm0, %v5269_v48, 0.0 }
0x1507   :  { %5102 = vrot.lane.b32.xlu1 %v5967_v61, %s5355_s26 }
0x150b   :  { %5107 = vrot.lane.b32.xlu1 %v5957_v54, %s5356_s27 }
0x150d   :  { %5097 = vrot.lane.b32.xlu0 %v5957_v54, %s5355_s26  ;;  %s6411_s26 = smov 80  }
0x150f   :  { %5112 = vrot.lane.b32.xlu1 %v5967_v61, %s5356_s27  ;;  %s6412_s27 = smov 112  }
0x152c   :  { %2213 = vadd.xlane.f32.xlu0 %v2212_v47 }
0x1533   :  { %2216 = vadd.xlane.f32.xlu1 %v2215_v20 }
0x1542   :  { %2335 = vrot.lane.b32.xlu0 %v5951_v52, %s5357_s28 }
0x1544   :  { %2337 = vrot.lane.b32.xlu1 %v5949_v19, %s5357_s28 }
0x1546   :  { %2339 = vrot.lane.b32.xlu0 %v5963_v58, %s5357_s28 }
0x1548   :  { %2341 = vrot.lane.b32.xlu1 %v5961_v46, %s5357_s28  ;;  %s6413_s28 = smov 48  }
0x1583   :  { %v2211_v49 = vpop.xlane.xlu1 %2210 }
0x1584   :  { %v2208_v50 = vpop.xlane.xlu0 %2207 }
0x1585   :  { %5270 = vrcp.f32 %v2208_v50 }
0x1586   :  { %5272 = vrcp.f32 %v2211_v49 }
0x1587   :  { %v5103_v51 = vpop.permute.xlu1 %5102 }
0x1588   :  { %v5098_v36 = vpop.permute.xlu0 %5097  ;;  %v5105_v57 = vunpack.i.h.bf16 %v5103_v51  ;;  %v5104_v60 = vunpack.i.l.bf16 %v5103_v51 }
0x1589   :  { %v5100_v63 = vunpack.i.h.bf16 %v5098_v36  ;;  %v5099_v62 = vunpack.i.l.bf16 %v5098_v36 }
0x158a   :  { %v4881_v40 = vpack.c.bf16 %v5105_v57, %v5104_v60 }
0x158b   :  { %v4877_v0 = vpack.c.bf16 %v5100_v63, %v5099_v62  ;;  %v5108_v1 = vpop.permute.xlu1 %5107 }
0x158c   :  { %v5110_v6 = vunpack.i.h.bf16 %v5108_v1  ;;  %v5109_v3 = vunpack.i.l.bf16 %v5108_v1 }
0x158d   :  { %4878 = vmatprep.subr.bf16.mxu1 %v4877_v0 }
0x158e   :  { %4880 = vmatpush3.bf16.msra.mxu1 %v4877_v0  ;;  %v4885_v12 = vpack.c.bf16 %v5110_v6, %v5109_v3 }
0x158f   :  { %v5271_v5 = vpop.eup %5270  ;;  %4882 = vmatprep.subr.bf16.mxu1 %v4881_v40  ;;  %v5113_v22 = vpop.permute.xlu1 %5112 }
0x1590   :  { %v5273_v8 = vpop.eup %5272  ;;  %v2219_v11 = vmul.f32 %v5271_v5, %v5265_v32  ;;  %v5115_v21 = vunpack.i.h.bf16 %v5113_v22  ;;  %v5114_v24 = vunpack.i.l.bf16 %v5113_v22 }
0x1591   :  { %v2221_v15 = vmul.f32 %v5273_v8, %v5263_v31 }
0x1592   :  { %4884 = vmatpush3.bf16.msra.mxu1 %v4881_v40  ;;  %4575 = vmatprep.mubr.msk.f32.mxu1 %vm73_vm0, %v2219_v11  ;;  %v4891_v23 = vpack.c.bf16 %v5115_v21, %v5114_v24 }
0x1593   :  { %4887 = vmatprep.subr.msk.bf16.mxu1 %vm5557_vm2, %v4885_v12 }
0x1595   :  { %4576 = vmatmul.mubr.msk.f32.vlgmr.msra.gmra.mrb[24].mxu1 %vm73_vm0, %v2221_v15 }
0x159b   :  { %4890 = vmatpush3.bf16.xpose.msk.msra.mxu1 %vm5557_vm2, %v4885_v12 }
0x159c   :  { %4893 = vmatprep.subr.msk.bf16.mxu1 %vm5557_vm2, %v4891_v23 }
0x15a3   :  { %4896 = vmatpush3.bf16.xpose.msk.msra.mxu1 %vm5557_vm2, %v4891_v23 }
0x15b9   :  { %v2214_v25 = vpop.xlane.xlu0 %2213 }
0x15ba   :  { %5274 = vrcp.f32 %v2214_v25 }
0x15bd   :  { %v2336_v28 = vpop.permute.xlu0 %2335 }
0x15c0   :  { %v2217_v4 = vpop.xlane.xlu1 %2216 }
0x15c1   :  { %5276 = vrcp.f32 %v2217_v4  ;;  %v2340_v44 = vpop.permute.xlu0 %2339 }
0x15c4   :  { %v5275_v55 = vpop.eup %5274  ;;  %v2338_v33 = vpop.permute.xlu1 %2337 }
0x15c5   :  { %v2223_v56 = vmul.f32 %v5275_v55, %v5267_v17 }
0x15c7   :  { %4578 = vmatprep.mubr.msk.f32.mxu1 %vm73_vm0, %v2223_v56 }
0x15c8   :  { %v2342_v7 = vpop.permute.xlu1 %2341 }
0x15cb   :  { %v5277_v2 = vpop.eup %5276 }
0x15cc   :  { %v2225_v9 = vmul.f32 %v5277_v2, %v5269_v48 }
0x15ce   :  { %4579 = vmatmul.mubr.msk.f32.gmra.mrb[26].mxu1 %vm73_vm0, %v2225_v9 }
0x15cf   :  { %4589 = vmatprep.mubr.msk.f32.mxu1 %vm271_vm1, %v2336_v28 }
0x15d2   :  { %4590 = vmatmul.mubr.msk.f32.vlgmr.msra.gmra.mrb[28].mxu1 %vm271_vm1, %v2338_v33 }
0x15d3   :  { %4592 = vmatprep.mubr.msk.f32.mxu1 %vm271_vm1, %v2340_v44 }
0x15d6   :  { %4593 = vmatmul.mubr.msk.f32.gmra.mrb[30].mxu1 %vm271_vm1, %v2342_v7 }
0x1668   :  { %v6049_v30 = vpop.f32.mrb[24].mxu1 }
0x1669   :  { %v6051_v43 = vpop.f32.mrb[25].mxu1 }
0x16a1   :  { %v6053_v29 = vpop.f32.mrb[26].mxu1 }
0x16a2   :  { %v6055_v31 = vpop.f32.mrb[27].mxu1 }
0x16a5   :  { %v4591_v32 = vpop.f32.mrb[28].mxu1 }
0x16a6   :  { %v2453_v34 = vmul.f32 0.35355338, %v4591_v32  ;;  %v2433_v35 = vpop.f32.mrb[29].mxu1 }
0x16a7   :  { %v2452_v37 = vmul.f32 0.35355338, %v2433_v35 }
0x16a8   :  { %v2457_v45 = vadd.f32 %v5988_v13, %v2453_v34 }
0x16a9   :  { %v2456_v38 = vadd.f32 %v5994_v16, %v2452_v37  ;;  %v4594_v10 = vpop.f32.mrb[30].mxu1 }
0x16aa   :  { %v2443_v41 = vpop.f32.mrb[31].mxu1  ;;  %v2463_v42 = vsel %vm73_vm0, %v2457_v45, -inf  ;;  %v2455_v17 = vmul.f32 0.35355338, %v4594_v10 }
0x16ab   :  { %v2454_v47 = vmul.f32 0.35355338, %v2443_v41  ;;  %2464 = vmax.xlane.f32.xlu1 %v2463_v42  ;;  %v2460_v48 = vsel %vm73_vm0, %v2456_v38, -inf }
0x16ac   :  { %2461 = vmax.xlane.f32.xlu0 %v2460_v48  ;;  %v2459_v49 = vadd.f32 %v6002_v26, %v2455_v17 }
0x16ad   :  { %v2458_v20 = vadd.f32 %v6008_v27, %v2454_v47 }
0x16ae   :  { %v2469_v51 = vsel %vm73_vm0, %v2459_v49, -inf }
0x16af   :  { %v2466_v50 = vsel %vm73_vm0, %v2458_v20, -inf }
0x16b0   :  { %2467 = vmax.xlane.f32.xlu0 %v2466_v50 }
0x16b4   :  { %2470 = vmax.xlane.f32.xlu0 %v2469_v51 }
0x1738   :  { %v2465_v36 = vpop.xlane.xlu1 %2464 }
0x1739   :  { %v2473_v57 = vsub.f32 %v2457_v45, %v2465_v36  ;;  %v2462_v60 = vpop.xlane.xlu0 %2461 }
0x173a   :  { %v2472_v63 = vsub.f32 %v2456_v38, %v2462_v60 }
0x173b   :  { %v2478_v62 = vmul.f32 1.442695, %v2473_v57 }
0x173c   :  { %v2476_v0 = vmul.f32 1.442695, %v2472_v63 }
0x173d   :  { %5278 = vpow2.f32 %v2478_v62  ;;  %v2468_v5 = vpop.xlane.xlu0 %2467 }
0x173e   :  { %5280 = vpow2.f32 %v2476_v0  ;;  %v2474_v8 = vsub.f32 %v2458_v20, %v2468_v5 }
0x1740   :  { %v2480_v11 = vmul.f32 1.442695, %v2474_v8 }
0x1741   :  { %v2471_v12 = vpop.xlane.xlu0 %2470 }
0x1742   :  { %v2475_v15 = vsub.f32 %v2459_v49, %v2471_v12  ;;  %5282 = vpow2.f32 %v2480_v11 }
0x1744   :  { %v2482_v22 = vmul.f32 1.442695, %v2475_v15 }
0x1746   :  { %5284 = vpow2.f32 %v2482_v22 }
0x1747   :  { %v5279_v1 = vpop.eup %5278 }
0x1748   :  { %v5281_v40 = vpop.eup %5280  ;;  %v2487_v6 = vsel %vm73_vm0, %v5279_v1, 0.0 }
0x1749   :  { %2488 = vadd.xlane.f32.xlu1 %v2487_v6  ;;  %v2484_v3 = vsel %vm73_vm0, %v5281_v40, 0.0 }
0x174a   :  { %2485 = vadd.xlane.f32.xlu0 %v2484_v3 }
0x174c   :  { %v5283_v21 = vpop.eup %5282 }
0x174d   :  { %v2490_v24 = vsel %vm73_vm0, %v5283_v21, 0.0 }
0x1750   :  { %v5285_v23 = vpop.eup %5284 }
0x1751   :  { %v2493_v25 = vsel %vm73_vm0, %v5285_v23, 0.0 }
0x175a   :  { %5122 = vrot.lane.b32.xlu1 %v5967_v61, %s6410_s1 }
0x175e   :  { %5127 = vrot.lane.b32.xlu1 %v5957_v54, %s6411_s26 }
0x1760   :  { %5117 = vrot.lane.b32.xlu0 %v5957_v54, %s6410_s1  ;;  %s6418_s1 = smov 24  }
0x1762   :  { %5132 = vrot.lane.b32.xlu1 %v5967_v61, %s6411_s26 }
0x177f   :  { %2491 = vadd.xlane.f32.xlu0 %v2490_v24 }
0x1786   :  { %2494 = vadd.xlane.f32.xlu1 %v2493_v25 }
0x1795   :  { %2613 = vrot.lane.b32.xlu0 %v5951_v52, %s6412_s27 }
0x1797   :  { %2615 = vrot.lane.b32.xlu1 %v5949_v19, %s6412_s27 }
0x1799   :  { %2617 = vrot.lane.b32.xlu0 %v5963_v58, %s6412_s27 }
0x179b   :  { %2619 = vrot.lane.b32.xlu1 %v5961_v46, %s6412_s27 }
0x17d6   :  { %v2489_v4 = vpop.xlane.xlu1 %2488 }
0x17d7   :  { %v2486_v55 = vpop.xlane.xlu0 %2485 }
0x17d8   :  { %5286 = vrcp.f32 %v2486_v55 }
0x17d9   :  { %5288 = vrcp.f32 %v2489_v4 }
0x17da   :  { %v5123_v56 = vpop.permute.xlu1 %5122 }
0x17db   :  { %v5118_v2 = vpop.permute.xlu0 %5117  ;;  %v5125_v28 = vunpack.i.h.bf16 %v5123_v56  ;;  %v5124_v9 = vunpack.i.l.bf16 %v5123_v56 }
0x17dc   :  { %v5120_v33 = vunpack.i.h.bf16 %v5118_v2  ;;  %v5119_v44 = vunpack.i.l.bf16 %v5118_v2 }
0x17dd   :  { %v4901_v34 = vpack.c.bf16 %v5125_v28, %v5124_v9 }
0x17de   :  { %v4897_v7 = vpack.c.bf16 %v5120_v33, %v5119_v44  ;;  %v5128_v32 = vpop.permute.xlu1 %5127 }
0x17df   :  { %v5130_v35 = vunpack.i.h.bf16 %v5128_v32  ;;  %v5129_v37 = vunpack.i.l.bf16 %v5128_v32 }
0x17e0   :  { %4898 = vmatprep.subr.bf16.mxu0 %v4897_v7 }
0x17e1   :  { %4900 = vmatpush3.bf16.msra.mxu0 %v4897_v7  ;;  %v4905_v41 = vpack.c.bf16 %v5130_v35, %v5129_v37 }
0x17e2   :  { %v5287_v45 = vpop.eup %5286  ;;  %4902 = vmatprep.subr.bf16.mxu0 %v4901_v34  ;;  %v5133_v17 = vpop.permute.xlu1 %5132 }
0x17e3   :  { %v5289_v38 = vpop.eup %5288  ;;  %v2497_v10 = vmul.f32 %v5287_v45, %v5281_v40  ;;  %v5135_v47 = vunpack.i.h.bf16 %v5133_v17  ;;  %v5134_v48 = vunpack.i.l.bf16 %v5133_v17 }
0x17e4   :  { %v2499_v42 = vmul.f32 %v5289_v38, %v5279_v1 }
0x17e5   :  { %4904 = vmatpush3.bf16.msra.mxu0 %v4901_v34  ;;  %4603 = vmatprep.mubr.msk.f32.mxu0 %vm73_vm0, %v2497_v10  ;;  %v4911_v20 = vpack.c.bf16 %v5135_v47, %v5134_v48 }
0x17e6   :  { %4907 = vmatprep.subr.msk.bf16.mxu0 %vm5557_vm2, %v4905_v41 }
0x17e8   :  { %4604 = vmatmul.mubr.msk.f32.vlgmr.msra.gmra.mrb[32].mxu0 %vm73_vm0, %v2499_v42 }
0x17ee   :  { %4910 = vmatpush3.bf16.xpose.msk.msra.mxu0 %vm5557_vm2, %v4905_v41 }
0x17ef   :  { %4913 = vmatprep.subr.msk.bf16.mxu0 %vm5557_vm2, %v4911_v20 }
0x17f6   :  { %4916 = vmatpush3.bf16.xpose.msk.msra.mxu0 %vm5557_vm2, %v4911_v20 }
0x180c   :  { %v2492_v49 = vpop.xlane.xlu0 %2491 }
0x180d   :  { %5290 = vrcp.f32 %v2492_v49 }
0x1810   :  { %v2614_v60 = vpop.permute.xlu0 %2613 }
0x1813   :  { %v2495_v50 = vpop.xlane.xlu1 %2494 }
0x1814   :  { %5292 = vrcp.f32 %v2495_v50  ;;  %v2618_v0 = vpop.permute.xlu0 %2617 }
0x1817   :  { %v5291_v51 = vpop.eup %5290  ;;  %v2616_v62 = vpop.permute.xlu1 %2615 }
0x1818   :  { %v2501_v36 = vmul.f32 %v5291_v51, %v5283_v21 }
0x181a   :  { %4606 = vmatprep.mubr.msk.f32.mxu0 %vm73_vm0, %v2501_v36 }
0x181b   :  { %v2620_v1 = vpop.permute.xlu1 %2619 }
0x181e   :  { %v5293_v57 = vpop.eup %5292 }
0x181f   :  { %v2503_v63 = vmul.f32 %v5293_v57, %v5285_v23 }
0x1821   :  { %4607 = vmatmul.mubr.msk.f32.gmra.mrb[34].mxu0 %vm73_vm0, %v2503_v63 }
0x1822   :  { %4617 = vmatprep.mubr.msk.f32.mxu0 %vm271_vm1, %v2614_v60 }
0x1825   :  { %4618 = vmatmul.mubr.msk.f32.vlgmr.msra.gmra.mrb[36].mxu0 %vm271_vm1, %v2616_v62 }
0x1826   :  { %4620 = vmatprep.mubr.msk.f32.mxu0 %vm271_vm1, %v2618_v0 }
0x1829   :  { %4621 = vmatmul.mubr.msk.f32.gmra.mrb[38].mxu0 %vm271_vm1, %v2620_v1 }
0x18bb   :  { %v6101_v40 = vpop.f32.mrb[32].mxu0 }
0x18bc   :  { %v6103_v6 = vpop.f32.mrb[33].mxu0 }
0x18f4   :  { %v6105_v3 = vpop.f32.mrb[34].mxu0 }
0x18f5   :  { %v6107_v5 = vpop.f32.mrb[35].mxu0 }
0x18f8   :  { %v4619_v8 = vpop.f32.mrb[36].mxu0 }
0x18f9   :  { %v2731_v11 = vmul.f32 0.35355338, %v4619_v8  ;;  %v2711_v12 = vpop.f32.mrb[37].mxu0 }
0x18fa   :  { %v2730_v15 = vmul.f32 0.35355338, %v2711_v12 }
0x18fb   :  { %v2735_v22 = vadd.f32 %v5988_v13, %v2731_v11 }
0x18fc   :  { %v2734_v21 = vadd.f32 %v5994_v16, %v2730_v15  ;;  %v4622_v24 = vpop.f32.mrb[38].mxu0 }
0x18fd   :  { %v2721_v23 = vpop.f32.mrb[39].mxu0  ;;  %v2741_v25 = vsel %vm73_vm0, %v2735_v22, -inf  ;;  %v2733_v4 = vmul.f32 0.35355338, %v4622_v24 }
0x18fe   :  { %v2732_v55 = vmul.f32 0.35355338, %v2721_v23  ;;  %2742 = vmax.xlane.f32.xlu1 %v2741_v25  ;;  %v2738_v56 = vsel %vm73_vm0, %v2734_v21, -inf }
0x18ff   :  { %2739 = vmax.xlane.f32.xlu0 %v2738_v56  ;;  %v2737_v28 = vadd.f32 %v6002_v26, %v2733_v4 }
0x1900   :  { %v2736_v2 = vadd.f32 %v6008_v27, %v2732_v55 }
0x1901   :  { %v2747_v33 = vsel %vm73_vm0, %v2737_v28, -inf }
0x1902   :  { %v2744_v9 = vsel %vm73_vm0, %v2736_v2, -inf }
0x1903   :  { %2745 = vmax.xlane.f32.xlu0 %v2744_v9 }
0x1907   :  { %2748 = vmax.xlane.f32.xlu0 %v2747_v33 }
0x198b   :  { %v2743_v44 = vpop.xlane.xlu1 %2742 }
0x198c   :  { %v2751_v7 = vsub.f32 %v2735_v22, %v2743_v44  ;;  %v2740_v32 = vpop.xlane.xlu0 %2739 }
0x198d   :  { %v2750_v34 = vsub.f32 %v2734_v21, %v2740_v32 }
0x198e   :  { %v2756_v35 = vmul.f32 1.442695, %v2751_v7 }
0x198f   :  { %v2754_v37 = vmul.f32 1.442695, %v2750_v34 }
0x1990   :  { %5294 = vpow2.f32 %v2756_v35  ;;  %v2746_v42 = vpop.xlane.xlu0 %2745 }
0x1991   :  { %5296 = vpow2.f32 %v2754_v37  ;;  %v2752_v17 = vsub.f32 %v2736_v2, %v2746_v42 }
0x1993   :  { %v2758_v47 = vmul.f32 1.442695, %v2752_v17 }
0x1994   :  { %v2749_v48 = vpop.xlane.xlu0 %2748 }
0x1995   :  { %v2753_v20 = vsub.f32 %v2737_v28, %v2749_v48  ;;  %5298 = vpow2.f32 %v2758_v47 }
0x1997   :  { %v2760_v49 = vmul.f32 1.442695, %v2753_v20 }
0x1999   :  { %5300 = vpow2.f32 %v2760_v49 }
0x199a   :  { %v5295_v45 = vpop.eup %5294 }
0x199b   :  { %v5297_v38 = vpop.eup %5296  ;;  %v2765_v10 = vsel %vm73_vm0, %v5295_v45, 0.0 }
0x199c   :  { %2766 = vadd.xlane.f32.xlu1 %v2765_v10  ;;  %v2762_v41 = vsel %vm73_vm0, %v5297_v38, 0.0 }
0x199d   :  { %2763 = vadd.xlane.f32.xlu0 %v2762_v41 }
0x199f   :  { %v5299_v50 = vpop.eup %5298 }
0x19a0   :  { %v2768_v51 = vsel %vm73_vm0, %v5299_v50, 0.0 }
0x19a3   :  { %v5301_v36 = vpop.eup %5300 }
0x19a4   :  { %v2771_v57 = vsel %vm73_vm0, %v5301_v36, 0.0 }
0x19ad   :  { %5142 = vrot.lane.b32.xlu1 %v5967_v61, %s6413_s28 }
0x19b1   :  { %5147 = vrot.lane.b32.xlu1 %v5957_v54, %s6414_s22 }
0x19b3   :  { %5137 = vrot.lane.b32.xlu0 %v5957_v54, %s6413_s28 }
0x19b5   :  { %5152 = vrot.lane.b32.xlu1 %v5967_v61, %s6414_s22 }
0x19d2   :  { %2769 = vadd.xlane.f32.xlu0 %v2768_v51 }
0x19d9   :  { %2772 = vadd.xlane.f32.xlu1 %v2771_v57 }
0x19e8   :  { %2891 = vrot.lane.b32.xlu0 %v5951_v52, %s6415_s23 }
0x19ea   :  { %2893 = vrot.lane.b32.xlu1 %v5949_v19, %s6415_s23 }
0x19ec   :  { %2895 = vrot.lane.b32.xlu0 %v5963_v58, %s6415_s23 }
0x19ee   :  { %2897 = vrot.lane.b32.xlu1 %v5961_v46, %s6415_s23 }
0x1a29   :  { %v2767_v60 = vpop.xlane.xlu1 %2766 }
0x1a2a   :  { %v2764_v63 = vpop.xlane.xlu0 %2763 }
0x1a2b   :  { %5302 = vrcp.f32 %v2764_v63 }
0x1a2c   :  { %5304 = vrcp.f32 %v2767_v60 }
0x1a2d   :  { %v5143_v62 = vpop.permute.xlu1 %5142 }
0x1a2e   :  { %v5138_v0 = vpop.permute.xlu0 %5137  ;;  %v5145_v1 = vunpack.i.h.bf16 %v5143_v62  ;;  %v5144_v8 = vunpack.i.l.bf16 %v5143_v62 }
0x1a2f   :  { %v5140_v11 = vunpack.i.h.bf16 %v5138_v0  ;;  %v5139_v12 = vunpack.i.l.bf16 %v5138_v0 }
0x1a30   :  { %v4921_v22 = vpack.c.bf16 %v5145_v1, %v5144_v8 }
0x1a31   :  { %v4917_v52 = vpack.c.bf16 %v5140_v11, %v5139_v12  ;;  %v5148_v15 = vpop.permute.xlu1 %5147 }
0x1a32   :  { %v5150_v19 = vunpack.i.h.bf16 %v5148_v15  ;;  %v5149_v21 = vunpack.i.l.bf16 %v5148_v15 }
0x1a33   :  { %4918 = vmatprep.subr.bf16.mxu1 %v4917_v52 }
0x1a34   :  { %4920 = vmatpush3.bf16.msra.mxu1 %v4917_v52  ;;  %v4925_v23 = vpack.c.bf16 %v5150_v19, %v5149_v21 }
0x1a35   :  { %v5303_v58 = vpop.eup %5302  ;;  %4922 = vmatprep.subr.bf16.mxu1 %v4921_v22  ;;  %v5153_v4 = vpop.permute.xlu1 %5152 }
0x1a36   :  { %v5305_v46 = vpop.eup %5304  ;;  %v2775_v24 = vmul.f32 %v5303_v58, %v5297_v38  ;;  %v5155_v55 = vunpack.i.h.bf16 %v5153_v4  ;;  %v5154_v56 = vunpack.i.l.bf16 %v5153_v4 }
0x1a37   :  { %v2777_v25 = vmul.f32 %v5305_v46, %v5295_v45 }
0x1a38   :  { %4924 = vmatpush3.bf16.msra.mxu1 %v4921_v22  ;;  %4631 = vmatprep.mubr.msk.f32.mxu1 %vm73_vm0, %v2775_v24  ;;  %v4931_v2 = vpack.c.bf16 %v5155_v55, %v5154_v56 }
0x1a39   :  { %4927 = vmatprep.subr.msk.bf16.mxu1 %vm5557_vm2, %v4925_v23 }
0x1a3b   :  { %4632 = vmatmul.mubr.msk.f32.vlgmr.msra.gmra.mrb[32].mxu1 %vm73_vm0, %v2777_v25 }
0x1a41   :  { %4930 = vmatpush3.bf16.xpose.msk.msra.mxu1 %vm5557_vm2, %v4925_v23 }
0x1a42   :  { %4933 = vmatprep.subr.msk.bf16.mxu1 %vm5557_vm2, %v4931_v2 }
0x1a49   :  { %4936 = vmatpush3.bf16.xpose.msk.msra.mxu1 %vm5557_vm2, %v4931_v2 }
0x1a5f   :  { %v2770_v28 = vpop.xlane.xlu0 %2769 }
0x1a60   :  { %5306 = vrcp.f32 %v2770_v28 }
0x1a63   :  { %v2892_v32 = vpop.permute.xlu0 %2891 }
0x1a66   :  { %v2773_v9 = vpop.xlane.xlu1 %2772 }
0x1a67   :  { %5308 = vrcp.f32 %v2773_v9  ;;  %v2896_v37 = vpop.permute.xlu0 %2895 }
0x1a6a   :  { %v5307_v33 = vpop.eup %5306  ;;  %v2894_v35 = vpop.permute.xlu1 %2893 }
0x1a6b   :  { %v2779_v44 = vmul.f32 %v5307_v33, %v5299_v50 }
0x1a6d   :  { %4634 = vmatprep.mubr.msk.f32.mxu1 %vm73_vm0, %v2779_v44 }
0x1a6e   :  { %v2898_v14 = vpop.permute.xlu1 %2897 }
0x1a71   :  { %v5309_v7 = vpop.eup %5308 }
0x1a72   :  { %v2781_v34 = vmul.f32 %v5309_v7, %v5301_v36 }
0x1a74   :  { %4635 = vmatmul.mubr.msk.f32.gmra.mrb[34].mxu1 %vm73_vm0, %v2781_v34 }
0x1a75   :  { %4645 = vmatprep.mubr.msk.f32.mxu1 %vm271_vm1, %v2892_v32 }
0x1a78   :  { %4646 = vmatmul.mubr.msk.f32.vlgmr.msra.gmra.mrb[36].mxu1 %vm271_vm1, %v2894_v35 }
0x1a79   :  { %4648 = vmatprep.mubr.msk.f32.mxu1 %vm271_vm1, %v2896_v37 }
0x1a7c   :  { %4649 = vmatmul.mubr.msk.f32.gmra.mrb[38].mxu1 %vm271_vm1, %v2898_v14 }
0x1b0e   :  { %v4633_v45 = vpop.f32.mrb[32].mxu1 }
0x1b0f   :  { %v2872_v38 = vpop.f32.mrb[33].mxu1 }
0x1b47   :  { %v4636_v10 = vpop.f32.mrb[34].mxu1 }
0x1b48   :  { %v2882_v41 = vpop.f32.mrb[35].mxu1 }
0x1b4b   :  { %v4647_v42 = vpop.f32.mrb[36].mxu1 }
0x1b4c   :  { %v3009_v17 = vmul.f32 0.35355338, %v4647_v42  ;;  %v2989_v47 = vpop.f32.mrb[37].mxu1  ;;  %v4103_v42 = vld [vmem:[%s6362_s6 + $0x20] sm:$0xff] }
0x1b4d   :  { %v3008_v48 = vmul.f32 0.35355338, %v2989_v47  ;;  %v4105_v47 = vld [vmem:[%s6362_s6 + $0x30] sm:$0xff] }
0x1b4e   :  { %v3013_v20 = vadd.f32 %v5988_v13, %v3009_v17  ;;  %v4104_v17 = vld [vmem:[%s6362_s6 + $0x28] sm:$0xff] }
0x1b4f   :  { %v3012_v49 = vadd.f32 %v5994_v16, %v3008_v48  ;;  %v4650_v50 = vpop.f32.mrb[38].mxu1  ;;  %v4945_v48 = vpack.c.bf16 %v4104_v17, %v4103_v42 }
0x1b50   :  { %v2999_v51 = vpop.f32.mrb[39].mxu1  ;;  %v3019_v36 = vsel %vm73_vm0, %v3013_v20, -inf  ;;  %v3011_v57 = vmul.f32 0.35355338, %v4650_v50 }
0x1b51   :  { %v3010_v60 = vmul.f32 0.35355338, %v2999_v51  ;;  %3020 = vmax.xlane.f32.xlu1 %v3019_v36  ;;  %v3016_v63 = vsel %vm73_vm0, %v3012_v49, -inf }
0x1b52   :  { %3017 = vmax.xlane.f32.xlu0 %v3016_v63  ;;  %v3015_v0 = vadd.f32 %v6002_v26, %v3011_v57 }
0x1b53   :  { %v3014_v62 = vadd.f32 %v6008_v27, %v3010_v60 }
0x1b54   :  { %v3025_v13 = vsel %vm73_vm0, %v3015_v0, -inf }
0x1b55   :  { %v3022_v1 = vsel %vm73_vm0, %v3014_v62, -inf }
0x1b56   :  { %3023 = vmax.xlane.f32.xlu0 %v3022_v1 }
0x1b5a   :  { %3026 = vmax.xlane.f32.xlu0 %v3025_v13 }
0x1bde   :  { %v3021_v16 = vpop.xlane.xlu1 %3020 }
0x1bdf   :  { %v3029_v8 = vsub.f32 %v3013_v20, %v3021_v16  ;;  %v3018_v11 = vpop.xlane.xlu0 %3017  ;;  %v4106_v20 = vld [vmem:[%s6362_s6 + $0x38] sm:$0xff] }
0x1be0   :  { %v3028_v12 = vsub.f32 %v3012_v49, %v3018_v11  ;;  %v4949_v49 = vpack.c.bf16 %v4106_v20, %v4105_v47 }
0x1be1   :  { %v3034_v52 = vmul.f32 1.442695, %v3029_v8 }
0x1be2   :  { %v3032_v15 = vmul.f32 1.442695, %v3028_v12 }
0x1be3   :  { %5310 = vpow2.f32 %v3034_v52  ;;  %v3024_v22 = vpop.xlane.xlu0 %3023 }
0x1be4   :  { %5312 = vpow2.f32 %v3032_v15  ;;  %v3030_v19 = vsub.f32 %v3014_v62, %v3024_v22 }
0x1be6   :  { %v3036_v21 = vmul.f32 1.442695, %v3030_v19 }
0x1be7   :  { %v3027_v27 = vpop.xlane.xlu0 %3026 }
0x1be8   :  { %5314 = vpow2.f32 %v3036_v21  ;;  %v3031_v26 = vsub.f32 %v3015_v0, %v3027_v27 }
0x1bea   :  { %v3038_v58 = vmul.f32 1.442695, %v3031_v26 }
0x1bec   :  { %5316 = vpow2.f32 %v3038_v58 }
0x1bed   :  { %v5311_v46 = vpop.eup %5310 }
0x1bee   :  { %v5313_v24 = vpop.eup %5312  ;;  %v3043_v23 = vsel %vm73_vm0, %v5311_v46, 0.0 }
0x1bef   :  { %3044 = vadd.xlane.f32.xlu1 %v3043_v23  ;;  %v3040_v25 = vsel %vm73_vm0, %v5313_v24, 0.0 }
0x1bf0   :  { %3041 = vadd.xlane.f32.xlu0 %v3040_v25 }
0x1bf2   :  { %v5315_v4 = vpop.eup %5314 }
0x1bf3   :  { %v3046_v55 = vsel %vm73_vm0, %v5315_v4, 0.0 }
0x1bf4   :  { %3047 = vadd.xlane.f32.xlu0 %v3046_v55 }
0x1bf6   :  { %v5317_v56 = vpop.eup %5316 }
0x1bf7   :  { %v3049_v2 = vsel %vm73_vm0, %v5317_v56, 0.0 }
0x1bf8   :  { %3050 = vadd.xlane.f32.xlu1 %v3049_v2 }
0x1c09   :  { %5162 = vrot.lane.b32.xlu1 %v5967_v61, %s6416_s24 }
0x1c0a   :  { %5157 = vrot.lane.b32.xlu0 %v5957_v54, %s6416_s24 }
0x1c0d   :  { %3173 = vrot.lane.b32.xlu1 %v6103_v6, %s6417_s30 }
0x1c0e   :  { %3189 = vrot.lane.b32.xlu0 %v2872_v38, %s5366_s3 }
0x1c11   :  { %3175 = vrot.lane.b32.xlu1 %v6101_v40, %s6417_s30 }
0x1c12   :  { %3177 = vrot.lane.b32.xlu0 %v6107_v5, %s6417_s30 }
0x1c15   :  { %3191 = vrot.lane.b32.xlu1 %v4633_v45, %s5366_s3 }
0x1c16   :  { %3193 = vrot.lane.b32.xlu0 %v2882_v41, %s5366_s3 }
0x1c19   :  { %3179 = vrot.lane.b32.xlu1 %v6105_v3, %s6417_s30 }
0x1c1d   :  { %3195 = vrot.lane.b32.xlu1 %v4636_v10, %s5366_s3 }
0x1c7c   :  { %v3045_v61 = vpop.xlane.xlu1 %3044 }
0x1c7d   :  { %v3042_v54 = vpop.xlane.xlu0 %3041 }
0x1c7e   :  { %5318 = vrcp.f32 %v3042_v54 }
0x1c7f   :  { %5320 = vrcp.f32 %v3045_v61 }
0x1c81   :  { %v3048_v6 = vpop.xlane.xlu0 %3047 }
0x1c82   :  { %5322 = vrcp.f32 %v3048_v6 }
0x1c85   :  { %v3051_v28 = vpop.xlane.xlu1 %3050  ;;  %v5158_v40 = vpop.permute.xlu0 %5157 }
0x1c86   :  { %v5160_v9 = vunpack.i.h.bf16 %v5158_v40  ;;  %v5159_v33 = vunpack.i.l.bf16 %v5158_v40  ;;  %5324 = vrcp.f32 %v3051_v28 }
0x1c88   :  { %v5319_v5 = vpop.eup %5318  ;;  %v4937_v44 = vpack.c.bf16 %v5160_v9, %v5159_v33 }
0x1c89   :  { %v5163_v7 = vpop.permute.xlu1 %5162  ;;  %v3053_v32 = vmul.f32 %v5319_v5, %v5313_v24  ;;  %v5321_v37 = vpop.eup %5320 }
0x1c8a   :  { %v5165_v34 = vunpack.i.h.bf16 %v5163_v7  ;;  %v5164_v35 = vunpack.i.l.bf16 %v5163_v7  ;;  %4938 = vmatprep.subr.bf16.mxu0 %v4937_v44  ;;  %v3055_v45 = vmul.f32 %v5321_v37, %v5311_v46  ;;  %v3190_v0 = vpop.permute.xlu0 %3189 }
0x1c8b   :  { %4940 = vmatpush3.bf16.msra.mxu0 %v4937_v44  ;;  %4659 = vmatprep.mubr.msk.f32.mxu0 %vm73_vm0, %v3053_v32 }
0x1c8c   :  { %v4941_v3 = vpack.c.bf16 %v5165_v34, %v5164_v35  ;;  %v5323_v14 = vpop.eup %5322 }
0x1c8d   :  { %v3057_v10 = vmul.f32 %v5323_v14, %v5315_v4  ;;  %v3174_v60 = vpop.permute.xlu1 %3173 }
0x1c8e   :  { %4942 = vmatprep.subr.bf16.mxu0 %v4941_v3  ;;  %v3178_v13 = vpop.permute.xlu0 %3177  ;;  %v3217_v11 = vsel %vm271_vm1, %v6051_v43, %v3174_v60  ;;  %v4119_v60 = vld [vmem:[%s6364_s10 + $0x30] sm:$0xff] }
0x1c8f   :  { %4944 = vmatpush3.bf16.msra.mxu0 %v4941_v3  ;;  %v3221_v15 = vsel %vm1420_vm3, %v3217_v11, %v3190_v0  ;;  %v3219_v26 = vsel %vm271_vm1, %v6055_v31, %v3178_v13  ;;  %v4108_v31 = vld [vmem:[%s6363_s7 + $0x1] ss:$0 sm:$0xff] }
0x1c90   :  { %v5325_v38 = vpop.eup %5324  ;;  %4946 = vmatprep.subr.bf16.mxu0 %v4945_v48 }
0x1c91   :  { %v3059_v41 = vmul.f32 %v5325_v38, %v5317_v56  ;;  %v3176_v63 = vpop.permute.xlu1 %3175 }
0x1c92   :  { %4660 = vmatmul.mubr.msk.f32.vlgmr.msra.gmra.mrb[40].mxu0 %vm73_vm0, %v3055_v45  ;;  %v3194_v8 = vpop.permute.xlu0 %3193  ;;  %v3218_v52 = vsel %vm271_vm1, %v6049_v30, %v3176_v63  ;;  %v4120_v63 = vld [vmem:[%s6364_s10 + $0x38] sm:$0xff] }
0x1c93   :  { %4662 = vmatprep.mubr.msk.f32.mxu0 %vm73_vm0, %v3057_v10  ;;  %4948 = vmatpush3.bf16.msra.mxu0 %v4945_v48  ;;  %v3223_v58 = vsel %vm1420_vm3, %v3219_v26, %v3194_v8  ;;  %v4115_v26 = vld [vmem:[%s6365_s8 + $0x1] ss:$0 sm:$0xff] }
0x1c94   :  { %4950 = vmatprep.subr.bf16.mxu0 %v4949_v49 }
0x1c95   :  { %v3192_v62 = vpop.permute.xlu1 %3191 }
0x1c96   :  { %4663 = vmatmul.mubr.msk.f32.gmra.mrb[42].mxu0 %vm73_vm0, %v3059_v41  ;;  %v3222_v19 = vsel %vm1420_vm3, %v3218_v52, %v3192_v62  ;;  %v4957_v62 = vpack.c.bf16 %v4120_v63, %v4119_v60 }
0x1c97   :  { %4952 = vmatpush3.bf16.msra.mxu0 %v4949_v49 }
0x1c99   :  { %v3180_v1 = vpop.permute.xlu1 %3179 }
0x1c9a   :  { %v3220_v30 = vsel %vm271_vm1, %v6053_v29, %v3180_v1 }
0x1c9d   :  { %v3196_v16 = vpop.permute.xlu1 %3195 }
0x1c9e   :  { %v3224_v24 = vsel %vm1420_vm3, %v3220_v30, %v3196_v16 }
0x1d65   :  { %v4661_v50 = vpop.f32.mrb[40].mxu0 }
0x1d66   :  { %3207 = vrot.lane.b32.xlu1 %v4661_v50, %s6418_s1  ;;  %v3150_v51 = vpop.f32.mrb[41].mxu0 }
0x1d67   :  { %3205 = vrot.lane.b32.xlu0 %v3150_v51, %s6418_s1  ;;  %v4117_v51 = vld [vmem:[%s6364_s10 + $0x20] sm:$0xff] }
0x1d69   :  { %v4664_v36 = vpop.f32.mrb[42].mxu0 }
0x1d6a   :  { %3211 = vrot.lane.b32.xlu1 %v4664_v36, %s6418_s1  ;;  %v3160_v57 = vpop.f32.mrb[43].mxu0  ;;  %v4118_v36 = vld [vmem:[%s6364_s10 + $0x28] sm:$0xff] }
0x1d6b   :  { %3209 = vrot.lane.b32.xlu0 %v3160_v57, %s6418_s1  ;;  %v4953_v57 = vpack.c.bf16 %v4118_v36, %v4117_v51 }
0x1d6d   :  { %4954 = vmatprep.subr.bf16.mxu1 %v4953_v57 }
0x1d6e   :  { %4956 = vmatpush3.bf16.msra.mxu1 %v4953_v57 }
0x1d6f   :  { %4958 = vmatprep.subr.bf16.mxu1 %v4957_v62 }
0x1d72   :  { %4960 = vmatpush3.bf16.msra.mxu1 %v4957_v62 }
0x1dd8   :  { %v3208_v12 = vpop.permute.xlu1 %3207 }
0x1dd9   :  { %v3206_v22 = vpop.permute.xlu0 %3205  ;;  %v3226_v27 = vsel %vm1425_vm4, %v3222_v19, %v3208_v12 }
0x1dda   :  { %v3225_v21 = vsel %vm1425_vm4, %v3221_v15, %v3206_v22 }
0x1ddb   :  { %4673 = vmatprep.mubr.msk.f32.mxu0 %vm73_vm0, %v3225_v21 }
0x1ddc   :  { %4674 = vmatmul.mubr.msk.f32.vlgmr.msra.gmra.mrb[44].mxu0 %vm73_vm0, %v3226_v27  ;;  %v3212_v43 = vpop.permute.xlu1 %3211 }
0x1ddd   :  { %v3210_v46 = vpop.permute.xlu0 %3209  ;;  %v3228_v25 = vsel %vm1425_vm4, %v3224_v24, %v3212_v43 }
0x1dde   :  { %v3227_v23 = vsel %vm1425_vm4, %v3223_v58, %v3210_v46  ;;  %v4116_v46 = vld [vmem:[%s6366_s9 + $0x1] ss:$0 sm:$0xff] }
0x1ddf   :  { %4676 = vmatprep.mubr.msk.f32.mxu0 %vm73_vm0, %v3227_v23 }
0x1de0   :  { %4677 = vmatmul.mubr.msk.f32.gmra.mrb[46].mxu0 %vm73_vm0, %v3228_v25 }
0x1eaf   :  { %v4675_v4 = vpop.f32.mrb[44].mxu0 }
0x1eb0   :  { %v3326_v55 = vadd.f32 %v4675_v4, %v4108_v31  ;;  %v3320_v56 = vpop.f32.mrb[45].mxu0 }
0x1eb1   :  { %v3321_v2 = vadd.f32 %v4108_v31, %v3320_v56 }
0x1eb2   :  { %v3340_v29 = vadd.f32 %v3326_v55, %v5932_v18 }
0x1eb3   :  { %v3339_v54 = vadd.f32 %v3321_v2, %v5930_v39  ;;  %v4678_v61 = vpop.f32.mrb[46].mxu0 }
0x1eb4   :  { %v3330_v6 = vpop.f32.mrb[47].mxu0  ;;  %v3350_v28 = vsel %vm73_vm0, %v3340_v29, 0.0  ;;  %v3336_v40 = vadd.f32 %v4678_v61, %v4108_v31 }
0x1eb5   :  { %v3331_v9 = vadd.f32 %v4108_v31, %v3330_v6  ;;  %3351 = vadd.xlane.f32.xlu1 %v3350_v28  ;;  %v3347_v33 = vsel %vm73_vm0, %v3339_v54, 0.0  ;;  %v4127_v28 = vld [vmem:[%s6367_s12 + $0x40] sm:$0xff] }
0x1eb6   :  { %3348 = vadd.xlane.f32.xlu0 %v3347_v33  ;;  %v3342_v44 = vadd.f32 %v3336_v40, %v5940_v53  ;;  %v4128_v40 = vld [vmem:[%s6367_s12 + $0x48] sm:$0xff]  ;;  %v4129_v33 = vld [vmem:[%s6367_s12 + $0x50] sm:$0xff] }
0x1eb7   :  { %v3341_v5 = vadd.f32 %v3331_v9, %v5938_v59  ;;  %v4961_v9 = vpack.c.bf16 %v4128_v40, %v4127_v28 }
0x1eb8   :  { %v3356_v18 = vsel %vm73_vm0, %v3342_v44, 0.0 }
0x1eb9   :  { %v3353_v7 = vsel %vm73_vm0, %v3341_v5, 0.0  ;;  %4962 = vmatprep.subr.bf16.mxu0 %v4961_v9 }
0x1eba   :  { %3354 = vadd.xlane.f32.xlu0 %v3353_v7  ;;  %4964 = vmatpush3.bf16.msra.mxu0 %v4961_v9  ;;  %v4131_v7 = vld [vmem:[%s6367_s12 + $0x60] sm:$0xff] }
0x1ebe   :  { %3357 = vadd.xlane.f32.xlu0 %v3356_v18  ;;  %v4132_v18 = vld [vmem:[%s6367_s12 + $0x68] sm:$0xff] }
0x1f42   :  { %v3352_v39 = vpop.xlane.xlu1 %3351 }
0x1f43   :  { %v3360_v32 = vmul.f32 0.03125, %v3352_v39  ;;  %v3349_v34 = vpop.xlane.xlu0 %3348  ;;  %v4969_v39 = vpack.c.bf16 %v4132_v18, %v4131_v7 }
0x1f44   :  { %v3359_v35 = vmul.f32 0.03125, %v3349_v34  ;;  %v4134_v34 = vld [vmem:[%s6367_s12 + $0x78] sm:$0xff] }
0x1f45   :  { %v3364_v3 = vsub.f32 %v3340_v29, %v3360_v32  ;;  %v4133_v32 = vld [vmem:[%s6367_s12 + $0x70] sm:$0xff] }
0x1f46   :  { %v3363_v37 = vsub.f32 %v3339_v54, %v3359_v35  ;;  %v4973_v35 = vpack.c.bf16 %v4134_v34, %v4133_v32 }
0x1f47   :  { %v3355_v14 = vpop.xlane.xlu0 %3354  ;;  %v3368_v45 = vmul.f32 %v3364_v3, %v3364_v3 }
0x1f48   :  { %v3361_v38 = vmul.f32 0.03125, %v3355_v14  ;;  %v3367_v10 = vmul.f32 %v3363_v37, %v3363_v37 }
0x1f49   :  { %v3374_v59 = vsel %vm73_vm0, %v3368_v45, 0.0 }
0x1f4a   :  { %v3365_v41 = vsub.f32 %v3341_v5, %v3361_v38  ;;  %3375 = vadd.xlane.f32.xlu1 %v3374_v59  ;;  %v3371_v53 = vsel %vm73_vm0, %v3367_v10, 0.0  ;;  %v4130_v5 = vld [vmem:[%s6367_s12 + $0x58] sm:$0xff] }
0x1f4b   :  { %3372 = vadd.xlane.f32.xlu0 %v3371_v53  ;;  %v3358_v42 = vpop.xlane.xlu0 %3357 }
0x1f4c   :  { %v3362_v17 = vmul.f32 0.03125, %v3358_v42  ;;  %v3369_v47 = vmul.f32 %v3365_v41, %v3365_v41 }
0x1f4e   :  { %v3366_v48 = vsub.f32 %v3342_v44, %v3362_v17  ;;  %v3377_v20 = vsel %vm73_vm0, %v3369_v47, 0.0  ;;  %v4965_v44 = vpack.c.bf16 %v4130_v5, %v4129_v33 }
0x1f4f   :  { %3378 = vadd.xlane.f32.xlu0 %v3377_v20 }
0x1f50   :  { %v3370_v49 = vmul.f32 %v3366_v48, %v3366_v48  ;;  %4966 = vmatprep.subr.bf16.mxu0 %v4965_v44 }
0x1f51   :  { %4968 = vmatpush3.bf16.msra.mxu0 %v4965_v44 }
0x1f52   :  { %v3380_v50 = vsel %vm73_vm0, %v3370_v49, 0.0  ;;  %4970 = vmatprep.subr.bf16.mxu0 %v4969_v39 }
0x1f53   :  { %3381 = vadd.xlane.f32.xlu1 %v3380_v50 }
0x1f55   :  { %4972 = vmatpush3.bf16.msra.mxu0 %v4969_v39 }
0x1f56   :  { %4974 = vmatprep.subr.bf16.mxu0 %v4973_v35 }
0x1f59   :  { %4976 = vmatpush3.bf16.msra.mxu0 %v4973_v35 }
0x1fd7   :  { %v3376_v0 = vpop.xlane.xlu1 %3375 }
0x1fd8   :  { %v3384_v1 = vmul.f32 0.03125, %v3376_v0  ;;  %v3373_v13 = vpop.xlane.xlu0 %3372 }
0x1fd9   :  { %v3383_v16 = vmul.f32 0.03125, %v3373_v13 }
0x1fda   :  { %v3388_v8 = vadd.f32 1e-12, %v3384_v1 }
0x1fdb   :  { %v3387_v11 = vadd.f32 1e-12, %v3383_v16 }
0x1fdc   :  { %5326 = vrsqrt.f32 %v3388_v8  ;;  %v3379_v12 = vpop.xlane.xlu0 %3378 }
0x1fdd   :  { %5328 = vrsqrt.f32 %v3387_v11  ;;  %v3385_v52 = vmul.f32 0.03125, %v3379_v12 }
0x1fdf   :  { %v3389_v15 = vadd.f32 1e-12, %v3385_v52 }
0x1fe0   :  { %v3382_v22 = vpop.xlane.xlu1 %3381 }
0x1fe1   :  { %5330 = vrsqrt.f32 %v3389_v15  ;;  %v3386_v19 = vmul.f32 0.03125, %v3382_v22 }
0x1fe3   :  { %v3390_v21 = vadd.f32 1e-12, %v3386_v19 }
0x1fe5   :  { %5332 = vrsqrt.f32 %v3390_v21 }
0x1fe6   :  { %v5327_v27 = vpop.eup %5326 }
0x1fe7   :  { %v5329_v43 = vpop.eup %5328  ;;  %v3396_v58 = vmul.f32 %v5327_v27, %v3364_v3  ;;  %v4122_v3 = vld [vmem:[%s6368_s11 + $0x1] ss:$0 sm:$0xff] }
0x1fe8   :  { %v3395_v30 = vmul.f32 %v5329_v43, %v3363_v37 }
0x1fe9   :  { %v3406_v24 = vmul.f32 %v4115_v26, %v3396_v58 }
0x1fea   :  { %v3405_v23 = vmul.f32 %v4115_v26, %v3395_v30 }
0x1feb   :  { %v5331_v25 = vpop.eup %5330  ;;  %v6256_v55 = vadd.f32 %v4116_v46, %v3406_v24 }
0x1fec   :  { %v6254_v31 = vadd.f32 %v4116_v46, %v3405_v23  ;;  %v3397_v4 = vmul.f32 %v5331_v25, %v3365_v41 }
0x1fee   :  { %4687 = vmatprep.mubr.msk.f32.mxu1 %vm73_vm0, %v6254_v31  ;;  %v3407_v56 = vmul.f32 %v4115_v26, %v3397_v4 }
0x1fef   :  { %v5333_v2 = vpop.eup %5332  ;;  %4688 = vmatmul.mubr.msk.f32.vlgmr.msra.gmra.mrb[40].mxu1 %vm73_vm0, %v6256_v55 }
0x1ff0   :  { %v6262_v29 = vadd.f32 %v4116_v46, %v3407_v56  ;;  %v3398_v54 = vmul.f32 %v5333_v2, %v3366_v48  ;;  %v4136_v2 = vld [vmem:[%s6369_s13 + $0x1] ss:$0 sm:$0xff] }
0x1ff2   :  { %4690 = vmatprep.mubr.msk.f32.mxu1 %vm73_vm0, %v6262_v29  ;;  %v3408_v61 = vmul.f32 %v4115_v26, %v3398_v54 }
0x1ff4   :  { %v6266_v6 = vadd.f32 %v4116_v46, %v3408_v61 }
0x1ff6   :  { %4691 = vmatmul.mubr.msk.f32.gmra.mrb[42].mxu1 %vm73_vm0, %v6266_v6 }
0x20c2   :  { %v4689_v37 = vpop.f32.mrb[40].mxu1 }
0x20c3   :  { %v3516_v14 = vadd.f32 %v4689_v37, %v4122_v3  ;;  %v3510_v45 = vpop.f32.mrb[41].mxu1 }
0x20c4   :  { %v3511_v38 = vadd.f32 %v4122_v3, %v3510_v45 }
0x20c5   :  { %v3530_v10 = vmul.f32 %v3516_v14, %v3516_v14 }
0x20c6   :  { %v3529_v59 = vmul.f32 %v3511_v38, %v3511_v38 }
0x20c7   :  { %v3534_v41 = vmul.f32 %v3530_v10, %v3516_v14 }
0x20c8   :  { %v3533_v53 = vmul.f32 %v3529_v59, %v3511_v38 }
0x20c9   :  { %v3538_v42 = vmul.f32 0.044715, %v3534_v41  ;;  %v4692_v17 = vpop.f32.mrb[42].mxu1 }
0x20ca   :  { %v3537_v47 = vmul.f32 0.044715, %v3533_v53  ;;  %v3526_v48 = vadd.f32 %v4692_v17, %v4122_v3  ;;  %v3520_v20 = vpop.f32.mrb[43].mxu1 }
0x20cb   :  { %v3542_v49 = vadd.f32 %v3538_v42, %v3516_v14  ;;  %v3521_v50 = vadd.f32 %v4122_v3, %v3520_v20 }
0x20cc   :  { %v3541_v51 = vadd.f32 %v3537_v47, %v3511_v38  ;;  %v3532_v36 = vmul.f32 %v3526_v48, %v3526_v48 }
0x20cd   :  { %v3546_v57 = vmul.f32 0.7978846, %v3542_v49  ;;  %v3531_v60 = vmul.f32 %v3521_v50, %v3521_v50 }
0x20ce   :  { %v3545_v63 = vmul.f32 0.7978846, %v3541_v51  ;;  %v3536_v62 = vmul.f32 %v3532_v36, %v3526_v48 }
0x20cf   :  { %5334 = vtanh.f32 %v3546_v57  ;;  %v3535_v0 = vmul.f32 %v3531_v60, %v3521_v50  ;;  %v5368_v57 = vmov 0.0|0.0   ;;  %v5370_v60 = vmov 0.0  }
0x20d0   :  { %5336 = vtanh.f32 %v3545_v63  ;;  %v3540_v1 = vmul.f32 0.044715, %v3536_v62  ;;  %4977 = vmatprep.subr.bf16.mxu1 %v5368_v57  ;;  %4723 = vmatprep.mubr.msk.f32.mxu1 %vm5369_vm6, %v5370_v60 }
0x20d1   :  { %v3539_v13 = vmul.f32 0.044715, %v3535_v0 }
0x20d2   :  { %v3544_v16 = vadd.f32 %v3540_v1, %v3526_v48 }
0x20d3   :  { %v3543_v8 = vadd.f32 %v3539_v13, %v3521_v50 }
0x20d4   :  { %v3548_v11 = vmul.f32 0.7978846, %v3544_v16 }
0x20d5   :  { %v3547_v12 = vmul.f32 0.7978846, %v3543_v8 }
0x20d6   :  { %5338 = vtanh.f32 %v3548_v11 }
0x20d7   :  { %5340 = vtanh.f32 %v3547_v12 }
0x20d9   :  { %v5335_v52 = vpop.eup %5334 }
0x20da   :  { %v5337_v15 = vpop.eup %5336  ;;  %v3554_v22 = vadd.f32 1.0, %v5335_v52 }
0x20db   :  { %v3553_v19 = vadd.f32 1.0, %v5337_v15 }
0x20dc   :  { %v3558_v21 = vmul.f32 0.5, %v3554_v22 }
0x20dd   :  { %v3557_v27 = vmul.f32 0.5, %v3553_v19 }
0x20de   :  { %v3562_v58 = vmul.f32 %v3558_v21, %v3516_v14  ;;  %v4143_v21 = vld [vmem:[%s6370_s14 + $0x1] ss:$0 sm:$0xff] }
0x20df   :  { %v3561_v26 = vmul.f32 %v3557_v27, %v3511_v38 }
0x20e0   :  { %v5339_v43 = vpop.eup %5338 }
0x20e1   :  { %v5341_v30 = vpop.eup %5340  ;;  %4709 = vmatprep.mubr.msk.f32.mxu0 %vm1775_vm5, %v3561_v26  ;;  %v3556_v46 = vadd.f32 1.0, %v5339_v43 }
0x20e2   :  { %4710 = vmatmul.mubr.msk.f32.vlgmr.msra.gmra.mrb[48].mxu0 %vm1775_vm5, %v3562_v58  ;;  %v3555_v24 = vadd.f32 1.0, %v5341_v30  ;;  %v4144_v58 = vld [vmem:[%s6371_s15 + $0x1] ss:$0 sm:$0xff]  ;;  %v3759_v30 = vlaneseq }
0x20e3   :  { %v3560_v23 = vmul.f32 0.5, %v3556_v46 }
0x20e4   :  { %v3559_v25 = vmul.f32 0.5, %v3555_v24 }
0x20e5   :  { %v3564_v56 = vmul.f32 %v3560_v23, %v3526_v48 }
0x20e6   :  { %v3563_v4 = vmul.f32 %v3559_v25, %v3521_v50 }
0x20e8   :  { %4712 = vmatprep.mubr.msk.f32.mxu0 %vm1775_vm5, %v3563_v4  ;;  %v3760_v4 = vshrl.u32 %v3759_v30, 7 }
0x20e9   :  { %4713 = vmatmul.mubr.msk.f32.gmra.mrb[50].mxu0 %vm1775_vm5, %v3564_v56 }
0x21b5   :  { %v4711_v54 = vpop.f32.mrb[48].mxu0 }
0x21b6   :  { %v3666_v61 = vadd.f32 %v4711_v54, %v4136_v2  ;;  %v3660_v28 = vpop.f32.mrb[49].mxu0 }
0x21b7   :  { %v3661_v40 = vadd.f32 %v4136_v2, %v3660_v28 }
0x21b8   :  { %v3680_v9 = vadd.f32 %v3666_v61, %v6256_v55 }
0x21b9   :  { %v3679_v33 = vadd.f32 %v3661_v40, %v6254_v31 }
0x21ba   :  { %v3690_v5 = vsel %vm73_vm0, %v3680_v9, 0.0 }
0x21bb   :  { %3691 = vadd.xlane.f32.xlu1 %v3690_v5  ;;  %v3687_v44 = vsel %vm73_vm0, %v3679_v33, 0.0 }
0x21bc   :  { %3688 = vadd.xlane.f32.xlu0 %v3687_v44  ;;  %v4714_v7 = vpop.f32.mrb[50].mxu0 }
0x21bd   :  { %v3676_v18 = vadd.f32 %v4714_v7, %v4136_v2  ;;  %v3670_v39 = vpop.f32.mrb[51].mxu0 }
0x21be   :  { %v3671_v32 = vadd.f32 %v4136_v2, %v3670_v39  ;;  %v3841_v39 = vld [vmem:[%s6372_s16 + $0x8] sm:$0xff] }
0x21bf   :  { %v3682_v34 = vadd.f32 %v3676_v18, %v6266_v6  ;;  %v3840_v18 = vld [vmem:[%s6372_s16] sm:$0xff] }
0x21c0   :  { %v3681_v35 = vadd.f32 %v3671_v32, %v6262_v29 }
0x21c1   :  { %v3696_v3 = vsel %vm73_vm0, %v3682_v34, 0.0 }
0x21c2   :  { %3697 = vadd.xlane.f32.xlu1 %v3696_v3  ;;  %v3693_v55 = vsel %vm73_vm0, %v3681_v35, 0.0  ;;  %v3842_v3 = vld [vmem:[%s6372_s16 + $0x10] sm:$0xff] }
0x21c3   :  { %3694 = vadd.xlane.f32.xlu0 %v3693_v55  ;;  %v3843_v55 = vld [vmem:[%s6372_s16 + $0x18] sm:$0xff] }
0x2248   :  { %v3692_v31 = vpop.xlane.xlu1 %3691 }
0x2249   :  { %v3700_v37 = vmul.f32 0.03125, %v3692_v31  ;;  %v3689_v14 = vpop.xlane.xlu0 %3688  ;;  %v4987_v31 = vpack.c.bf16 %v3843_v55, %v3842_v3 }
0x224a   :  { %v3699_v45 = vmul.f32 0.03125, %v3689_v14 }
0x224b   :  { %v3704_v38 = vsub.f32 %v3680_v9, %v3700_v37  ;;  %v3762_v9 = vand.u32 127, %v3759_v30 }
0x224c   :  { %v3703_v10 = vsub.f32 %v3679_v33, %v3699_v45  ;;  %v3763_v33 = vmul.u32 8, %v3760_v4  ;;  %v25_v45 = vstv %s6373_s19 }
0x224d   :  { %v3708_v59 = vmul.f32 %v3704_v38, %v3704_v38  ;;  %26 = vst [vmem:[#allocation2] sm:$0x1] %v25_v45 }
0x224e   :  { %v3707_v41 = vmul.f32 %v3703_v10, %v3703_v10  ;;  %vm3764_vm7 = vcmp.eq.s32.totalorder %v3762_v9, %v3763_v33 }
0x224f   :  { %v3698_v53 = vpop.xlane.xlu1 %3697  ;;  %v3714_v42 = vsel %vm73_vm0, %v3708_v59, 0.0 }
0x2250   :  { %v3702_v6 = vmul.f32 0.03125, %v3698_v53  ;;  %3715 = vadd.xlane.f32.xlu1 %v3714_v42  ;;  %v3695_v29 = vpop.xlane.xlu0 %3694  ;;  %v3711_v17 = vsel %vm73_vm0, %v3707_v41, 0.0  ;;  %v4150_v53 = vld [vmem:[%s6375_s18 + $0x1] ss:$0 sm:$0xff] }
0x2251   :  { %v3701_v47 = vmul.f32 0.03125, %v3695_v29  ;;  %3712 = vadd.xlane.f32.xlu0 %v3711_v17  ;;  %v4149_v29 = vld [vmem:[%s6375_s18] ss:$0 sm:$0xff] }
0x2252   :  { %v3706_v48 = vsub.f32 %v3682_v34, %v3702_v6  ;;  %v4145_v34 = vsel %vm3764_vm7, 1.0, %v5370_v60 }
0x2253   :  { %v3705_v20 = vsub.f32 %v3681_v35, %v3701_v47  ;;  %v4984_v35 = vpack.c.bf16 %v3841_v39, %v3840_v18 }
0x2254   :  { %v3710_v49 = vmul.f32 %v3706_v48, %v3706_v48 }
0x2255   :  { %v3709_v50 = vmul.f32 %v3705_v20, %v3705_v20 }
0x2256   :  { %v3720_v51 = vsel %vm73_vm0, %v3710_v49, 0.0 }
0x2257   :  { %3721 = vadd.xlane.f32.xlu1 %v3720_v51  ;;  %v3717_v36 = vsel %vm73_vm0, %v3709_v50, 0.0 }
0x2258   :  { %3718 = vadd.xlane.f32.xlu0 %v3717_v36 }
0x22dd   :  { %v3716_v63 = vpop.xlane.xlu1 %3715 }
0x22de   :  { %v3724_v62 = vmul.f32 0.03125, %v3716_v63  ;;  %v3713_v0 = vpop.xlane.xlu0 %3712  ;;  %v4152_v63 = vld [vmem:[#allocation2] ss:$0 sm:$0xff] }
0x22df   :  { %v3723_v1 = vmul.f32 0.03125, %v3713_v0 }
0x22e0   :  { %v3728_v13 = vadd.f32 1e-12, %v3724_v62 }
0x22e1   :  { %v3727_v16 = vadd.f32 1e-12, %v3723_v1 }
0x22e2   :  { %5342 = vrsqrt.f32 %v3728_v13 }
0x22e3   :  { %5344 = vrsqrt.f32 %v3727_v16 }
0x22e4   :  { %v3722_v8 = vpop.xlane.xlu1 %3721 }
0x22e5   :  { %v3726_v11 = vmul.f32 0.03125, %v3722_v8  ;;  %v3719_v12 = vpop.xlane.xlu0 %3718 }
0x22e6   :  { %v3725_v52 = vmul.f32 0.03125, %v3719_v12 }
0x22e7   :  { %v3730_v15 = vadd.f32 1e-12, %v3726_v11 }
0x22e8   :  { %v3729_v22 = vadd.f32 1e-12, %v3725_v52 }
0x22e9   :  { %5346 = vrsqrt.f32 %v3730_v15 }
0x22ea   :  { %5348 = vrsqrt.f32 %v3729_v22 }
0x22ec   :  { %v5343_v19 = vpop.eup %5342 }
0x22ed   :  { %v5345_v27 = vpop.eup %5344  ;;  %v3736_v26 = vmul.f32 %v5343_v19, %v3704_v38  ;;  %v4147_v38 = vld [vmem:[%s6374_s17] ss:$0 sm:$0xff] }
0x22ee   :  { %v3735_v43 = vmul.f32 %v5345_v27, %v3703_v10 }
0x22ef   :  { %v3746_v46 = vmul.f32 %v4143_v21, %v3736_v26 }
0x22f0   :  { %v3745_v24 = vmul.f32 %v4143_v21, %v3735_v43 }
0x22f1   :  { %v3756_v23 = vadd.f32 %v4144_v58, %v3746_v46 }
0x22f2   :  { %v3755_v25 = vadd.f32 %v4144_v58, %v3745_v24 }
0x22f3   :  { %v5347_v56 = vpop.eup %5346 }
0x22f4   :  { %v5349_v2 = vpop.eup %5348  ;;  %v3738_v54 = vmul.f32 %v5347_v56, %v3706_v48  ;;  %v4978_v61 = vpack.c.bf16 %v3756_v23, %v3755_v25  ;;  %v4151_v48 = vld [vmem:[%s6375_s18 + $0x2] ss:$0 sm:$0xff] }
0x22f5   :  { %v3737_v28 = vmul.f32 %v5349_v2, %v3705_v20 }
0x22f6   :  { %4979 = vmatpush3.bf16.msra.mxu1 %v4978_v61  ;;  %v3748_v40 = vmul.f32 %v4143_v21, %v3738_v54 }
0x22f7   :  { %4980 = vmatprep.subr.bf16.mxu1 %v5368_v57  ;;  %v3747_v5 = vmul.f32 %v4143_v21, %v3737_v28 }
0x22f8   :  { %v3758_v44 = vadd.f32 %v4144_v58, %v3748_v40 }
0x22f9   :  { %v3757_v7 = vadd.f32 %v4144_v58, %v3747_v5 }
0x22fb   :  { %v4981_v32 = vpack.c.bf16 %v3758_v44, %v3757_v7 }
0x22fd   :  { %4982 = vmatpush3.bf16.msra.mxu1 %v4981_v32 }
0x22fe   :  { %4983 = vmatprep.subr.bf16.mxu1 %v5368_v57 }
0x2300   :  { %4724 = vmatmul.mubr.msk.f32.vlgmr.msra.gmra.mrb[44].mxu1 %vm73_vm0, %v4145_v34 }
0x2301   :  { %4985 = vmatpush3.bf16.msra.mxu1 %v4984_v35  ;;  %4734 = vmatprep.mubr.msk.f32.mxu1 %vm5369_vm6, %v5370_v60 }
0x2302   :  { %4986 = vmatprep.subr.bf16.mxu1 %v5368_v57 }
0x2305   :  { %4988 = vmatpush3.bf16.msra.mxu1 %v4987_v31 }
0x23d3   :  { %v3836_v37 = vpop.f32.mrb[44].mxu1 }
0x23d4   :  { %v4725_v14 = vpop.f32.mrb[45].mxu1  ;;  %4735 = vmatmul.mubr.msk.f32.vlgmr.msra.gmra.mrb[46].mxu1 %vm73_vm0, %v3836_v37 }
0x24a7   :  { %v3920_v10 = vpop.f32.mrb[46].mxu1 }
0x24a8   :  { %v3921_v59 = vadd.f32 %v4147_v38, %v3920_v10  ;;  %v4736_v41 = vpop.f32.mrb[47].mxu1 }
0x24aa   :  { %v3925_v42 = vrot.slane %v3921_v59, 2  ;;  %v3928_v6 = vmax.f32 %v3921_v59, 0.0 }
0x24ac   :  { %v3927_v17 = vmul.f32 %v3925_v42, %v3921_v59  ;;  %v3941_v47 = vmul.f32 %v4150_v53, %v3928_v6  ;;  %v3935_v49 = vmul.f32 %v4149_v29, %v3928_v6 }
0x24ae   :  { %v3929_v20 = vmax.f32 %v3927_v17, 0.0  ;;  %v3943_v50 = vrot.slane %v3941_v47, 2 }
0x24b0   :  { %v3945_v51 = vadd.f32 %v3943_v50, %v3935_v49  ;;  %v3951_v36 = vmul.f32 %v4151_v48, %v3929_v20 }
0x24b2   :  { %v3952_v57 = vadd.f32 %v3951_v36, %v3945_v51 }
0x24b4   :  { %v3954_v60 = vsel %vm3953_vm8, %v3952_v57, 0.0 }
0x24b5   :  { %3955 = vadd.xlane.f32.xlu0 %v3954_v60 }
0x2542   :  { %v3956_v62 = vpop.xlane.xlu0 %3955 }
0x2543   :  { %v3964_v0 = vadd.f32 %v4152_v63, %v3956_v62 }
0x2545   :  { %3966 = vst.msk [vmem:[%s6376_s20] sm:$0x3] %vm3965_vm9, %v3964_v0 }

</bundles_post_ra>
